<compile_context>
chip_gen: v7x
topology: tpu7x:2x2x1
jax: 0.10.0
libtpu: 0.0.40
codegen_flags: <defaults>
</compile_context>

<pallas_src>
import functools
import math

import jax
import jax.numpy as jnp
from jax import lax
from jax.experimental import pallas as pl
from jax.experimental.pallas import tpu as pltpu

_LN_EPS = 1e-5


def _layer_norm(x, gamma, beta):
    mean = jnp.mean(x, axis=-1, keepdims=True)
    xc = x - mean
    var = jnp.mean(xc * xc, axis=-1, keepdims=True)
    return xc * lax.rsqrt(var + _LN_EPS) * gamma + beta


def _gelu_tanh(x):
    c = 0.7978845608028654  # sqrt(2/pi)
    return 0.5 * x * (1.0 + jnp.tanh(c * (x + 0.044715 * x * x * x)))


def _surface_encoder_kernel(
        x_ref, we1_ref, be1_ref, we2_ref, be2_ref,
        wattn_ref,   # (1, 4, D, D)  bf16: [wq*scale, wk, wv, wo]
        wf1_ref,     # (1, D, 4D)    bf16
        wf2_ref,     # (1, 4D, D)    bf16
        bvec_ref,    # (1, 9, D)     f32: [bq*scale, bk, bv, bo, g1, bt1, g2, bt2, bf2]
        bf1_ref,     # (1, 1, 4D)    f32
        o_ref,       # (N, D)        f32, VMEM-resident activation slab
        *, num_heads, compute_dtype):
    layer = pl.program_id(0)
    d_model = o_ref.shape[1]
    head_dim = d_model // num_heads
    cd = compute_dtype

    # Layer 0 also runs the point-embedding MLP; its result seeds the
    # activation slab held in o_ref for the rest of the grid.
    @pl.when(layer == 0)
    def _embed():
        h = jnp.dot(x_ref[...].astype(cd), we1_ref[...],
                    preferred_element_type=jnp.float32) + be1_ref[...]
        h = jnp.maximum(h, 0.0)
        o_ref[...] = jnp.dot(h.astype(cd), we2_ref[...],
                             preferred_element_type=jnp.float32) + be2_ref[...]

    src = o_ref[...]                       # (N, D) f32, resident
    src_c = src.astype(cd)

    b = bvec_ref[0]                        # (9, D) f32
    bq, bk, bv, bo = b[0:1, :], b[1:2, :], b[2:3, :], b[3:4, :]
    g1, bt1 = b[4:5, :], b[5:6, :]
    g2, bt2 = b[6:7, :], b[7:8, :]
    bf2 = b[8:9, :]

    # ---- full-width projections (Q pre-scaled by 1/sqrt(hd) at pack time) ----
    q = jnp.dot(src_c, wattn_ref[0, 0], preferred_element_type=jnp.float32) + bq
    k = jnp.dot(src_c, wattn_ref[0, 1], preferred_element_type=jnp.float32) + bk
    v = jnp.dot(src_c, wattn_ref[0, 2], preferred_element_type=jnp.float32) + bv
    q_c, k_c, v_c = q.astype(cd), k.astype(cd), v.astype(cd)

    # ---- per-head score / softmax / PV core on lane slices ----
    head_outs = []
    for h in range(num_heads):
        lo = h * head_dim
        qh = q_c[:, lo:lo + head_dim]
        kh = k_c[:, lo:lo + head_dim]
        vh = v_c[:, lo:lo + head_dim]
        s = lax.dot_general(qh, kh, (((1,), (1,)), ((), ())),
                            preferred_element_type=jnp.float32)        # (N, N)
        s = s - jnp.max(s, axis=-1, keepdims=True)
        p = jnp.exp(s)
        p = p * pl.reciprocal(jnp.sum(p, axis=-1, keepdims=True), approx=True)
        head_outs.append(jnp.dot(p.astype(cd), vh,
                                 preferred_element_type=jnp.float32))  # (N, hd)
    ctx = jnp.concatenate(head_outs, axis=-1)                          # (N, D)

    # single full-width output projection
    attn = jnp.dot(ctx.astype(cd), wattn_ref[0, 3],
                   preferred_element_type=jnp.float32) + bo

    # residual + post-norm (dropout = identity in inference mode)
    x1 = _layer_norm(src + attn, g1, bt1)

    # ---- feed-forward D -> 4D -> D with GELU ----
    f = jnp.dot(x1.astype(cd), wf1_ref[0],
                preferred_element_type=jnp.float32) + bf1_ref[0]
    f = _gelu_tanh(f)
    f = jnp.dot(f.astype(cd), wf2_ref[0],
                preferred_element_type=jnp.float32) + bf2

    o_ref[...] = _layer_norm(x1 + f, g2, bt2)


def _vmem_limit_bytes():
    """Generation-aware VMEM limit: ~48 MiB on v7x, ~96 MiB on v5e/v6e."""
    try:
        cap = int(pltpu.get_tpu_info().vmem_capacity_bytes)
    except Exception:
        cap = 64 * 1024 * 1024
    return max(32 * 1024 * 1024, min(cap - cap // 4, 100 * 1024 * 1024))


def surface_encoder(x, kp, *, num_heads):
    """Pallas forward. `kp` is the packed (fused/consolidated) parameter dict."""
    n, input_dim = x.shape
    num_layers = kp["wattn"].shape[0]
    d_model = kp["wattn"].shape[2]
    d_ff = kp["wf1"].shape[2]
    compute_dtype = kp["wattn"].dtype

    def full(shape):
        zeros = (0,) * len(shape)
        return pl.BlockSpec(tuple(shape), lambda l: zeros)

    def per_layer(shape):
        zeros = (0,) * len(shape)
        return pl.BlockSpec((1,) + tuple(shape), lambda l: (l,) + zeros)

    # Advisory cost estimate.
    per_layer_flops = (8 * n * d_model * d_model      # q,k,v,out projections
                       + 4 * n * n * d_model          # scores + attn@V
                       + 4 * n * d_model * d_ff)      # FFN
    flops = (2 * n * input_dim * d_model + 2 * n * d_model * d_model
             + num_layers * per_layer_flops)
    transcendentals = num_layers * (num_heads * n * n + n * d_ff + 4 * n)
    bytes_accessed = int(
        x.size * x.dtype.itemsize
        + sum(int(v.size) * v.dtype.itemsize for v in kp.values())
        + 2 * n * d_model * 4)

    kernel = functools.partial(_surface_encoder_kernel,
                               num_heads=num_heads,
                               compute_dtype=compute_dtype)

    out = pl.pallas_call(
        kernel,
        out_shape=jax.ShapeDtypeStruct((n, d_model), jnp.float32),
        grid_spec=pltpu.PrefetchScalarGridSpec(
            num_scalar_prefetch=0,
            grid=(num_layers,),
            in_specs=[
                full((n, input_dim)),
                full((input_dim, d_model)), full((1, d_model)),
                full((d_model, d_model)), full((1, d_model)),
                per_layer((4, d_model, d_model)),
                per_layer((d_model, d_ff)),
                per_layer((d_ff, d_model)),
                per_layer((9, d_model)),
                per_layer((1, d_ff)),
            ],
            out_specs=pl.BlockSpec((n, d_model), lambda l: (0, 0)),
        ),
        compiler_params=pltpu.CompilerParams(
            # Layer axis carries state (output block revisited) -> arbitrary.
            dimension_semantics=("arbitrary",),
            vmem_limit_bytes=_vmem_limit_bytes(),
        ),
        cost_estimate=pl.CostEstimate(
            flops=int(flops),
            transcendentals=int(transcendentals),
            bytes_accessed=bytes_accessed,
        ),
    )(x,
      kp["we1"], kp["be1"], kp["we2"], kp["be2"],
      kp["wattn"], kp["wf1"], kp["wf2"], kp["bvec"], kp["bf1"])
    return out


def init_params(key, input_dim, d_model, num_layers):
    """Natural (PyTorch-like) parameter layout; weights are (in, out), f32."""
    d_ff = 4 * d_model
    keys = iter(jax.random.split(key, 32))

    def lin(fin, fout, leading=()):
        bound = 1.0 / math.sqrt(fin)
        w = jax.random.uniform(next(keys), leading + (fin, fout),
                               jnp.float32, -bound, bound)
        b = jax.random.uniform(next(keys), leading + (1, fout),
                               jnp.float32, -bound, bound)
        return w, b

    L = (num_layers,)
    we1, be1 = lin(input_dim, d_model)
    we2, be2 = lin(d_model, d_model)
    wq, bq = lin(d_model, d_model, L)
    wk, bk = lin(d_model, d_model, L)
    wv, bv = lin(d_model, d_model, L)
    wo, bo = lin(d_model, d_model, L)
    wf1, bf1 = lin(d_model, d_ff, L)
    wf2, bf2 = lin(d_ff, d_model, L)
    ones = jnp.ones((num_layers, 1, d_model), jnp.float32)
    zeros = jnp.zeros((num_layers, 1, d_model), jnp.float32)
    return dict(we1=we1, be1=be1, we2=we2, be2=be2,
                wq=wq, bq=bq, wk=wk, bk=bk, wv=wv, bv=bv, wo=wo, bo=bo,
                g1=ones, bt1=zeros, wf1=wf1, bf1=bf1, wf2=wf2, bf2=bf2,
                g2=ones, bt2=zeros)


def pack_params(params, num_heads, compute_dtype=jnp.bfloat16):
    """One-time weight packing: fuse/stack per-layer tensors, fold the
    1/sqrt(head_dim) score scale into wq/bq, cast matmul weights to bf16."""
    L, D, _ = params["wq"].shape
    hd = D // num_heads
    scale = 1.0 / math.sqrt(hd)

    wq_s = params["wq"] * scale
    bq_s = params["bq"] * scale
    wattn = jnp.stack([wq_s, params["wk"], params["wv"], params["wo"]],
                      axis=1).astype(compute_dtype)                 # (L,4,D,D)
    bvec = jnp.concatenate(
        [bq_s, params["bk"], params["bv"], params["bo"],
         params["g1"], params["bt1"], params["g2"], params["bt2"],
         params["bf2"]], axis=1)                                    # (L,9,D) f32
    return dict(
        we1=params["we1"].astype(compute_dtype), be1=params["be1"],
        we2=params["we2"].astype(compute_dtype), be2=params["be2"],
        wattn=wattn,
        wf1=params["wf1"].astype(compute_dtype),
        wf2=params["wf2"].astype(compute_dtype),
        bvec=bvec,
        bf1=params["bf1"],
    )


def surface_encoder_ref(x, params, *, num_heads, compute_dtype=jnp.float32):
    """Pure-JAX reference mirroring the PyTorch forward (eval mode).
    Matmul operands are cast to `compute_dtype` (f32 accumulation) so the
    comparison against the bf16 kernel is like-for-like."""
    cd = compute_dtype

    def mm(a, w):
        return jnp.dot(a.astype(cd), w.astype(cd),
                       preferred_element_type=jnp.float32)

    h = jnp.maximum(mm(x, params["we1"]) + params["be1"], 0.0)
    h = mm(h, params["we2"]) + params["be2"]
    num_layers, d, _ = params["wq"].shape
    hd = d // num_heads
    scale = 1.0 / math.sqrt(hd)
    for l in range(num_layers):
        q = mm(h, params["wq"][l] * scale) + params["bq"][l] * scale
        k = mm(h, params["wk"][l]) + params["bk"][l]
        v = mm(h, params["wv"][l]) + params["bv"][l]
        heads = []
        for i in range(num_heads):
            sl = slice(i * hd, (i + 1) * hd)
            s = mm(q[:, sl], k[:, sl].T)
            heads.append(mm(jax.nn.softmax(s, axis=-1), v[:, sl]))
        attn = mm(jnp.concatenate(heads, axis=-1), params["wo"][l]) + params["bo"][l]
        x1 = _layer_norm(h + attn, params["g1"][l], params["bt1"][l])
        f = _gelu_tanh(mm(x1, params["wf1"][l]) + params["bf1"][l])
        f = mm(f, params["wf2"][l]) + params["bf2"][l]
        h = _layer_norm(x1 + f, params["g2"][l], params["bt2"][l])
    return h


if __name__ == "__main__":
    # Small but lane-friendly shapes: d_model = 128 (one full lane tile),
    # N multiple of 8, head_dim = 32.
    N, input_dim, d_model, n_head, num_layers = 64, 6, 128, 4, 2
    assert d_model % n_head == 0

    key = jax.random.PRNGKey(0)
    kparams_key, kx = jax.random.split(key)

    params = init_params(kparams_key, input_dim, d_model, num_layers)
    kparams = pack_params(params, n_head, compute_dtype=jnp.bfloat16)
    x = jax.random.normal(kx, (N, input_dim), jnp.float32)

    out = surface_encoder(x, kparams, num_heads=n_head)
    out = jax.block_until_ready(out)

    ref = surface_encoder_ref(x, params, num_heads=n_head,
                              compute_dtype=jnp.bfloat16)
    assert out.shape == (N, d_model)
    assert bool(jnp.allclose(out, ref, atol=2e-2, rtol=2e-2)), \
        "mismatch vs reference"

    print("KERNEL_OK")
</pallas_src>

<mosaic_0001>
module attributes {stable_mosaic.version = 11 : i64} {
  func.func @_surface_encoder_kernel(%arg0: i32, %arg1: memref<64x6xf32, #tpu.memory_space<vmem>>, %arg2: memref<6x128xbf16, #tpu.memory_space<vmem>>, %arg3: memref<1x128xf32, #tpu.memory_space<vmem>>, %arg4: memref<128x128xbf16, #tpu.memory_space<vmem>>, %arg5: memref<1x128xf32, #tpu.memory_space<vmem>>, %arg6: memref<1x4x128x128xbf16, #tpu.memory_space<vmem>>, %arg7: memref<1x128x512xbf16, #tpu.memory_space<vmem>>, %arg8: memref<1x512x128xbf16, #tpu.memory_space<vmem>>, %arg9: memref<1x9x128xf32, #tpu.memory_space<vmem>>, %arg10: memref<1x1x512xf32, #tpu.memory_space<vmem>>, %arg11: memref<64x128xf32, #tpu.memory_space<vmem>>) attributes {dimension_semantics = [#tpu.dimension_semantics<arbitrary>], iteration_bounds = array<i64: 2>, scalar_prefetch = 0 : i64, scratch_operands = 0 : i64, tpu.core_type = #tpu.core_type<tc>, window_params = [{pipeline_mode = #tpu.pipeline_mode<synchronous>, transform_indices = @transform_0, window_bounds = array<i64: 64, 6>}, {pipeline_mode = #tpu.pipeline_mode<synchronous>, transform_indices = @transform_1, window_bounds = array<i64: 6, 128>}, {pipeline_mode = #tpu.pipeline_mode<synchronous>, transform_indices = @transform_2, window_bounds = array<i64: 1, 128>}, {pipeline_mode = #tpu.pipeline_mode<synchronous>, transform_indices = @transform_3, window_bounds = array<i64: 128, 128>}, {pipeline_mode = #tpu.pipeline_mode<synchronous>, transform_indices = @transform_4, window_bounds = array<i64: 1, 128>}, {transform_indices = @transform_5, window_bounds = array<i64: 1, 4, 128, 128>}, {transform_indices = @transform_6, window_bounds = array<i64: 1, 128, 512>}, {transform_indices = @transform_7, window_bounds = array<i64: 1, 512, 128>}, {transform_indices = @transform_8, window_bounds = array<i64: 1, 9, 128>}, {transform_indices = @transform_9, window_bounds = array<i64: 1, 1, 512>}, {pipeline_mode = #tpu.pipeline_mode<synchronous>, transform_indices = @transform_10, window_bounds = array<i64: 64, 128>}]} {
    %c0_i32 = arith.constant 0 : i32
    %0 = arith.cmpi eq, %arg0, %c0_i32 : i32
    %1 = arith.extui %0 : i1 to i32
    %c0_i32_0 = arith.constant 0 : i32
    %2 = arith.cmpi ne, %1, %c0_i32_0 : i32
    scf.if %2 {
      %c0_64 = arith.constant 0 : index
      %c0_65 = arith.constant 0 : index
      %175 = vector.load %arg1[%c0_64, %c0_65] : memref<64x6xf32, #tpu.memory_space<vmem>>, vector<64x6xf32>
      %176 = arith.truncf %175 : vector<64x6xf32> to vector<64x6xbf16>
      %c0_66 = arith.constant 0 : index
      %c0_67 = arith.constant 0 : index
      %177 = vector.load %arg2[%c0_66, %c0_67] : memref<6x128xbf16, #tpu.memory_space<vmem>>, vector<6x128xbf16>
      %cst_68 = arith.constant dense<0.000000e+00> : vector<64x128xf32>
      %178 = tpu.matmul %176, %177, %cst_68 {dimension_numbers = #tpu.dot_dimension_numbers<[1], [0], [0], [1], [0, 0, 1, 1], [], []>} : vector<64x6xbf16>, vector<6x128xbf16>, vector<64x128xf32> -> vector<64x128xf32>
      %c0_69 = arith.constant 0 : index
      %c0_70 = arith.constant 0 : index
      %179 = vector.load %arg3[%c0_69, %c0_70] : memref<1x128xf32, #tpu.memory_space<vmem>>, vector<1x128xf32>
      %180 = vector.broadcast %179 : vector<1x128xf32> to vector<64x128xf32>
      %181 = arith.addf %178, %180 : vector<64x128xf32>
      %cst_71 = arith.constant 0.000000e+00 : f32
      %182 = vector.broadcast %cst_71 : f32 to vector<64x128xf32>
      %183 = arith.maximumf %181, %182 : vector<64x128xf32>
      %184 = arith.truncf %183 : vector<64x128xf32> to vector<64x128xbf16>
      %c0_72 = arith.constant 0 : index
      %c0_73 = arith.constant 0 : index
      %185 = vector.load %arg4[%c0_72, %c0_73] : memref<128x128xbf16, #tpu.memory_space<vmem>>, vector<128x128xbf16>
      %cst_74 = arith.constant dense<0.000000e+00> : vector<64x128xf32>
      %186 = tpu.matmul %184, %185, %cst_74 {dimension_numbers = #tpu.dot_dimension_numbers<[1], [0], [0], [1], [0, 0, 1, 1], [], []>} : vector<64x128xbf16>, vector<128x128xbf16>, vector<64x128xf32> -> vector<64x128xf32>
      %c0_75 = arith.constant 0 : index
      %c0_76 = arith.constant 0 : index
      %187 = vector.load %arg5[%c0_75, %c0_76] : memref<1x128xf32, #tpu.memory_space<vmem>>, vector<1x128xf32>
      %188 = vector.broadcast %187 : vector<1x128xf32> to vector<64x128xf32>
      %189 = arith.addf %186, %188 : vector<64x128xf32>
      %c0_77 = arith.constant 0 : index
      %c0_78 = arith.constant 0 : index
      %190 = vector.load %arg11[%c0_77, %c0_78] : memref<64x128xf32, #tpu.memory_space<vmem>>, vector<64x128xf32>
      tpu.vector_store %arg11[%c0_77, %c0_78], %189 {strides = array<i32>} : memref<64x128xf32, #tpu.memory_space<vmem>>, vector<64x128xf32>,
    } else {
    }
    %c0 = arith.constant 0 : index
    %c0_1 = arith.constant 0 : index
    %3 = vector.load %arg11[%c0, %c0_1] : memref<64x128xf32, #tpu.memory_space<vmem>>, vector<64x128xf32>
    %4 = arith.truncf %3 : vector<64x128xf32> to vector<64x128xbf16>
    %c0_2 = arith.constant 0 : index
    %c0_3 = arith.constant 0 : index
    %c0_4 = arith.constant 0 : index
    %5 = vector.load %arg9[%c0_2, %c0_3, %c0_4] : memref<1x9x128xf32, #tpu.memory_space<vmem>>, vector<1x9x128xf32>
    %6 = vector.shape_cast %5 : vector<1x9x128xf32> to vector<9x128xf32>
    %7 = vector.extract_strided_slice %6 {offsets = [0, 0], sizes = [1, 128], strides = [1, 1]} : vector<9x128xf32> to vector<1x128xf32>
    %8 = vector.extract_strided_slice %6 {offsets = [1, 0], sizes = [1, 128], strides = [1, 1]} : vector<9x128xf32> to vector<1x128xf32>
    %9 = vector.extract_strided_slice %6 {offsets = [2, 0], sizes = [1, 128], strides = [1, 1]} : vector<9x128xf32> to vector<1x128xf32>
    %10 = vector.extract_strided_slice %6 {offsets = [3, 0], sizes = [1, 128], strides = [1, 1]} : vector<9x128xf32> to vector<1x128xf32>
    %11 = vector.extract_strided_slice %6 {offsets = [4, 0], sizes = [1, 128], strides = [1, 1]} : vector<9x128xf32> to vector<1x128xf32>
    %12 = vector.extract_strided_slice %6 {offsets = [5, 0], sizes = [1, 128], strides = [1, 1]} : vector<9x128xf32> to vector<1x128xf32>
    %13 = vector.extract_strided_slice %6 {offsets = [6, 0], sizes = [1, 128], strides = [1, 1]} : vector<9x128xf32> to vector<1x128xf32>
    %14 = vector.extract_strided_slice %6 {offsets = [7, 0], sizes = [1, 128], strides = [1, 1]} : vector<9x128xf32> to vector<1x128xf32>
    %15 = vector.extract_strided_slice %6 {offsets = [8, 0], sizes = [1, 128], strides = [1, 1]} : vector<9x128xf32> to vector<1x128xf32>
    %c0_5 = arith.constant 0 : index
    %c0_6 = arith.constant 0 : index
    %c0_7 = arith.constant 0 : index
    %c0_8 = arith.constant 0 : index
    %16 = vector.load %arg6[%c0_5, %c0_6, %c0_7, %c0_8] : memref<1x4x128x128xbf16, #tpu.memory_space<vmem>>, vector<1x1x128x128xbf16>
    %17 = vector.shape_cast %16 : vector<1x1x128x128xbf16> to vector<128x128xbf16>
    %cst = arith.constant dense<0.000000e+00> : vector<64x128xf32>
    %18 = tpu.matmul %4, %17, %cst {dimension_numbers = #tpu.dot_dimension_numbers<[1], [0], [0], [1], [0, 0, 1, 1], [], []>} : vector<64x128xbf16>, vector<128x128xbf16>, vector<64x128xf32> -> vector<64x128xf32>
    %19 = vector.broadcast %7 : vector<1x128xf32> to vector<64x128xf32>
    %20 = arith.addf %18, %19 : vector<64x128xf32>
    %c0_9 = arith.constant 0 : index
    %c1 = arith.constant 1 : index
    %c0_10 = arith.constant 0 : index
    %c0_11 = arith.constant 0 : index
    %21 = vector.load %arg6[%c0_9, %c1, %c0_10, %c0_11] : memref<1x4x128x128xbf16, #tpu.memory_space<vmem>>, vector<1x1x128x128xbf16>
    %22 = vector.shape_cast %21 : vector<1x1x128x128xbf16> to vector<128x128xbf16>
    %cst_12 = arith.constant dense<0.000000e+00> : vector<64x128xf32>
    %23 = tpu.matmul %4, %22, %cst_12 {dimension_numbers = #tpu.dot_dimension_numbers<[1], [0], [0], [1], [0, 0, 1, 1], [], []>} : vector<64x128xbf16>, vector<128x128xbf16>, vector<64x128xf32> -> vector<64x128xf32>
    %24 = vector.broadcast %8 : vector<1x128xf32> to vector<64x128xf32>
    %25 = arith.addf %23, %24 : vector<64x128xf32>
    %c0_13 = arith.constant 0 : index
    %c2 = arith.constant 2 : index
    %c0_14 = arith.constant 0 : index
    %c0_15 = arith.constant 0 : index
    %26 = vector.load %arg6[%c0_13, %c2, %c0_14, %c0_15] : memref<1x4x128x128xbf16, #tpu.memory_space<vmem>>, vector<1x1x128x128xbf16>
    %27 = vector.shape_cast %26 : vector<1x1x128x128xbf16> to vector<128x128xbf16>
    %cst_16 = arith.constant dense<0.000000e+00> : vector<64x128xf32>
    %28 = tpu.matmul %4, %27, %cst_16 {dimension_numbers = #tpu.dot_dimension_numbers<[1], [0], [0], [1], [0, 0, 1, 1], [], []>} : vector<64x128xbf16>, vector<128x128xbf16>, vector<64x128xf32> -> vector<64x128xf32>
    %29 = vector.broadcast %9 : vector<1x128xf32> to vector<64x128xf32>
    %30 = arith.addf %28, %29 : vector<64x128xf32>
    %31 = arith.truncf %20 : vector<64x128xf32> to vector<64x128xbf16>
    %32 = arith.truncf %25 : vector<64x128xf32> to vector<64x128xbf16>
    %33 = arith.truncf %30 : vector<64x128xf32> to vector<64x128xbf16>
    %34 = vector.extract_strided_slice %31 {offsets = [0, 0], sizes = [64, 32], strides = [1, 1]} : vector<64x128xbf16> to vector<64x32xbf16>
    %35 = vector.extract_strided_slice %32 {offsets = [0, 0], sizes = [64, 32], strides = [1, 1]} : vector<64x128xbf16> to vector<64x32xbf16>
    %36 = vector.extract_strided_slice %33 {offsets = [0, 0], sizes = [64, 32], strides = [1, 1]} : vector<64x128xbf16> to vector<64x32xbf16>
    %cst_17 = arith.constant dense<0.000000e+00> : vector<64x64xf32>
    %37 = tpu.matmul %34, %35, %cst_17 {dimension_numbers = #tpu.dot_dimension_numbers<[1], [1], [0], [0], [0, 0, 1, 0], [], []>} : vector<64x32xbf16>, vector<64x32xbf16>, vector<64x64xf32> -> vector<64x64xf32>
    %cst_18 = arith.constant dense<0xFF800000> : vector<64xf32>
    %38 = vector.multi_reduction <maximumf>, %37, %cst_18 [1] : vector<64x64xf32> to vector<64xf32>
    %39 = vector.shape_cast %38 : vector<64xf32> to vector<64x1xf32>
    %40 = vector.broadcast %39 : vector<64x1xf32> to vector<64x64xf32>
    %41 = arith.subf %37, %40 : vector<64x64xf32>
    %42 = math.exp %41 : vector<64x64xf32>
    %cst_19 = arith.constant dense<0.000000e+00> : vector<64xf32>
    %43 = vector.multi_reduction <add>, %42, %cst_19 [1] : vector<64x64xf32> to vector<64xf32>
    %44 = vector.shape_cast %43 : vector<64xf32> to vector<64x1xf32>
    %45 = tpu.reciprocal %44 {approx = true} : vector<64x1xf32> -> vector<64x1xf32>
    %46 = vector.broadcast %45 : vector<64x1xf32> to vector<64x64xf32>
    %47 = arith.mulf %42, %46 : vector<64x64xf32>
    %48 = arith.truncf %47 : vector<64x64xf32> to vector<64x64xbf16>
    %cst_20 = arith.constant dense<0.000000e+00> : vector<64x32xf32>
    %49 = tpu.matmul %48, %36, %cst_20 {dimension_numbers = #tpu.dot_dimension_numbers<[1], [0], [0], [1], [0, 0, 1, 1], [], []>} : vector<64x64xbf16>, vector<64x32xbf16>, vector<64x32xf32> -> vector<64x32xf32>
    %50 = vector.extract_strided_slice %31 {offsets = [0, 32], sizes = [64, 32], strides = [1, 1]} : vector<64x128xbf16> to vector<64x32xbf16>
    %51 = vector.extract_strided_slice %32 {offsets = [0, 32], sizes = [64, 32], strides = [1, 1]} : vector<64x128xbf16> to vector<64x32xbf16>
    %52 = vector.extract_strided_slice %33 {offsets = [0, 32], sizes = [64, 32], strides = [1, 1]} : vector<64x128xbf16> to vector<64x32xbf16>
    %cst_21 = arith.constant dense<0.000000e+00> : vector<64x64xf32>
    %53 = tpu.matmul %50, %51, %cst_21 {dimension_numbers = #tpu.dot_dimension_numbers<[1], [1], [0], [0], [0, 0, 1, 0], [], []>} : vector<64x32xbf16>, vector<64x32xbf16>, vector<64x64xf32> -> vector<64x64xf32>
    %cst_22 = arith.constant dense<0xFF800000> : vector<64xf32>
    %54 = vector.multi_reduction <maximumf>, %53, %cst_22 [1] : vector<64x64xf32> to vector<64xf32>
    %55 = vector.shape_cast %54 : vector<64xf32> to vector<64x1xf32>
    %56 = vector.broadcast %55 : vector<64x1xf32> to vector<64x64xf32>
    %57 = arith.subf %53, %56 : vector<64x64xf32>
    %58 = math.exp %57 : vector<64x64xf32>
    %cst_23 = arith.constant dense<0.000000e+00> : vector<64xf32>
    %59 = vector.multi_reduction <add>, %58, %cst_23 [1] : vector<64x64xf32> to vector<64xf32>
    %60 = vector.shape_cast %59 : vector<64xf32> to vector<64x1xf32>
    %61 = tpu.reciprocal %60 {approx = true} : vector<64x1xf32> -> vector<64x1xf32>
    %62 = vector.broadcast %61 : vector<64x1xf32> to vector<64x64xf32>
    %63 = arith.mulf %58, %62 : vector<64x64xf32>
    %64 = arith.truncf %63 : vector<64x64xf32> to vector<64x64xbf16>
    %cst_24 = arith.constant dense<0.000000e+00> : vector<64x32xf32>
    %65 = tpu.matmul %64, %52, %cst_24 {dimension_numbers = #tpu.dot_dimension_numbers<[1], [0], [0], [1], [0, 0, 1, 1], [], []>} : vector<64x64xbf16>, vector<64x32xbf16>, vector<64x32xf32> -> vector<64x32xf32>
    %66 = vector.extract_strided_slice %31 {offsets = [0, 64], sizes = [64, 32], strides = [1, 1]} : vector<64x128xbf16> to vector<64x32xbf16>
    %67 = vector.extract_strided_slice %32 {offsets = [0, 64], sizes = [64, 32], strides = [1, 1]} : vector<64x128xbf16> to vector<64x32xbf16>
    %68 = vector.extract_strided_slice %33 {offsets = [0, 64], sizes = [64, 32], strides = [1, 1]} : vector<64x128xbf16> to vector<64x32xbf16>
    %cst_25 = arith.constant dense<0.000000e+00> : vector<64x64xf32>
    %69 = tpu.matmul %66, %67, %cst_25 {dimension_numbers = #tpu.dot_dimension_numbers<[1], [1], [0], [0], [0, 0, 1, 0], [], []>} : vector<64x32xbf16>, vector<64x32xbf16>, vector<64x64xf32> -> vector<64x64xf32>
    %cst_26 = arith.constant dense<0xFF800000> : vector<64xf32>
    %70 = vector.multi_reduction <maximumf>, %69, %cst_26 [1] : vector<64x64xf32> to vector<64xf32>
    %71 = vector.shape_cast %70 : vector<64xf32> to vector<64x1xf32>
    %72 = vector.broadcast %71 : vector<64x1xf32> to vector<64x64xf32>
    %73 = arith.subf %69, %72 : vector<64x64xf32>
    %74 = math.exp %73 : vector<64x64xf32>
    %cst_27 = arith.constant dense<0.000000e+00> : vector<64xf32>
    %75 = vector.multi_reduction <add>, %74, %cst_27 [1] : vector<64x64xf32> to vector<64xf32>
    %76 = vector.shape_cast %75 : vector<64xf32> to vector<64x1xf32>
    %77 = tpu.reciprocal %76 {approx = true} : vector<64x1xf32> -> vector<64x1xf32>
    %78 = vector.broadcast %77 : vector<64x1xf32> to vector<64x64xf32>
    %79 = arith.mulf %74, %78 : vector<64x64xf32>
    %80 = arith.truncf %79 : vector<64x64xf32> to vector<64x64xbf16>
    %cst_28 = arith.constant dense<0.000000e+00> : vector<64x32xf32>
    %81 = tpu.matmul %80, %68, %cst_28 {dimension_numbers = #tpu.dot_dimension_numbers<[1], [0], [0], [1], [0, 0, 1, 1], [], []>} : vector<64x64xbf16>, vector<64x32xbf16>, vector<64x32xf32> -> vector<64x32xf32>
    %82 = vector.extract_strided_slice %31 {offsets = [0, 96], sizes = [64, 32], strides = [1, 1]} : vector<64x128xbf16> to vector<64x32xbf16>
    %83 = vector.extract_strided_slice %32 {offsets = [0, 96], sizes = [64, 32], strides = [1, 1]} : vector<64x128xbf16> to vector<64x32xbf16>
    %84 = vector.extract_strided_slice %33 {offsets = [0, 96], sizes = [64, 32], strides = [1, 1]} : vector<64x128xbf16> to vector<64x32xbf16>
    %cst_29 = arith.constant dense<0.000000e+00> : vector<64x64xf32>
    %85 = tpu.matmul %82, %83, %cst_29 {dimension_numbers = #tpu.dot_dimension_numbers<[1], [1], [0], [0], [0, 0, 1, 0], [], []>} : vector<64x32xbf16>, vector<64x32xbf16>, vector<64x64xf32> -> vector<64x64xf32>
    %cst_30 = arith.constant dense<0xFF800000> : vector<64xf32>
    %86 = vector.multi_reduction <maximumf>, %85, %cst_30 [1] : vector<64x64xf32> to vector<64xf32>
    %87 = vector.shape_cast %86 : vector<64xf32> to vector<64x1xf32>
    %88 = vector.broadcast %87 : vector<64x1xf32> to vector<64x64xf32>
    %89 = arith.subf %85, %88 : vector<64x64xf32>
    %90 = math.exp %89 : vector<64x64xf32>
    %cst_31 = arith.constant dense<0.000000e+00> : vector<64xf32>
    %91 = vector.multi_reduction <add>, %90, %cst_31 [1] : vector<64x64xf32> to vector<64xf32>
    %92 = vector.shape_cast %91 : vector<64xf32> to vector<64x1xf32>
    %93 = tpu.reciprocal %92 {approx = true} : vector<64x1xf32> -> vector<64x1xf32>
    %94 = vector.broadcast %93 : vector<64x1xf32> to vector<64x64xf32>
    %95 = arith.mulf %90, %94 : vector<64x64xf32>
    %96 = arith.truncf %95 : vector<64x64xf32> to vector<64x64xbf16>
    %cst_32 = arith.constant dense<0.000000e+00> : vector<64x32xf32>
    %97 = tpu.matmul %96, %84, %cst_32 {dimension_numbers = #tpu.dot_dimension_numbers<[1], [0], [0], [1], [0, 0, 1, 1], [], []>} : vector<64x64xbf16>, vector<64x32xbf16>, vector<64x32xf32> -> vector<64x32xf32>
    %98 = tpu.concatenate %49, %65, %81, %97 in 1 : vector<64x32xf32>, vector<64x32xf32>, vector<64x32xf32>, vector<64x32xf32> -> vector<64x128xf32>
    %99 = arith.truncf %98 : vector<64x128xf32> to vector<64x128xbf16>
    %c0_33 = arith.constant 0 : index
    %c3 = arith.constant 3 : index
    %c0_34 = arith.constant 0 : index
    %c0_35 = arith.constant 0 : index
    %100 = vector.load %arg6[%c0_33, %c3, %c0_34, %c0_35] : memref<1x4x128x128xbf16, #tpu.memory_space<vmem>>, vector<1x1x128x128xbf16>
    %101 = vector.shape_cast %100 : vector<1x1x128x128xbf16> to vector<128x128xbf16>
    %cst_36 = arith.constant dense<0.000000e+00> : vector<64x128xf32>
    %102 = tpu.matmul %99, %101, %cst_36 {dimension_numbers = #tpu.dot_dimension_numbers<[1], [0], [0], [1], [0, 0, 1, 1], [], []>} : vector<64x128xbf16>, vector<128x128xbf16>, vector<64x128xf32> -> vector<64x128xf32>
    %103 = vector.broadcast %10 : vector<1x128xf32> to vector<64x128xf32>
    %104 = arith.addf %102, %103 : vector<64x128xf32>
    %105 = arith.addf %3, %104 : vector<64x128xf32>
    %cst_37 = arith.constant dense<0.000000e+00> : vector<64xf32>
    %106 = vector.multi_reduction <add>, %105, %cst_37 [1] : vector<64x128xf32> to vector<64xf32>
    %107 = vector.shape_cast %106 : vector<64xf32> to vector<64x1xf32>
    %cst_38 = arith.constant 1.280000e+02 : f32
    %108 = vector.broadcast %cst_38 : f32 to vector<64x1xf32>
    %109 = arith.divf %107, %108 : vector<64x1xf32>
    %110 = vector.broadcast %109 : vector<64x1xf32> to vector<64x128xf32>
    %111 = arith.subf %105, %110 : vector<64x128xf32>
    %112 = arith.mulf %111, %111 : vector<64x128xf32>
    %cst_39 = arith.constant dense<0.000000e+00> : vector<64xf32>
    %113 = vector.multi_reduction <add>, %112, %cst_39 [1] : vector<64x128xf32> to vector<64xf32>
    %114 = vector.shape_cast %113 : vector<64xf32> to vector<64x1xf32>
    %cst_40 = arith.constant 1.280000e+02 : f32
    %115 = vector.broadcast %cst_40 : f32 to vector<64x1xf32>
    %116 = arith.divf %114, %115 : vector<64x1xf32>
    %cst_41 = arith.constant 9.99999974E-6 : f32
    %117 = vector.broadcast %cst_41 : f32 to vector<64x1xf32>
    %118 = arith.addf %116, %117 : vector<64x1xf32>
    %119 = math.rsqrt %118 : vector<64x1xf32>
    %120 = vector.broadcast %119 : vector<64x1xf32> to vector<64x128xf32>
    %121 = arith.mulf %111, %120 : vector<64x128xf32>
    %122 = vector.broadcast %11 : vector<1x128xf32> to vector<64x128xf32>
    %123 = arith.mulf %121, %122 : vector<64x128xf32>
    %124 = vector.broadcast %12 : vector<1x128xf32> to vector<64x128xf32>
    %125 = arith.addf %123, %124 : vector<64x128xf32>
    %126 = arith.truncf %125 : vector<64x128xf32> to vector<64x128xbf16>
    %c0_42 = arith.constant 0 : index
    %c0_43 = arith.constant 0 : index
    %c0_44 = arith.constant 0 : index
    %127 = vector.load %arg7[%c0_42, %c0_43, %c0_44] : memref<1x128x512xbf16, #tpu.memory_space<vmem>>, vector<1x128x512xbf16>
    %128 = vector.shape_cast %127 : vector<1x128x512xbf16> to vector<128x512xbf16>
    %cst_45 = arith.constant dense<0.000000e+00> : vector<64x512xf32>
    %129 = tpu.matmul %126, %128, %cst_45 {dimension_numbers = #tpu.dot_dimension_numbers<[1], [0], [0], [1], [0, 0, 1, 1], [], []>} : vector<64x128xbf16>, vector<128x512xbf16>, vector<64x512xf32> -> vector<64x512xf32>
    %c0_46 = arith.constant 0 : index
    %c0_47 = arith.constant 0 : index
    %c0_48 = arith.constant 0 : index
    %130 = vector.load %arg10[%c0_46, %c0_47, %c0_48] : memref<1x1x512xf32, #tpu.memory_space<vmem>>, vector<1x1x512xf32>
    %131 = vector.shape_cast %130 : vector<1x1x512xf32> to vector<1x512xf32>
    %132 = vector.broadcast %131 : vector<1x512xf32> to vector<64x512xf32>
    %133 = arith.addf %129, %132 : vector<64x512xf32>
    %cst_49 = arith.constant 5.000000e-01 : f32
    %134 = vector.broadcast %cst_49 : f32 to vector<64x512xf32>
    %135 = arith.mulf %134, %133 : vector<64x512xf32>
    %cst_50 = arith.constant 4.471500e-02 : f32
    %136 = vector.broadcast %cst_50 : f32 to vector<64x512xf32>
    %137 = arith.mulf %136, %133 : vector<64x512xf32>
    %138 = arith.mulf %137, %133 : vector<64x512xf32>
    %139 = arith.mulf %138, %133 : vector<64x512xf32>
    %140 = arith.addf %133, %139 : vector<64x512xf32>
    %cst_51 = arith.constant 0.797884583 : f32
    %141 = vector.broadcast %cst_51 : f32 to vector<64x512xf32>
    %142 = arith.mulf %141, %140 : vector<64x512xf32>
    %143 = math.tanh %142 : vector<64x512xf32>
    %cst_52 = arith.constant 1.000000e+00 : f32
    %144 = vector.broadcast %cst_52 : f32 to vector<64x512xf32>
    %145 = arith.addf %144, %143 : vector<64x512xf32>
    %146 = arith.mulf %135, %145 : vector<64x512xf32>
    %147 = arith.truncf %146 : vector<64x512xf32> to vector<64x512xbf16>
    %c0_53 = arith.constant 0 : index
    %c0_54 = arith.constant 0 : index
    %c0_55 = arith.constant 0 : index
    %148 = vector.load %arg8[%c0_53, %c0_54, %c0_55] : memref<1x512x128xbf16, #tpu.memory_space<vmem>>, vector<1x512x128xbf16>
    %149 = vector.shape_cast %148 : vector<1x512x128xbf16> to vector<512x128xbf16>
    %cst_56 = arith.constant dense<0.000000e+00> : vector<64x128xf32>
    %150 = tpu.matmul %147, %149, %cst_56 {dimension_numbers = #tpu.dot_dimension_numbers<[1], [0], [0], [1], [0, 0, 1, 1], [], []>} : vector<64x512xbf16>, vector<512x128xbf16>, vector<64x128xf32> -> vector<64x128xf32>
    %151 = vector.broadcast %15 : vector<1x128xf32> to vector<64x128xf32>
    %152 = arith.addf %150, %151 : vector<64x128xf32>
    %153 = arith.addf %125, %152 : vector<64x128xf32>
    %cst_57 = arith.constant dense<0.000000e+00> : vector<64xf32>
    %154 = vector.multi_reduction <add>, %153, %cst_57 [1] : vector<64x128xf32> to vector<64xf32>
    %155 = vector.shape_cast %154 : vector<64xf32> to vector<64x1xf32>
    %cst_58 = arith.constant 1.280000e+02 : f32
    %156 = vector.broadcast %cst_58 : f32 to vector<64x1xf32>
    %157 = arith.divf %155, %156 : vector<64x1xf32>
    %158 = vector.broadcast %157 : vector<64x1xf32> to vector<64x128xf32>
    %159 = arith.subf %153, %158 : vector<64x128xf32>
    %160 = arith.mulf %159, %159 : vector<64x128xf32>
    %cst_59 = arith.constant dense<0.000000e+00> : vector<64xf32>
    %161 = vector.multi_reduction <add>, %160, %cst_59 [1] : vector<64x128xf32> to vector<64xf32>
    %162 = vector.shape_cast %161 : vector<64xf32> to vector<64x1xf32>
    %cst_60 = arith.constant 1.280000e+02 : f32
    %163 = vector.broadcast %cst_60 : f32 to vector<64x1xf32>
    %164 = arith.divf %162, %163 : vector<64x1xf32>
    %cst_61 = arith.constant 9.99999974E-6 : f32
    %165 = vector.broadcast %cst_61 : f32 to vector<64x1xf32>
    %166 = arith.addf %164, %165 : vector<64x1xf32>
    %167 = math.rsqrt %166 : vector<64x1xf32>
    %168 = vector.broadcast %167 : vector<64x1xf32> to vector<64x128xf32>
    %169 = arith.mulf %159, %168 : vector<64x128xf32>
    %170 = vector.broadcast %13 : vector<1x128xf32> to vector<64x128xf32>
    %171 = arith.mulf %169, %170 : vector<64x128xf32>
    %172 = vector.broadcast %14 : vector<1x128xf32> to vector<64x128xf32>
    %173 = arith.addf %171, %172 : vector<64x128xf32>
    %c0_62 = arith.constant 0 : index
    %c0_63 = arith.constant 0 : index
    %174 = vector.load %arg11[%c0_62, %c0_63] : memref<64x128xf32, #tpu.memory_space<vmem>>, vector<64x128xf32>
    tpu.vector_store %arg11[%c0_62, %c0_63], %173 {strides = array<i32>} : memref<64x128xf32, #tpu.memory_space<vmem>>, vector<64x128xf32>,
    return
  }
  func.func @transform_0(%arg0: i32) -> (i32, i32) {
    %c0_i32 = arith.constant 0 : i32
    %c0_i32_0 = arith.constant 0 : i32
    %c0_i32_1 = arith.constant 0 : i32
    return %c0_i32, %c0_i32_0 : i32, i32
  }
  func.func @transform_1(%arg0: i32) -> (i32, i32) {
    %c0_i32 = arith.constant 0 : i32
    %c0_i32_0 = arith.constant 0 : i32
    %c0_i32_1 = arith.constant 0 : i32
    return %c0_i32, %c0_i32_0 : i32, i32
  }
  func.func @transform_2(%arg0: i32) -> (i32, i32) {
    %c0_i32 = arith.constant 0 : i32
    %c0_i32_0 = arith.constant 0 : i32
    %c0_i32_1 = arith.constant 0 : i32
    return %c0_i32, %c0_i32_0 : i32, i32
  }
  func.func @transform_3(%arg0: i32) -> (i32, i32) {
    %c0_i32 = arith.constant 0 : i32
    %c0_i32_0 = arith.constant 0 : i32
    %c0_i32_1 = arith.constant 0 : i32
    return %c0_i32, %c0_i32_0 : i32, i32
  }
  func.func @transform_4(%arg0: i32) -> (i32, i32) {
    %c0_i32 = arith.constant 0 : i32
    %c0_i32_0 = arith.constant 0 : i32
    %c0_i32_1 = arith.constant 0 : i32
    return %c0_i32, %c0_i32_0 : i32, i32
  }
  func.func @transform_5(%arg0: i32) -> (i32, i32, i32, i32) {
    %c0_i32 = arith.constant 0 : i32
    %c0_i32_0 = arith.constant 0 : i32
    %c0_i32_1 = arith.constant 0 : i32
    %c0_i32_2 = arith.constant 0 : i32
    return %arg0, %c0_i32, %c0_i32_0, %c0_i32_1 : i32, i32, i32, i32
  }
  func.func @transform_6(%arg0: i32) -> (i32, i32, i32) {
    %c0_i32 = arith.constant 0 : i32
    %c0_i32_0 = arith.constant 0 : i32
    %c0_i32_1 = arith.constant 0 : i32
    return %arg0, %c0_i32, %c0_i32_0 : i32, i32, i32
  }
  func.func @transform_7(%arg0: i32) -> (i32, i32, i32) {
    %c0_i32 = arith.constant 0 : i32
    %c0_i32_0 = arith.constant 0 : i32
    %c0_i32_1 = arith.constant 0 : i32
    return %arg0, %c0_i32, %c0_i32_0 : i32, i32, i32
  }
  func.func @transform_8(%arg0: i32) -> (i32, i32, i32) {
    %c0_i32 = arith.constant 0 : i32
    %c0_i32_0 = arith.constant 0 : i32
    %c0_i32_1 = arith.constant 0 : i32
    return %arg0, %c0_i32, %c0_i32_0 : i32, i32, i32
  }
  func.func @transform_9(%arg0: i32) -> (i32, i32, i32) {
    %c0_i32 = arith.constant 0 : i32
    %c0_i32_0 = arith.constant 0 : i32
    %c0_i32_1 = arith.constant 0 : i32
    return %arg0, %c0_i32, %c0_i32_0 : i32, i32, i32
  }
  func.func @transform_10(%arg0: i32) -> (i32, i32) {
    %c0_i32 = arith.constant 0 : i32
    %c0_i32_0 = arith.constant 0 : i32
    %c0_i32_1 = arith.constant 0 : i32
    return %c0_i32, %c0_i32_0 : i32, i32
  }
}

</mosaic_0001>

<bundles_post_ra>
// kernel: tpu_custom_call.1
= control target key start
LH: loop header
LB: loop body
LE: loop exit
PB: predicated region body
PF: predicated region fallthrough
CT: control target
= control target key end

     0   :  { %s6830_s0 = inlined_call_operand.vmem [shape: f32[64,6], index: 0, kind: input, shape index: {}]   ;;  %s6831_s1 = inlined_call_operand.vmem [shape: bf16[6,128], index: 1, kind: input, shape index: {}]   ;;  %s6832_s2 = inlined_call_operand.vmem [shape: f32[1,128], index: 2, kind: input, shape index: {}]   ;;  %s6833_s3 = inlined_call_operand.vmem [shape: bf16[128,128], index: 3, kind: input, shape index: {}]   ;;  %s6834_s4 = inlined_call_operand.vmem [shape: f32[1,128], index: 4, kind: input, shape index: {}]   ;;  %s6835_s5 = inlined_call_operand.hbm [shape: bf16[2,4,128,128], index: 5, kind: input, shape index: {}]   ;;  %s6836_s6 = inlined_call_operand.hbm [shape: bf16[2,128,512], index: 6, kind: input, shape index: {}]   ;;  %s6837_s7 = inlined_call_operand.hbm [shape: bf16[2,512,128], index: 7, kind: input, shape index: {}]   ;;  %s6838_s8 = inlined_call_operand.vmem [shape: f32[2,9,128], index: 8, kind: input, shape index: {}]   ;;  %s6839_s9 = inlined_call_operand.vmem [shape: f32[2,1,512], index: 9, kind: input, shape index: {}]   ;;  %s6840_s10 = inlined_call_operand.hbm [shape: f32[64,128], index: 10, kind: output, shape index: {}]  }
   0x1   :  { %6863 = sst [smem:[#allocation32_spill]] %s6835_s5 }
   0x2   :  { %6864 = sst [smem:[#allocation33_spill]] %s6836_s6 }
   0x3   :  { %15 = vsyncpa [#allocation3], 0 }
   0x4   :  { %17 = vsyncpa [#allocation3 + $0x1], 0 }
   0x5   :  { %18 = vsyncpa [#allocation6], 0 }
   0x6   :  { %20 = vsyncpa [#allocation6 + $0x1], 0 }
   0x7   :  { %21 = vsyncpa [#allocation4], 0  ;;  %s5420_s13 = smov 0   ;;  %s5422_s14 = smov 0  }
   0x8   :  { %s5424_s15 = smov 0   ;;  %s5426_s16 = smov 0  }
   0x9 LB: > { %s5439_s17 = sadd.s32 4294967295, %s5349_s16   ;;  %s5442_s18 = sadd.s32 1, %s5349_s16   ;;  %s5349_s16 = sphi %s5426_s16, %s6912_s16   ;;  %s5345_s15 = sphi %s5424_s15, %s6916_s15   ;;  %s5341_s14 = sphi %s5422_s14, %s6915_s14   ;;  %s5337_s13 = sphi %s5420_s13, %s6914_s13  }
   0xa   : > { %6865 = sst [smem:[#allocation12_spill]] %s5442_s18  ;;  %s136_s19 = ssub.s32 %s5349_s16, %s5442_s18 }
   0xb   : > { %s139_s20 = sadd.s32 1, %s5345_s15  ;;  %p137_p0 = scmp.eq.s32.totalorder %s136_s19, 0 }
   0xc   : > { %p146_p1 = scmp.ne.s32.totalorder %s5345_s15, %s5341_s14  ;;  %p147_p2 = scmp.eq.s32.totalorder %s5349_s16, 0 }
   0xd   : > { %p152_p3 = scmp.ne.s32.totalorder %s5341_s14, %s5337_s13  ;;  %p153_p5 = scmp.eq.s32.totalorder %s5439_s17, 0 }
   0xe   : > { %s5452_s21 = scalar_select %p137_p0, %s5345_s15, %s139_s20  }
   0xf   : > { %p148_p4 = por %p147_p2, %p146_p1  ;;  %p4731_p6 = scmp.lt.s32.totalorder %s5349_s16, 2 }
  0x10   : > { %6866 = sst [smem:[#allocation13_spill]] %s5452_s21  ;;  %p5456_p7 = por %p153_p5, %p152_p3 }
  0x11   : > { %s6841_s23 = sand.u32 1, %s5345_s15   ;;  %s5466_s25 = sshll.u32 %s5349_s16, 12 }
  0x12   : > { %s6867_s22 = scalar_select %p5456_p7, 1, 0 }
  0x13   : > { %s5463_s24 = sshll.u32 %s6841_s23, 8  ;;  %p5468_p8 = pnand %p4731_p6, %p148_p4 }
  0x14   : > { %s337_s27 = sand.u32 1, %s5349_s16   ;;  %s6869_s6 = sld [smem:[#allocation33_spill]] }
  0x15   : > { %s341_s11 = scalar_lea.vmem [#allocation5], %s5463_s24  ;;  %s5482_s13 = scalar_lea.sflag [#allocation6], %s337_s27 }
  0x16   : > { %s348_s12 = sshll.u32 %s341_s11, 4  ;;  %p5488_p10 = pneg %p5468_p8  ;;  %s5480_s12 = int_to_ptr.vmem [resolvable:$true] %s348_s12 }
  0x1a   : > { %s5477_s30 = scalar_lea.hbm %s6869_s6, %s5466_s25  ;;  %s5196_s23 = scalar_lea.hbm %s6869_s6, 8192 }
  0x1b   : > { %s5191_s19 = scalar_lea.hbm %s5477_s30, 4096  ;;  %p5197_p13 = scmp.lt.u32.totalorder %s5477_s30, %s6869_s6 }
  0x1c   : > { %p5192_p9 = scmp.ne.s32.totalorder %s5477_s30, %s5191_s19  ;;  %p5198_p0 = scmp.lt.u32.totalorder %s5196_s23, %s5191_s19 }
  0x1d   : > { %p5200_p2 = scmp.lt.u32.totalorder %s5191_s19, %s5477_s30 }
  0x1e   : > { %p5194_p11 = pnand %p5488_p10, %p5192_p9  ;;  %p5199_p1 = por %p5198_p0, %p5197_p13 }
  0x20   : > { %p5195_p12 = pneg %p5194_p11  ;;  %p5201_p3 = por %p5200_p2, %p5199_p1 }
  0x22   : > { %p5202_p4 = pnand %p5201_p3, %p5195_p12 }
  0x24   : > { %5205 = shalt.err (!%p5202_p4)
}
  0x25   : > { %s5206_s27 = scalar_lea.vmem %s5480_s12, 4096  ;;  %s5351_s28 = smov [#allocation5]  }
  0x26   : > { %p5207_p5 = scmp.ne.s32.totalorder %s5480_s12, %s5206_s27  ;;  %s5211_s29 = sshll.u32 %s5351_s28, 4  ;;  %s5212_s29 = int_to_ptr.vmem [resolvable:$false] %s5211_s29 }
  0x27   : > { %s5213_s21 = scalar_lea.vmem %s5212_s29, 8192  ;;  %p5214_p11 = scmp.lt.s32.totalorder %s5480_s12, %s5212_s29 }
  0x28   : > { %p5209_p6 = pnand %p5207_p5, %p5488_p10  ;;  %p5215_p7 = scmp.lt.s32.totalorder %s5213_s21, %s5206_s27 }
  0x2a   : > { %p5210_p9 = pneg %p5209_p6  ;;  %p5216_p13 = por %p5215_p7, %p5214_p11 }
  0x2c   : > { %p5217_p0 = pnand %p5216_p13, %p5210_p9 }
  0x2e   : > { %5220 = shalt.err (!%p5217_p0)
}
  0x2f   : > { %s5352_s23 = smov 256   ;;  %s5353_s19 = smov 16  }
  0x30   : > { %4727 = dma.hbm_to_vmem [thread:$0]  (!%p5468_p8), %s5477_s30, 4096, %s5480_s12, %s5482_s13, %s5352_s23, %s5352_s23, %s5353_s19  }
  0x31   : > { %p4004_p12 = scmp.ge.s32.totalorder %s5349_s16, 1  ;;  %p392_p1 = scmp.lt.s32.totalorder %s5349_s16, 3 }
  0x32   : > { %s6872_s5 = sld [smem:[#allocation32_spill]]  ;;  %s320_s21 = scalar_lea.vmem [#allocation2], %s5463_s24 }
  0x33   : > { %p5514_p2 = pnand %p4004_p12, %p392_p1  ;;  %s327_s6 = sshll.u32 %s320_s21, 4  ;;  %s5525_s6 = int_to_ptr.vmem [resolvable:$true] %s327_s6 }
  0x34   : > { %s6873_s30 = sand.u32 1, %s5345_s15  }
  0x35   : > { %s6871_s11 = scalar_select %p5514_p2, 1, 0 }
  0x36   : > { %s5529_s12 = scalar_lea.sflag [#allocation3], %s6873_s30 }
  0x38   : > { %s5522_s29 = scalar_lea.hbm %s6872_s5, %s5466_s25  ;;  %s5226_s27 = scalar_lea.hbm %s6872_s5, 8192 }
  0x39   : > { %s5221_s16 = scalar_lea.hbm %s5522_s29, 4096  ;;  %p5227_p5 = scmp.lt.u32.totalorder %s5522_s29, %s6872_s5 }
  0x3a   : > { %p5222_p7 = scmp.ne.s32.totalorder %s5522_s29, %s5221_s16  ;;  %p5228_p6 = scmp.lt.u32.totalorder %s5226_s27, %s5221_s16 }
  0x3b   : > { %p5230_p11 = scmp.lt.u32.totalorder %s5221_s16, %s5522_s29 }
  0x3c   : > { %p5224_p3 = pnand %p5222_p7, %p5488_p10  ;;  %p5229_p9 = por %p5228_p6, %p5227_p5 }
  0x3e   : > { %p5225_p4 = pneg %p5224_p3  ;;  %p5231_p13 = por %p5230_p11, %p5229_p9 }
  0x40   : > { %p5232_p0 = pnand %p5231_p13, %p5225_p4 }
  0x42   : > { %5235 = shalt.err (!%p5232_p0)
}
  0x43   : > { %s5236_s21 = scalar_lea.vmem %s5525_s6, 4096  ;;  %s5354_s30 = smov [#allocation2]  }
  0x44   : > { %p5237_p12 = scmp.ne.s32.totalorder %s5525_s6, %s5236_s21  ;;  %s5241_s23 = sshll.u32 %s5354_s30, 4  ;;  %s5242_s23 = int_to_ptr.vmem [resolvable:$false] %s5241_s23 }
  0x45   : > { %s5243_s18 = scalar_lea.vmem %s5242_s23, 8192  ;;  %p5244_p3 = scmp.lt.s32.totalorder %s5525_s6, %s5242_s23 }
  0x46   : > { %p5239_p1 = pnand %p5237_p12, %p5488_p10  ;;  %p5245_p2 = scmp.lt.s32.totalorder %s5243_s18, %s5236_s21 }
  0x48   : > { %p5240_p7 = pneg %p5239_p1  ;;  %p5246_p5 = por %p5245_p2, %p5244_p3 }
  0x4a   : > { %p5247_p6 = pnand %p5246_p5, %p5240_p7 }
  0x4c   : > { %5250 = shalt.err (!%p5247_p6)
}
  0x4d   : > { %s5355_s16 = smov 64   ;;  %s5356_s19 = smov 4  }
  0x4e   : > { %4724 = dma.hbm_to_vmem [thread:$0]  (!%p5468_p8), %s5522_s29, 4096, %s5525_s6, %s5529_s12, %s5355_s16, %s5355_s16, %s5356_s19  }
  0x4f   : > { %s5560_s21 = scalar_lea.hbm %s6837_s7, %s5466_s25  ;;  %s362_s30 = scalar_lea.vmem [#allocation7], %s5463_s24 }
  0x50   : > { %s369_s23 = sshll.u32 %s362_s30, 4  ;;  %s5251_s18 = scalar_lea.hbm %s5560_s21, 4096  ;;  %s5563_s23 = int_to_ptr.vmem [resolvable:$true] %s369_s23 }
  0x51   : > { %p5252_p2 = scmp.ne.s32.totalorder %s5560_s21, %s5251_s18  ;;  %s5256_s29 = scalar_lea.hbm %s6837_s7, 8192 }
  0x52   : > { %p5257_p11 = scmp.lt.u32.totalorder %s5560_s21, %s6837_s7  ;;  %p5258_p13 = scmp.lt.u32.totalorder %s5256_s29, %s5251_s18 }
  0x53   : > { %p5254_p4 = pnand %p5252_p2, %p5488_p10  ;;  %p5260_p12 = scmp.lt.u32.totalorder %s5251_s18, %s5560_s21 }
  0x54   : > { %p5259_p0 = por %p5258_p13, %p5257_p11 }
  0x55   : > { %p5255_p9 = pneg %p5254_p4 }
  0x56   : > { %p5261_p1 = por %p5260_p12, %p5259_p0 }
  0x58   : > { %p5262_p7 = pnand %p5261_p1, %p5255_p9 }
  0x5a   : > { %5265 = shalt.err (!%p5262_p7)
}
  0x5b   : > { %s5266_s24 = scalar_lea.vmem %s5563_s23, 4096  ;;  %s5357_s5 = smov [#allocation7]  }
  0x5c   : > { %p5267_p3 = scmp.ne.s32.totalorder %s5563_s23, %s5266_s24  ;;  %s5271_s27 = sshll.u32 %s5357_s5, 4  ;;  %s5272_s27 = int_to_ptr.vmem [resolvable:$false] %s5271_s27 }
  0x5d   : > { %s5273_s28 = scalar_lea.vmem %s5272_s27, 8192  ;;  %p5274_p2 = scmp.lt.s32.totalorder %s5563_s23, %s5272_s27 }
  0x5e   : > { %p5269_p5 = pnand %p5267_p3, %p5488_p10  ;;  %p5275_p4 = scmp.lt.s32.totalorder %s5273_s28, %s5266_s24 }
  0x60   : > { %p5270_p6 = pneg %p5269_p5  ;;  %p5276_p11 = por %p5275_p4, %p5274_p2 }
  0x62   : > { %p5277_p13 = pnand %p5276_p11, %p5270_p6 }
  0x64   : > { %5280 = shalt.err (!%p5277_p13)
}
  0x65   : > { %4730 = dma.hbm_to_vmem [thread:$0]  (!%p5468_p8), %s5560_s21, 4096, %s5563_s23, %s5482_s13, %s5355_s16, %s5355_s16, %s5356_s19  }
  0x66   : > { %p6874_p10 = scmp.ne.s32.totalorder %s6871_s11, 0 }
  0x68   : > { %396 = sbr.rel (%p6874_p10) target bundleno = 4966 (0x1366), region = 60 }
  0x6f   : > { %s398_s20 = sand.u32 1, %s5341_s14   ;;  %p6875_p9 = scmp.ne.s32.totalorder %s6867_s22, 0 }
  0x70   : > { %s4005_s30 = sshll.u32 %s398_s20, 8  ;;  %s399_s18 = scalar_lea.sflag [#allocation3], %s398_s20 }
  0x71   : > { %s5593_s6 = scalar_lea.vmem [#allocation2], %s4005_s30 }
  0x72   : > { %5324 = dma.done.wait (%p6875_p9), %s399_s18, 4096  }
  0x73   : > { %5326 = vsyncadd (%p6875_p9), %s399_s18, 4294963200  ;;  %s407_s26 = sand.u32 1, %s5439_s17   ;;  %s5600_s13 = scalar_lea.vmem [#allocation5], %s4005_s30 }
  0x74   : > { %s408_s29 = scalar_lea.sflag [#allocation6], %s407_s26 }
  0x75   : > { %5328 = dma.done.wait (%p6875_p9), %s408_s29, 8192  }
  0x76   : > { %5330 = vsyncadd (%p6875_p9), %s408_s29, 4294959104  ;;  %p471_p8 = scmp.lt.s32.totalorder %s5439_s17, 1  ;;  %s5618_s27 = scalar_lea.vmem [#allocation7], %s4005_s30 }
  0x77   : > { %p4011_p0 = scmp.ne.s32.totalorder %s5439_s17, 0 }
  0x78   : > { %s472_s11 = scalar_select %p471_p8, %s5439_s17, 1 }
  0x79   : > { %484 = sbr.rel (%p4011_p0) target bundleno = 574 (0x23e), region = 76  ;;  %v497_v0 = vld [vmem:[%s6831_s1] sm:$0x7] (!%p4011_p0)  ;;  %vm518_vm0 = vcmask (!%p4011_p0), 1042432   ;;  %v486_v2 = vld [vmem:[%s6830_s0 + $0x8] sm:$0xff] (!%p4011_p0)  ;;  %vm505_vm1 = vcmask (!%p4011_p0), 48128  }
  0x7a   : > { %s4210_s16 = sshll.u32 %s472_s11, 4  ;;  %s4010_s19 = sshll.u32 %s472_s11, 2  ;;  %v485_v1 = vld [vmem:[%s6830_s0] sm:$0xff] (!%p4011_p0)  ;;  %4694 = vmatprep.subr.msk.bf16.mxu0 (!%p4011_p0), %vm518_vm0, %v497_v0  ;;  %v520_v3 = vsel (!%p4011_p0), %vm518_vm0, %v497_v0, 0  ;;  %v487_v5 = vld [vmem:[%s6830_s0 + $0x10] sm:$0xff] (!%p4011_p0)  ;;  %v488_v6 = vld [vmem:[%s6830_s0 + $0x18] sm:$0xff] (!%p4011_p0) }
  0x7b   : > { %s5611_s12 = scalar_lea.vmem %s6838_s8, %s4210_s16  ;;  %s5616_s5 = scalar_lea.vmem %s6839_s9, %s4010_s19  ;;  %v493_v4 = vpack.c.bf16 (!%p4011_p0), %v486_v2, %v485_v1  ;;  %v489_v7 = vld [vmem:[%s6830_s0 + $0x20] sm:$0xff] (!%p4011_p0)  ;;  %4421 = vmatpush3.bf16.msra.mxu0 (!%p4011_p0), %v520_v3  ;;  %v494_v8 = vpack.c.bf16 (!%p4011_p0), %v488_v6, %v487_v5  ;;  %v490_v9 = vld [vmem:[%s6830_s0 + $0x28] sm:$0xff] (!%p4011_p0)  ;;  %v491_v13 = vld [vmem:[%s6830_s0 + $0x30] sm:$0xff] (!%p4011_p0) }
  0x7c   : > { %v495_v10 = vpack.c.bf16 (!%p4011_p0), %v490_v9, %v489_v7  ;;  %v4777_v11 = vld [vmem:[%s6833_s3] sm:$0xff] (!%p4011_p0)   ;;  %v4778_v12 = vld [vmem:[%s6833_s3 + $0x8] sm:$0xff] (!%p4011_p0)   ;;  %v492_v14 = vld [vmem:[%s6830_s0 + $0x38] sm:$0xff] (!%p4011_p0) }
  0x7d   : > { %4422 = vmatprep.mubr.msk.bf16.mxu0 (!%p4011_p0), %vm505_vm1, %v493_v4  ;;  %4430 = vmatprep.subr.bf16.mxu0 (!%p4011_p0), %v4777_v11  ;;  %v4779_v15 = vld [vmem:[%s6833_s3 + $0x10] sm:$0xff] (!%p4011_p0)   ;;  %v496_v16 = vpack.c.bf16 (!%p4011_p0), %v492_v14, %v491_v13  ;;  %v4780_v17 = vld [vmem:[%s6833_s3 + $0x18] sm:$0xff] (!%p4011_p0)   ;;  %v4781_v18 = vld [vmem:[%s6833_s3 + $0x20] sm:$0xff] (!%p4011_p0)  }
  0x7e   : > { %4423 = vmatmul.mubr.msk.bf16.vlgmr.msra.gmra.mrb[0].mxu0 (!%p4011_p0), %vm505_vm1, %v494_v8  ;;  %4678 = vmatprep.subr.bf16.mxu1 (!%p4011_p0), %v4777_v11  ;;  %v4782_v19 = vld [vmem:[%s6833_s3 + $0x28] sm:$0xff] (!%p4011_p0)   ;;  %v4783_v20 = vld [vmem:[%s6833_s3 + $0x30] sm:$0xff] (!%p4011_p0)   ;;  %v4784_v21 = vld [vmem:[%s6833_s3 + $0x38] sm:$0xff] (!%p4011_p0)  }
  0x7f   : > { %4426 = vmatprep.mubr.msk.bf16.mxu0 (!%p4011_p0), %vm505_vm1, %v495_v10  ;;  %4431 = vmatpush3.bf16.msra.mxu0 (!%p4011_p0), %v4777_v11  ;;  %v4012_v22 = vld [vmem:[%s6832_s2] ss:$0 sm:$0xff] (!%p4011_p0) }
  0x80   : > { %4432 = vmatprep.subr.bf16.mxu0 %v4778_v12  ;;  %4686 = vmatpush3.bf16.msra.mxu1 %v4777_v11  ;;  %v4017_v51 = vld [vmem:[%s6834_s4] ss:$0 sm:$0xff] }
  0x81   : > { %4679 = vmatprep.subr.bf16.mxu1 %v4778_v12 }
  0x83   : > { %4433 = vmatpush3.bf16.msra.mxu0 %v4778_v12 }
  0x84   : > { %4434 = vmatprep.subr.bf16.mxu0 %v4779_v15  ;;  %4687 = vmatpush3.bf16.msra.mxu1 %v4778_v12 }
  0x85   : > { %4680 = vmatprep.subr.bf16.mxu1 %v4779_v15 }
  0x86   : > { %4427 = vmatmul.mubr.msk.bf16.gmra.mrb[4].mxu0 %vm505_vm1, %v496_v16 }
  0x87   : > { %4435 = vmatpush3.bf16.msra.mxu0 %v4779_v15 }
  0x88   : > { %4436 = vmatprep.subr.bf16.mxu0 %v4780_v17  ;;  %4688 = vmatpush3.bf16.msra.mxu1 %v4779_v15 }
  0x89   : > { %4681 = vmatprep.subr.bf16.mxu1 %v4780_v17 }
  0x8b   : > { %4437 = vmatpush3.bf16.msra.mxu0 %v4780_v17 }
  0x8c   : > { %4438 = vmatprep.subr.bf16.mxu0 %v4781_v18  ;;  %4689 = vmatpush3.bf16.msra.mxu1 %v4780_v17 }
  0x8d   : > { %4682 = vmatprep.subr.bf16.mxu1 %v4781_v18 }
  0x8f   : > { %4439 = vmatpush3.bf16.msra.mxu0 %v4781_v18 }
  0x90   : > { %4440 = vmatprep.subr.bf16.mxu0 %v4782_v19  ;;  %4690 = vmatpush3.bf16.msra.mxu1 %v4781_v18 }
  0x91   : > { %4683 = vmatprep.subr.bf16.mxu1 %v4782_v19 }
  0x93   : > { %4441 = vmatpush3.bf16.msra.mxu0 %v4782_v19 }
  0x94   : > { %4691 = vmatpush3.bf16.msra.mxu1 %v4782_v19  ;;  %4442 = vmatprep.subr.bf16.mxu0 %v4783_v20 }
  0x95   : > { %4684 = vmatprep.subr.bf16.mxu1 %v4783_v20 }
  0x97   : > { %4443 = vmatpush3.bf16.msra.mxu0 %v4783_v20 }
  0x98   : > { %4692 = vmatpush3.bf16.msra.mxu1 %v4783_v20  ;;  %4444 = vmatprep.subr.bf16.mxu0 %v4784_v21 }
  0x99   : > { %4685 = vmatprep.subr.bf16.mxu1 %v4784_v21 }
  0x9b   : > { %4445 = vmatpush3.bf16.msra.mxu0 %v4784_v21 }
  0x9c   : > { %4693 = vmatpush3.bf16.msra.mxu1 %v4784_v21 }
 0x151   : > { %v4424_v23 = vpop.f32.mrb[0].mxu0 }
 0x152   : > { %v565_v24 = vadd.f32 %v4424_v23, %v4012_v22  ;;  %v556_v25 = vpop.f32.mrb[1].mxu0 }
 0x153   : > { %v557_v26 = vadd.f32 %v4012_v22, %v556_v25  ;;  %v4425_v27 = vpop.f32.mrb[2].mxu0 }
 0x154   : > { %v568_v28 = vadd.f32 %v4425_v27, %v4012_v22  ;;  %v559_v29 = vpop.f32.mrb[3].mxu0  ;;  %v589_v31 = vmax.f32 %v565_v24, 0.0 }
 0x155   : > { %v560_v30 = vadd.f32 %v4012_v22, %v559_v29  ;;  %v587_v33 = vmax.f32 %v557_v26, 0.0 }
 0x156   : > { %v590_v32 = vmax.f32 %v568_v28, 0.0 }
 0x157   : > { %v588_v34 = vmax.f32 %v560_v30, 0.0 }
 0x158   : > { %v596_v35 = vpack.c.bf16 %v590_v32, %v589_v31 }
 0x159   : > { %v595_v36 = vpack.c.bf16 %v588_v34, %v587_v33  ;;  %v4428_v37 = vpop.f32.mrb[4].mxu0 }
 0x15a   : > { %v581_v38 = vadd.f32 %v4428_v37, %v4012_v22  ;;  %v572_v39 = vpop.f32.mrb[5].mxu0 }
 0x15b   : > { %v573_v40 = vadd.f32 %v4012_v22, %v572_v39  ;;  %v4429_v41 = vpop.f32.mrb[6].mxu0  ;;  %4446 = vmatprep.mubr.bf16.mxu0 %v595_v36 }
 0x15c   : > { %v584_v42 = vadd.f32 %v4429_v41, %v4012_v22  ;;  %v575_v43 = vpop.f32.mrb[7].mxu0  ;;  %4447 = vmatmul.mubr.bf16.vlgmr.msra.gmra.mrb[8].mxu0 %v596_v35  ;;  %v593_v45 = vmax.f32 %v581_v38, 0.0 }
 0x15d   : > { %v576_v44 = vadd.f32 %v4012_v22, %v575_v43  ;;  %v591_v47 = vmax.f32 %v573_v40, 0.0 }
 0x15e   : > { %v594_v46 = vmax.f32 %v584_v42, 0.0 }
 0x15f   : > { %v592_v48 = vmax.f32 %v576_v44, 0.0 }
 0x160   : > { %v598_v49 = vpack.c.bf16 %v594_v46, %v593_v45 }
 0x161   : > { %v597_v50 = vpack.c.bf16 %v592_v48, %v591_v47 }
 0x163   : > { %4450 = vmatprep.mubr.bf16.mxu1 %v597_v50 }
 0x164   : > { %4451 = vmatmul.mubr.bf16.vlgmr.msra.gmra.mrb[0].mxu1 %v598_v49 }
 0x22f   : > { %v4448_v52 = vpop.f32.mrb[8].mxu0 }
 0x230   : > { %v713_v53 = vadd.f32 %v4448_v52, %v4017_v51  ;;  %v704_v54 = vpop.f32.mrb[9].mxu0 }
 0x231   : > { %v705_v55 = vadd.f32 %v4017_v51, %v704_v54  ;;  %v4449_v56 = vpop.f32.mrb[10].mxu0 }
 0x232   : > { %737 = vst [vmem:[#allocation8 + $0x10] sm:$0xff] %v713_v53  ;;  %v716_v57 = vadd.f32 %v4449_v56, %v4017_v51  ;;  %v707_v58 = vpop.f32.mrb[11].mxu0 }
 0x233   : > { %735 = vst [vmem:[#allocation8] sm:$0xff] %v705_v55  ;;  %v708_v59 = vadd.f32 %v4017_v51, %v707_v58 }
 0x234   : > { %738 = vst [vmem:[#allocation8 + $0x18] sm:$0xff] %v716_v57 }
 0x235   : > { %736 = vst [vmem:[#allocation8 + $0x8] sm:$0xff] %v708_v59 }
 0x237   : > { %v4452_v60 = vpop.f32.mrb[0].mxu1 }
 0x238   : > { %v729_v61 = vadd.f32 %v4452_v60, %v4017_v51  ;;  %v720_v62 = vpop.f32.mrb[1].mxu1 }
 0x239   : > { %v721_v63 = vadd.f32 %v4017_v51, %v720_v62  ;;  %v4453_v0 = vpop.f32.mrb[2].mxu1 }
 0x23a   : > { %741 = vst [vmem:[#allocation8 + $0x30] sm:$0xff] %v729_v61  ;;  %v732_v1 = vadd.f32 %v4453_v0, %v4017_v51  ;;  %v723_v2 = vpop.f32.mrb[3].mxu1 }
 0x23b   : > { %739 = vst [vmem:[#allocation8 + $0x20] sm:$0xff] %v721_v63  ;;  %v724_v3 = vadd.f32 %v4017_v51, %v723_v2 }
 0x23c   : > { %742 = vst [vmem:[#allocation8 + $0x38] sm:$0xff] %v732_v1 }
 0x23d   : > { %740 = vst [vmem:[#allocation8 + $0x28] sm:$0xff] %v724_v3 }
 0x23e PF: > { %v4845_v4 = vld [vmem:[%s5593_s6 + $0x40] sm:$0xff]   ;;  %v4846_v5 = vld [vmem:[%s5593_s6 + $0x48] sm:$0xff]   ;;  %v4847_v6 = vld [vmem:[%s5593_s6 + $0x50] sm:$0xff]   ;;  %v773_v32 = vlaneseq  ;;  %vm1170_vm2 = vcmask 261120   ;;  %vm1260_vm3 = vcmask 523264   ;;  %s5358_s21 = smov 96  }
 0x23f   : > { %4478 = vmatprep.subr.bf16.mxu1 %v4845_v4  ;;  %v4852_v7 = vld [vmem:[%s5593_s6] sm:$0xff]   ;;  %v4848_v8 = vld [vmem:[%s5593_s6 + $0x58] sm:$0xff]   ;;  %v744_v10 = vld [vmem:[#allocation8 + $0x8] sm:$0xff]  ;;  %s5359_s23 = smov 64   ;;  %s5360_s25 = smov 32   ;;  %vm2412_vm4 = vcmask 785408  }
 0x240   : > { %4479 = vmatpush3.bf16.msra.mxu1 %v4845_v4  ;;  %4454 = vmatprep.subr.bf16.mxu0 %v4852_v7  ;;  %v743_v9 = vld [vmem:[#allocation8] sm:$0xff]  ;;  %v4854_v12 = vld [vmem:[%s5593_s6 + $0x8] sm:$0xff]   ;;  %v4855_v14 = vld [vmem:[%s5593_s6 + $0x10] sm:$0xff]   ;;  %v5710_v33 = vshrl.u32 %v773_v32, 7  ;;  %p4732_p12 = scmp.eq.s32.totalorder %s5439_s17, 1 }
 0x241   : > { %4480 = vmatprep.subr.bf16.mxu1 %v4846_v5  ;;  %4455 = vmatpush3.bf16.msra.mxu0 %v4852_v7  ;;  %v751_v11 = vpack.c.bf16 %v744_v10, %v743_v9  ;;  %v4849_v13 = vld [vmem:[%s5593_s6 + $0x60] sm:$0xff]   ;;  %v4856_v15 = vld [vmem:[%s5593_s6 + $0x18] sm:$0xff]   ;;  %v4850_v16 = vld [vmem:[%s5593_s6 + $0x68] sm:$0xff]  }
 0x242   : > { %4456 = vmatprep.subr.bf16.mxu0 %v4854_v12  ;;  %v4851_v17 = vld [vmem:[%s5593_s6 + $0x70] sm:$0xff]   ;;  %v4857_v18 = vld [vmem:[%s5593_s6 + $0x20] sm:$0xff]   ;;  %v4858_v19 = vld [vmem:[%s5593_s6 + $0x28] sm:$0xff]   ;;  %6876 = vst [vmem:[#allocation14_spill] sm:$0xff] %v5710_v33  ;;  %v909_v34 = vsub.s32 1, %v5710_v33  ;;  %v775_v38 = vsub.s32 0, %v5710_v33 }
 0x243   : > { %4494 = vmatprep.mubr.bf16.mxu1 %v751_v11  ;;  %4470 = vmatprep.mubr.bf16.mxu0 %v751_v11  ;;  %v4853_v20 = vld [vmem:[%s5593_s6 + $0x78] sm:$0xff]   ;;  %v745_v21 = vld [vmem:[#allocation8 + $0x10] sm:$0xff]  ;;  %v747_v24 = vld [vmem:[#allocation8 + $0x20] sm:$0xff] }
 0x244   : > { %4481 = vmatpush3.bf16.msra.mxu1 %v4846_v5  ;;  %v746_v22 = vld [vmem:[#allocation8 + $0x18] sm:$0xff]  ;;  %v4859_v23 = vld [vmem:[%s5593_s6 + $0x30] sm:$0xff]   ;;  %v748_v25 = vld [vmem:[#allocation8 + $0x28] sm:$0xff] }
 0x245   : > { %4482 = vmatprep.subr.bf16.mxu1 %v4847_v6  ;;  %4457 = vmatpush3.bf16.msra.mxu0 %v4854_v12  ;;  %v4860_v26 = vld [vmem:[%s5593_s6 + $0x38] sm:$0xff]   ;;  %v5698_v27 = vpack.c.bf16 %v746_v22, %v745_v21  ;;  %v5700_v28 = vpack.c.bf16 %v748_v25, %v747_v24  ;;  %v749_v29 = vld [vmem:[#allocation8 + $0x30] sm:$0xff]  ;;  %v5714_v35 = vld [vmem:[%s5611_s12] sm:$0xff] }
 0x246   : > { %4458 = vmatprep.subr.bf16.mxu0 %v4855_v14  ;;  %v750_v30 = vld [vmem:[#allocation8 + $0x38] sm:$0xff]  ;;  %v910_v36 = vrot.slane %v5714_v35, %v909_v34  ;;  %v776_v46 = vrot.slane %v5714_v35, %v775_v38  ;;  %v4863_v21 = vld [vmem:[%s5593_s6 + $0x90] sm:$0xff]   ;;  %v4866_v24 = vld [vmem:[%s5593_s6 + $0xa8] sm:$0xff]  }
 0x247   : > { %v5704_v31 = vpack.c.bf16 %v750_v30, %v749_v29  ;;  %v4864_v22 = vld [vmem:[%s5593_s6 + $0x98] sm:$0xff]   ;;  %v4867_v25 = vld [vmem:[%s5593_s6 + $0xb0] sm:$0xff]  }
 0x248   : > { %4483 = vmatpush3.bf16.msra.mxu1 %v4847_v6 }
 0x249   : > { %4484 = vmatprep.subr.bf16.mxu1 %v4848_v8  ;;  %4459 = vmatpush3.bf16.msra.mxu0 %v4855_v14 }
 0x24a   : > { %4460 = vmatprep.subr.bf16.mxu0 %v4856_v15 }
 0x24c   : > { %4485 = vmatpush3.bf16.msra.mxu1 %v4848_v8 }
 0x24d   : > { %4486 = vmatprep.subr.bf16.mxu1 %v4849_v13  ;;  %4461 = vmatpush3.bf16.msra.mxu0 %v4856_v15 }
 0x24e   : > { %4462 = vmatprep.subr.bf16.mxu0 %v4857_v18 }
 0x250   : > { %4487 = vmatpush3.bf16.msra.mxu1 %v4849_v13 }
 0x251   : > { %4488 = vmatprep.subr.bf16.mxu1 %v4850_v16  ;;  %4463 = vmatpush3.bf16.msra.mxu0 %v4857_v18 }
 0x252   : > { %4464 = vmatprep.subr.bf16.mxu0 %v4858_v19 }
 0x254   : > { %4489 = vmatpush3.bf16.msra.mxu1 %v4850_v16 }
 0x255   : > { %4490 = vmatprep.subr.bf16.mxu1 %v4851_v17  ;;  %4465 = vmatpush3.bf16.msra.mxu0 %v4858_v19  ;;  %v4861_v19 = vld [vmem:[%s5593_s6 + $0x80] sm:$0xff]  }
 0x256   : > { %4466 = vmatprep.subr.bf16.mxu0 %v4859_v23 }
 0x258   : > { %4491 = vmatpush3.bf16.msra.mxu1 %v4851_v17 }
 0x259   : > { %4492 = vmatprep.subr.bf16.mxu1 %v4853_v20  ;;  %4467 = vmatpush3.bf16.msra.mxu0 %v4859_v23  ;;  %v4865_v23 = vld [vmem:[%s5593_s6 + $0xa0] sm:$0xff]  }
 0x25a   : > { %4468 = vmatprep.subr.bf16.mxu0 %v4860_v26 }
 0x25c   : > { %4493 = vmatpush3.bf16.msra.mxu1 %v4853_v20  ;;  %v4862_v20 = vld [vmem:[%s5593_s6 + $0x88] sm:$0xff]  }
 0x25d   : > { %4469 = vmatpush3.bf16.msra.mxu0 %v4860_v26  ;;  %v4868_v26 = vld [vmem:[%s5593_s6 + $0xb8] sm:$0xff]  }
 0x25e   : > { %4502 = vmatprep.subr.bf16.mxu0 %v4861_v19 }
 0x25f   : > { %4495 = vmatmul.mubr.bf16.vlgmr.msra.gmra.mrb[0].mxu1 %v5698_v27 }
 0x260   : > { %4498 = vmatprep.mubr.bf16.mxu1 %v5700_v28  ;;  %4471 = vmatmul.mubr.bf16.vlgmr.msra.gmra.mrb[0].mxu0 %v5698_v27 }
 0x261   : > { %4474 = vmatprep.mubr.bf16.mxu0 %v5700_v28  ;;  %4503 = vmatpush3.bf16.msra.mxu0 %v4861_v19 }
 0x262   : > { %4504 = vmatprep.subr.bf16.mxu0 %v4862_v20 }
 0x265   : > { %4505 = vmatpush3.bf16.msra.mxu0 %v4862_v20 }
 0x266   : > { %4506 = vmatprep.subr.bf16.mxu0 %v4863_v21 }
 0x267   : > { %4499 = vmatmul.mubr.bf16.gmra.mrb[4].mxu1 %v5704_v31 }
 0x268   : > { %4475 = vmatmul.mubr.bf16.gmra.mrb[4].mxu0 %v5704_v31 }
 0x269   : > { %4518 = vmatprep.mubr.bf16.mxu0 %v751_v11  ;;  %4507 = vmatpush3.bf16.msra.mxu0 %v4863_v21 }
 0x26a   : > { %4508 = vmatprep.subr.bf16.mxu0 %v4864_v22 }
 0x26d   : > { %4509 = vmatpush3.bf16.msra.mxu0 %v4864_v22 }
 0x26e   : > { %4510 = vmatprep.subr.bf16.mxu0 %v4865_v23 }
 0x271   : > { %4511 = vmatpush3.bf16.msra.mxu0 %v4865_v23 }
 0x272   : > { %4512 = vmatprep.subr.bf16.mxu0 %v4866_v24 }
 0x275   : > { %4513 = vmatpush3.bf16.msra.mxu0 %v4866_v24 }
 0x276   : > { %4514 = vmatprep.subr.bf16.mxu0 %v4867_v25 }
 0x279   : > { %4515 = vmatpush3.bf16.msra.mxu0 %v4867_v25 }
 0x27a   : > { %4516 = vmatprep.subr.bf16.mxu0 %v4868_v26 }
 0x27d   : > { %4517 = vmatpush3.bf16.msra.mxu0 %v4868_v26 }
 0x280   : > { %4519 = vmatmul.mubr.bf16.vlgmr.msra.gmra.mrb[8].mxu0 %v5698_v27 }
 0x281   : > { %4522 = vmatprep.mubr.bf16.mxu0 %v5700_v28 }
 0x288   : > { %4523 = vmatmul.mubr.bf16.gmra.mrb[12].mxu0 %v5704_v31 }
 0x332   : > { %v4496_v37 = vpop.f32.mrb[0].mxu1 }
 0x333   : > { %v993_v39 = vpop.f32.mrb[1].mxu1  ;;  %v1002_v41 = vadd.f32 %v4496_v37, %v910_v36  ;;  %v4472_v49 = vpop.f32.mrb[0].mxu0 }
 0x334   : > { %v4497_v40 = vpop.f32.mrb[2].mxu1  ;;  %v994_v44 = vadd.f32 %v993_v39, %v910_v36  ;;  %v868_v52 = vadd.f32 %v4472_v49, %v776_v46  ;;  %v859_v53 = vpop.f32.mrb[1].mxu0  ;;  %v1043_v49 = vsub.s32 2, %v5710_v33 }
 0x335   : > { %v1005_v42 = vadd.f32 %v4497_v40, %v910_v36  ;;  %v996_v43 = vpop.f32.mrb[3].mxu1  ;;  %v860_v56 = vadd.f32 %v859_v53, %v776_v46  ;;  %v4473_v57 = vpop.f32.mrb[2].mxu0 }
 0x336   : > { %v997_v45 = vadd.f32 %v996_v43, %v910_v36  ;;  %v871_v60 = vadd.f32 %v4473_v57, %v776_v46  ;;  %v862_v61 = vpop.f32.mrb[3].mxu0 }
 0x337   : > { %v5723_v47 = vpack.c.bf16 %v1005_v42, %v1002_v41  ;;  %v863_v0 = vadd.f32 %v862_v61, %v776_v46 }
 0x338   : > { %v5725_v48 = vpack.c.bf16 %v997_v45, %v994_v44  ;;  %v5733_v2 = vpack.c.bf16 %v871_v60, %v868_v52 }
 0x339   : > { %v5737_v4 = vpack.c.bf16 %v863_v0, %v860_v56  ;;  %v1187_v7 = vsel %vm1170_vm2, %v5723_v47, 0 }
 0x33a   : > { %4695 = vmatprep.subr.msk.bf16.mxu1 %vm1170_vm2, %v5725_v48  ;;  %v1184_v50 = vsel %vm1170_vm2, %v5725_v48, 0  ;;  %v4500_v51 = vpop.f32.mrb[4].mxu1 }
 0x33b   : > { %4527 = vmatpush3.bf16.xpose.msra.mxu1 %v1184_v50  ;;  %v1018_v54 = vadd.f32 %v4500_v51, %v910_v36  ;;  %v1009_v55 = vpop.f32.mrb[5].mxu1  ;;  %4534 = vmatprep.mubr.msk.bf16.mxu1 %vm1170_vm2, %v5737_v4  ;;  %v4476_v6 = vpop.f32.mrb[4].mxu0  ;;  %v5792_v50 = vrot.slane %v5714_v35, %v1043_v49 }
 0x33c   : > { %4696 = vmatprep.subr.msk.bf16.mxu1 %vm1170_vm2, %v5723_v47  ;;  %v1010_v58 = vadd.f32 %v1009_v55, %v910_v36  ;;  %v4501_v59 = vpop.f32.mrb[6].mxu1  ;;  %v884_v8 = vadd.f32 %v4476_v6, %v776_v46  ;;  %v875_v9 = vpop.f32.mrb[5].mxu0 }
 0x33d   : > { %v1021_v62 = vadd.f32 %v4501_v59, %v910_v36  ;;  %v1012_v63 = vpop.f32.mrb[7].mxu1  ;;  %v876_v10 = vadd.f32 %v875_v9, %v776_v46  ;;  %v4477_v11 = vpop.f32.mrb[6].mxu0 }
 0x33e   : > { %v1013_v1 = vadd.f32 %v1012_v63, %v910_v36  ;;  %v887_v12 = vadd.f32 %v4477_v11, %v776_v46  ;;  %v878_v13 = vpop.f32.mrb[7].mxu0 }
 0x33f   : > { %v5735_v3 = vpack.c.bf16 %v1021_v62, %v1018_v54  ;;  %v879_v14 = vadd.f32 %v878_v13, %v776_v46 }
 0x340   : > { %v5739_v5 = vpack.c.bf16 %v1013_v1, %v1010_v58  ;;  %v5747_v15 = vpack.c.bf16 %v887_v12, %v884_v8 }
 0x341   : > { %v5749_v16 = vpack.c.bf16 %v879_v14, %v876_v10  ;;  %v1193_v18 = vsel %vm1170_vm2, %v5735_v3, 0 }
 0x342   : > { %v1190_v17 = vsel %vm1170_vm2, %v5739_v5, 0 }
 0x343   : > { %4529 = vmatpush3.bf16.xpose.msra.mxu1 %v1187_v7 }
 0x344   : > { %4697 = vmatprep.subr.msk.bf16.mxu1 %vm1170_vm2, %v5739_v5 }
 0x34b   : > { %4531 = vmatpush3.bf16.xpose.msra.mxu1 %v1190_v17 }
 0x34c   : > { %4698 = vmatprep.subr.msk.bf16.mxu1 %vm1170_vm2, %v5735_v3 }
 0x353   : > { %4533 = vmatpush3.bf16.xpose.msra.mxu1 %v1193_v18  ;;  %v4520_v51 = vpop.f32.mrb[8].mxu0 }
 0x354   : > { %v1136_v52 = vadd.f32 %v4520_v51, %v5792_v50  ;;  %v1127_v53 = vpop.f32.mrb[9].mxu0 }
 0x355   : > { %v1128_v54 = vadd.f32 %v1127_v53, %v5792_v50  ;;  %v4521_v55 = vpop.f32.mrb[10].mxu0 }
 0x356   : > { %v1139_v56 = vadd.f32 %v4521_v55, %v5792_v50  ;;  %v1130_v57 = vpop.f32.mrb[11].mxu0 }
 0x357   : > { %v1131_v58 = vadd.f32 %v1130_v57, %v5792_v50 }
 0x358   : > { %v5798_v59 = vpack.c.bf16 %v1139_v56, %v1136_v52 }
 0x359   : > { %v5800_v60 = vpack.c.bf16 %v1131_v58, %v1128_v54 }
 0x35a   : > { %4535 = vmatmul.mubr.msk.bf16.vlgmr.msra.gmra.mrb[8].mxu1 %vm1170_vm2, %v5733_v2 }
 0x35b   : > { %4538 = vmatprep.mubr.msk.bf16.mxu1 %vm1170_vm2, %v5749_v16  ;;  %4542 = vmatprep.subr.bf16.mxu1 %v5800_v60 }
 0x35c   : > { %4543 = vmatpush3.bf16.msra.mxu1 %v5800_v60 }
 0x35d   : > { %4544 = vmatprep.subr.bf16.mxu1 %v5798_v59 }
 0x360   : > { %4545 = vmatpush3.bf16.msra.mxu1 %v5798_v59 }
 0x362   : > { %4539 = vmatmul.mubr.msk.bf16.gmra.mrb[12].mxu1 %vm1170_vm2, %v5747_v15 }
 0x42d   : > { %v4536_v29 = vpop.f32.mrb[8].mxu1 }
 0x42e   : > { %v1229_v30 = vpop.f32.mrb[9].mxu1  ;;  %v1267_v32 = vsel %vm1260_vm3, %v4536_v29, -inf }
 0x42f   : > { %1268 = vmax.xlane.f32.xlu1 %v1267_v32  ;;  %v4537_v36 = vpop.f32.mrb[10].mxu1  ;;  %v1261_v37 = vsel %vm1260_vm3, %v1229_v30, -inf }
 0x430   : > { %1262 = vmax.xlane.f32.xlu0 %v1261_v37  ;;  %v1232_v39 = vpop.f32.mrb[11].mxu1  ;;  %v1270_v40 = vsel %vm1260_vm3, %v4537_v36, -inf }
 0x431   : > { %v1264_v27 = vsel %vm1260_vm3, %v1232_v39, -inf }
 0x433   : > { %1271 = vmax.xlane.f32.xlu1 %v1270_v40 }
 0x434   : > { %1265 = vmax.xlane.f32.xlu0 %v1264_v27 }
 0x435   : > { %v4540_v28 = vpop.f32.mrb[12].mxu1 }
 0x436   : > { %v1245_v41 = vpop.f32.mrb[13].mxu1  ;;  %v1279_v45 = vsel %vm1260_vm3, %v4540_v28, -inf }
 0x437   : > { %v5778_v31 = vpop.f32.mrb[14].mxu1  ;;  %v1273_v42 = vsel %vm1260_vm3, %v1245_v41, -inf }
 0x438   : > { %1274 = vmax.xlane.f32.xlu0 %v1273_v42  ;;  %v5781_v43 = vpop.f32.mrb[15].mxu1  ;;  %v1282_v46 = vsel %vm1260_vm3, %v5778_v31, -inf }
 0x439   : > { %v1276_v44 = vsel %vm1260_vm3, %v5781_v43, -inf }
 0x43a   : > { %1277 = vmax.xlane.f32.xlu1 %v1276_v44 }
 0x43c   : > { %1280 = vmax.xlane.f32.xlu0 %v1279_v45 }
 0x43e   : > { %1283 = vmax.xlane.f32.xlu1 %v1282_v46 }
 0x4bc   : > { %v1269_v35 = vpop.xlane.xlu1 %1268 }
 0x4bd   : > { %v1287_v61 = vsub.f32 %v4536_v29, %v1269_v35  ;;  %v1263_v62 = vpop.xlane.xlu0 %1262 }
 0x4be   : > { %v1285_v63 = vsub.f32 %v1229_v30, %v1263_v62 }
 0x4bf   : > { %v1297_v0 = vmul.f32 1.442695, %v1287_v61 }
 0x4c0   : > { %v1293_v1 = vmul.f32 1.442695, %v1285_v63  ;;  %v1272_v6 = vpop.xlane.xlu1 %1271 }
 0x4c1   : > { %4957 = vpow2.f32 %v1297_v0  ;;  %v1288_v7 = vsub.f32 %v4537_v36, %v1272_v6  ;;  %v1266_v8 = vpop.xlane.xlu0 %1265 }
 0x4c2   : > { %v1286_v9 = vsub.f32 %v1232_v39, %v1266_v8  ;;  %4959 = vpow2.f32 %v1293_v1  ;;  %v4524_v39 = vpop.f32.mrb[12].mxu0 }
 0x4c3   : > { %v1299_v10 = vmul.f32 1.442695, %v1288_v7  ;;  %v1143_v40 = vpop.f32.mrb[13].mxu0  ;;  %v1152_v45 = vadd.f32 %v4524_v39, %v5792_v50 }
 0x4c4   : > { %v1295_v11 = vmul.f32 1.442695, %v1286_v9  ;;  %v4525_v27 = vpop.f32.mrb[14].mxu0 }
 0x4c5   : > { %4961 = vpow2.f32 %v1299_v10  ;;  %v1275_v12 = vpop.xlane.xlu0 %1274  ;;  %v1155_v46 = vadd.f32 %v4525_v27, %v5792_v50 }
 0x4c6   : > { %4963 = vpow2.f32 %v1295_v11  ;;  %v1289_v13 = vsub.f32 %v1245_v41, %v1275_v12  ;;  %v1146_v41 = vpop.f32.mrb[15].mxu0 }
 0x4c7   : > { %v1147_v42 = vadd.f32 %v1146_v41, %v5792_v50  ;;  %v5840_v51 = vpack.c.bf16 %v1155_v46, %v1152_v45  ;;  %v1278_v52 = vpop.xlane.xlu1 %1277 }
 0x4c8   : > { %v1301_v19 = vmul.f32 1.442695, %v1289_v13  ;;  %v1290_v54 = vsub.f32 %v5781_v43, %v1278_v52 }
 0x4c9   : > { %v1281_v14 = vpop.xlane.xlu0 %1280 }
 0x4ca   : > { %v1291_v17 = vsub.f32 %v4540_v28, %v1281_v14  ;;  %v1144_v28 = vadd.f32 %v1143_v40, %v5792_v50  ;;  %v1303_v56 = vmul.f32 1.442695, %v1290_v54 }
 0x4cb   : > { %v5806_v18 = vpop.eup %4957  ;;  %v1284_v53 = vpop.xlane.xlu1 %1283 }
 0x4cc   : > { %v1305_v20 = vmul.f32 1.442695, %v1291_v17  ;;  %v1315_v21 = vsel %vm1260_vm3, %v5806_v18, 0.0  ;;  %v5810_v22 = vpop.eup %4959  ;;  %v5832_v44 = vpack.c.bf16 %v1147_v42, %v1144_v28  ;;  %v1292_v50 = vsub.f32 %v5778_v31, %v1284_v53 }
 0x4cd   : > { %1316 = vadd.xlane.f32.xlu0 %v1315_v21  ;;  %v1309_v24 = vsel %vm1260_vm3, %v5810_v22, 0.0 }
 0x4ce   : > { %4965 = vpow2.f32 %v1305_v20  ;;  %4546 = vmatprep.subr.bf16.mxu1 %v5832_v44  ;;  %v1307_v55 = vmul.f32 1.442695, %v1292_v50 }
 0x4cf   : > { %v5812_v23 = vpop.eup %4961  ;;  %4967 = vpow2.f32 %v1301_v19  ;;  %4547 = vmatpush3.bf16.msra.mxu1 %v5832_v44 }
 0x4d0   : > { %v1318_v25 = vsel %vm1260_vm3, %v5812_v23, 0.0  ;;  %v5818_v26 = vpop.eup %4963  ;;  %4548 = vmatprep.subr.bf16.mxu1 %v5840_v51  ;;  %4969 = vpow2.f32 %v1307_v55 }
 0x4d1   : > { %1310 = vadd.xlane.f32.xlu0 %v1309_v24  ;;  %1319 = vadd.xlane.f32.xlu1 %v1318_v25  ;;  %v1312_v29 = vsel %vm1260_vm3, %v5818_v26, 0.0  ;;  %4971 = vpow2.f32 %v1303_v56 }
 0x4d3   : > { %4549 = vmatpush3.bf16.msra.mxu1 %v5840_v51 }
 0x4d5   : > { %1313 = vadd.xlane.f32.xlu1 %v1312_v29 }
 0x4d8   : > { %v5822_v30 = vpop.eup %4965 }
 0x4d9   : > { %v1327_v32 = vsel %vm1260_vm3, %v5822_v30, 0.0  ;;  %v5826_v36 = vpop.eup %4967 }
 0x4da   : > { %1328 = vadd.xlane.f32.xlu0 %v1327_v32  ;;  %v1321_v37 = vsel %vm1260_vm3, %v5826_v36, 0.0  ;;  %v4970_v57 = vpop.eup %4969 }
 0x4db   : > { %v1330_v58 = vsel %vm1260_vm3, %v4970_v57, 0.0  ;;  %v4972_v35 = vpop.eup %4971 }
 0x4dc   : > { %v1324_v61 = vsel %vm1260_vm3, %v4972_v35, 0.0 }
 0x4de   : > { %1322 = vadd.xlane.f32.xlu0 %v1321_v37 }
 0x4e6   : > { %1448 = vrot.lane.b32.xlu1 %v5723_v47, %s5358_s21 }
 0x4ea   : > { %1450 = vrot.lane.b32.xlu1 %v5739_v5, %s5358_s21 }
 0x4f4   : > { %1446 = vrot.lane.b32.xlu0 %v5725_v48, %s5358_s21 }
 0x4f8   : > { %1434 = vrot.lane.b32.xlu0 %v5737_v4, %s5358_s21 }
 0x4fc   : > { %1438 = vrot.lane.b32.xlu0 %v5749_v16, %s5358_s21 }
 0x50e   : > { %1331 = vadd.xlane.f32.xlu1 %v1330_v58 }
 0x512   : > { %1325 = vadd.xlane.f32.xlu1 %v1324_v61 }
 0x523   : > { %1452 = vrot.lane.b32.xlu1 %v5735_v3, %s5358_s21 }
 0x527   : > { %1436 = vrot.lane.b32.xlu1 %v5733_v2, %s5358_s21 }
 0x52b   : > { %1440 = vrot.lane.b32.xlu1 %v5747_v15, %s5358_s21 }
 0x55a   : > { %v1317_v31 = vpop.xlane.xlu0 %1316 }
 0x55e   : > { %v1311_v43 = vpop.xlane.xlu0 %1310  ;;  %v1320_v62 = vpop.xlane.xlu1 %1319 }
 0x55f   : > { %4973 = vrcp.f32 %v1320_v62 }
 0x560   : > { %4975 = vrcp.f32 %v1311_v43 }
 0x561   : > { %4977 = vrcp.f32 %v1317_v31 }
 0x562   : > { %v1314_v63 = vpop.xlane.xlu1 %1313 }
 0x563   : > { %4979 = vrcp.f32 %v1314_v63 }
 0x566   : > { %v1449_v21 = vpop.permute.xlu1 %1448 }
 0x567   : > { %v1329_v0 = vpop.xlane.xlu0 %1328 }
 0x569   : > { %v4974_v1 = vpop.eup %4973 }
 0x56a   : > { %v4976_v6 = vpop.eup %4975  ;;  %v1344_v10 = vmul.f32 %v4974_v1, %v5812_v23  ;;  %v1451_v23 = vpop.permute.xlu1 %1450 }
 0x56b   : > { %v1323_v7 = vpop.xlane.xlu0 %1322  ;;  %v4978_v8 = vpop.eup %4977  ;;  %v1341_v11 = vmul.f32 %v4976_v6, %v5810_v22  ;;  %v1470_v22 = vsel %vm1170_vm2, %v1449_v21, 0 }
 0x56c   : > { %v1343_v13 = vmul.f32 %v4978_v8, %v5806_v18  ;;  %v1473_v18 = vsel %vm1170_vm2, %v1451_v23, 0 }
 0x56d   : > { %v4980_v9 = vpop.eup %4979 }
 0x56e   : > { %v1342_v12 = vmul.f32 %v4980_v9, %v5818_v26  ;;  %v1350_v19 = vpack.c.bf16 %v1344_v10, %v1343_v13 }
 0x56f   : > { %v1447_v14 = vpop.permute.xlu0 %1446 }
 0x570   : > { %4699 = vmatprep.subr.msk.bf16.mxu1 %vm1170_vm2, %v1447_v14  ;;  %v1349_v17 = vpack.c.bf16 %v1342_v12, %v1341_v11  ;;  %v1467_v20 = vsel %vm1170_vm2, %v1447_v14, 0 }
 0x572   : > { %4550 = vmatprep.mubr.msk.bf16.mxu1 %vm1260_vm3, %v1349_v17 }
 0x573   : > { %4551 = vmatmul.mubr.msk.bf16.vlgmr.msra.gmra.mrb[16].mxu1 %vm1260_vm3, %v1350_v19  ;;  %v1435_v52 = vpop.permute.xlu0 %1434 }
 0x574   : > { %4559 = vmatpush3.bf16.xpose.msra.mxu1 %v1467_v20 }
 0x575   : > { %4700 = vmatprep.subr.msk.bf16.mxu1 %vm1170_vm2, %v1449_v21 }
 0x577   : > { %v1439_v50 = vpop.permute.xlu0 %1438 }
 0x57c   : > { %4561 = vmatpush3.bf16.xpose.msra.mxu1 %v1470_v22 }
 0x57d   : > { %4701 = vmatprep.subr.msk.bf16.mxu1 %vm1170_vm2, %v1451_v23 }
 0x584   : > { %4563 = vmatpush3.bf16.xpose.msra.mxu1 %v1473_v18 }
 0x59b   : > { %v1332_v24 = vpop.xlane.xlu1 %1331 }
 0x59c   : > { %4981 = vrcp.f32 %v1332_v24 }
 0x59d   : > { %4983 = vrcp.f32 %v1323_v7 }
 0x59e   : > { %4985 = vrcp.f32 %v1329_v0 }
 0x59f   : > { %v1326_v25 = vpop.xlane.xlu1 %1325 }
 0x5a0   : > { %4987 = vrcp.f32 %v1326_v25 }
 0x5a3   : > { %v1453_v26 = vpop.permute.xlu1 %1452 }
 0x5a4   : > { %4702 = vmatprep.subr.msk.bf16.mxu1 %vm1170_vm2, %v1453_v26  ;;  %v1476_v29 = vsel %vm1170_vm2, %v1453_v26, 0 }
 0x5a5   : > { %4565 = vmatpush3.bf16.xpose.msra.mxu1 %v1476_v29 }
 0x5a6   : > { %v4982_v32 = vpop.eup %4981 }
 0x5a7   : > { %v4984_v37 = vpop.eup %4983  ;;  %v1348_v27 = vmul.f32 %v4982_v32, %v4970_v57  ;;  %v1437_v53 = vpop.permute.xlu1 %1436 }
 0x5a8   : > { %v4986_v39 = vpop.eup %4985  ;;  %v1345_v28 = vmul.f32 %v4984_v37, %v5826_v36 }
 0x5a9   : > { %v1347_v42 = vmul.f32 %v4986_v39, %v5822_v30 }
 0x5aa   : > { %v4988_v40 = vpop.eup %4987 }
 0x5ab   : > { %v1346_v41 = vmul.f32 %v4988_v40, %v4972_v35  ;;  %v1352_v46 = vpack.c.bf16 %v1348_v27, %v1347_v42  ;;  %v1441_v54 = vpop.permute.xlu1 %1440 }
 0x5ad   : > { %v1351_v45 = vpack.c.bf16 %v1346_v41, %v1345_v28 }
 0x5af   : > { %4554 = vmatprep.mubr.msk.bf16.mxu1 %vm1260_vm3, %v1351_v45 }
 0x5b0   : > { %4555 = vmatmul.mubr.msk.bf16.gmra.mrb[20].mxu1 %vm1260_vm3, %v1352_v46 }
 0x5b1   : > { %4566 = vmatprep.mubr.msk.bf16.mxu1 %vm1170_vm2, %v1435_v52 }
 0x5b8   : > { %4567 = vmatmul.mubr.msk.bf16.vlgmr.msra.gmra.mrb[24].mxu1 %vm1170_vm2, %v1437_v53 }
 0x5b9   : > { %4570 = vmatprep.mubr.msk.bf16.mxu1 %vm1170_vm2, %v1439_v50 }
 0x5c0   : > { %4571 = vmatmul.mubr.msk.bf16.gmra.mrb[28].mxu1 %vm1170_vm2, %v1441_v54 }
 0x646   : > { %v5884_v36 = vpop.f32.mrb[16].mxu1 }
 0x647   : > { %v5886_v30 = vpop.f32.mrb[17].mxu1 }
 0x648   : > { %v5888_v55 = vpop.f32.mrb[18].mxu1 }
 0x649   : > { %v5890_v56 = vpop.f32.mrb[19].mxu1 }
 0x683   : > { %v5892_v57 = vpop.f32.mrb[20].mxu1 }
 0x684   : > { %v5894_v58 = vpop.f32.mrb[21].mxu1 }
 0x685   : > { %v5896_v35 = vpop.f32.mrb[22].mxu1 }
 0x686   : > { %v5898_v61 = vpop.f32.mrb[23].mxu1 }
 0x68b   : > { %v4568_v31 = vpop.f32.mrb[24].mxu1 }
 0x68c   : > { %v1512_v43 = vpop.f32.mrb[25].mxu1  ;;  %v1549_v62 = vsel %vm1260_vm3, %v4568_v31, -inf }
 0x68d   : > { %1550 = vmax.xlane.f32.xlu0 %v1549_v62  ;;  %v4569_v63 = vpop.f32.mrb[26].mxu1  ;;  %v1543_v6 = vsel %vm1260_vm3, %v1512_v43, -inf }
 0x68e   : > { %v1515_v0 = vpop.f32.mrb[27].mxu1  ;;  %v1552_v9 = vsel %vm1260_vm3, %v4569_v63, -inf }
 0x68f   : > { %v1546_v1 = vsel %vm1260_vm3, %v1515_v0, -inf }
 0x690   : > { %1547 = vmax.xlane.f32.xlu1 %v1546_v1 }
 0x691   : > { %1544 = vmax.xlane.f32.xlu0 %v1543_v6 }
 0x693   : > { %v4572_v7 = vpop.f32.mrb[28].mxu1 }
 0x694   : > { %v1528_v8 = vpop.f32.mrb[29].mxu1  ;;  %v1561_v12 = vsel %vm1260_vm3, %v4572_v7, -inf }
 0x695   : > { %1553 = vmax.xlane.f32.xlu0 %v1552_v9  ;;  %v5904_v10 = vpop.f32.mrb[30].mxu1  ;;  %v1555_v13 = vsel %vm1260_vm3, %v1528_v8, -inf }
 0x696   : > { %v5906_v11 = vpop.f32.mrb[31].mxu1  ;;  %v1564_v14 = vsel %vm1260_vm3, %v5904_v10, -inf }
 0x697   : > { %v1558_v17 = vsel %vm1260_vm3, %v5906_v11, -inf }
 0x699   : > { %1562 = vmax.xlane.f32.xlu0 %v1561_v12 }
 0x69d   : > { %1556 = vmax.xlane.f32.xlu0 %v1555_v13 }
 0x6a1   : > { %1641 = vrot.lane.b32.xlu1 %v5798_v59, %s5358_s21 }
 0x6a5   : > { %1643 = vrot.lane.b32.xlu1 %v5832_v44, %s5358_s21 }
 0x6b3   : > { %1639 = vrot.lane.b32.xlu0 %v5800_v60, %s5358_s21 }
 0x6c9   : > { %1565 = vmax.xlane.f32.xlu1 %v1564_v14 }
 0x6cd   : > { %1559 = vmax.xlane.f32.xlu1 %v1558_v17 }
 0x6de   : > { %1645 = vrot.lane.b32.xlu1 %v5840_v51, %s5358_s21 }
 0x71a   : > { %v1551_v19 = vpop.xlane.xlu0 %1550 }
 0x71b   : > { %v1569_v20 = vsub.f32 %v4568_v31, %v1551_v19 }
 0x71d   : > { %v1579_v21 = vmul.f32 1.442695, %v1569_v20  ;;  %v1548_v22 = vpop.xlane.xlu1 %1547 }
 0x71e   : > { %v1545_v23 = vpop.xlane.xlu0 %1544  ;;  %v1568_v24 = vsub.f32 %v1515_v0, %v1548_v22 }
 0x71f   : > { %4989 = vpow2.f32 %v1579_v21  ;;  %v1567_v18 = vsub.f32 %v1512_v43, %v1545_v23 }
 0x720   : > { %v1577_v32 = vmul.f32 1.442695, %v1568_v24 }
 0x721   : > { %v1575_v25 = vmul.f32 1.442695, %v1567_v18  ;;  %v1642_v53 = vpop.permute.xlu1 %1641 }
 0x722   : > { %v1554_v26 = vpop.xlane.xlu0 %1553 }
 0x723   : > { %4991 = vpow2.f32 %v1575_v25  ;;  %v1570_v29 = vsub.f32 %v4569_v63, %v1554_v26 }
 0x725   : > { %v1581_v37 = vmul.f32 1.442695, %v1570_v29  ;;  %v1644_v63 = vpop.permute.xlu1 %1643 }
 0x726   : > { %v1563_v39 = vpop.xlane.xlu0 %1562 }
 0x727   : > { %4993 = vpow2.f32 %v1581_v37  ;;  %v1573_v40 = vsub.f32 %v4572_v7, %v1563_v39 }
 0x728   : > { %4995 = vpow2.f32 %v1577_v32 }
 0x729   : > { %v5922_v27 = vpop.eup %4989  ;;  %v1587_v28 = vmul.f32 1.442695, %v1573_v40 }
 0x72a   : > { %v1557_v41 = vpop.xlane.xlu0 %1556  ;;  %v1597_v42 = vsel %vm1260_vm3, %v5922_v27, 0.0 }
 0x72b   : > { %4997 = vpow2.f32 %v1587_v28  ;;  %v1571_v45 = vsub.f32 %v1528_v8, %v1557_v41  ;;  %1598 = vadd.xlane.f32.xlu0 %v1597_v42 }
 0x72d   : > { %v5926_v46 = vpop.eup %4991  ;;  %v1583_v52 = vmul.f32 1.442695, %v1571_v45 }
 0x72e   : > { %v1640_v50 = vpop.permute.xlu0 %1639  ;;  %v1591_v54 = vsel %vm1260_vm3, %v5926_v46, 0.0 }
 0x72f   : > { %4999 = vpow2.f32 %v1583_v52  ;;  %1592 = vadd.xlane.f32.xlu0 %v1591_v54  ;;  %4574 = vmatprep.subr.bf16.mxu0 %v1640_v50 }
 0x730   : > { %4575 = vmatpush3.bf16.msra.mxu0 %v1640_v50 }
 0x731   : > { %v4994_v31 = vpop.eup %4993  ;;  %4576 = vmatprep.subr.bf16.mxu0 %v1642_v53 }
 0x732   : > { %v1600_v43 = vsel %vm1260_vm3, %v4994_v31, 0.0  ;;  %v4996_v62 = vpop.eup %4995 }
 0x733   : > { %1601 = vadd.xlane.f32.xlu1 %v1600_v43  ;;  %v1594_v6 = vsel %vm1260_vm3, %v4996_v62, 0.0 }
 0x734   : > { %4577 = vmatpush3.bf16.msra.mxu0 %v1642_v53 }
 0x735   : > { %v5931_v0 = vpop.eup %4997  ;;  %4578 = vmatprep.subr.bf16.mxu0 %v1644_v63 }
 0x736   : > { %v1609_v1 = vsel %vm1260_vm3, %v5931_v0, 0.0 }
 0x737   : > { %1610 = vadd.xlane.f32.xlu0 %v1609_v1  ;;  %1595 = vadd.xlane.f32.xlu1 %v1594_v6 }
 0x738   : > { %4579 = vmatpush3.bf16.msra.mxu0 %v1644_v63 }
 0x739   : > { %v5936_v7 = vpop.eup %4999 }
 0x73a   : > { %v1603_v8 = vsel %vm1260_vm3, %v5936_v7, 0.0 }
 0x73b   : > { %1604 = vadd.xlane.f32.xlu0 %v1603_v8 }
 0x748   : > { %1738 = vrot.lane.b32.xlu1 %v5723_v47, %s5359_s23 }
 0x74c   : > { %1740 = vrot.lane.b32.xlu1 %v5739_v5, %s5359_s23 }
 0x756   : > { %v1566_v9 = vpop.xlane.xlu1 %1565 }
 0x757   : > { %v1574_v12 = vsub.f32 %v5904_v10, %v1566_v9 }
 0x759   : > { %v1589_v13 = vmul.f32 1.442695, %v1574_v12 }
 0x75a   : > { %v1560_v14 = vpop.xlane.xlu1 %1559 }
 0x75b   : > { %5001 = vpow2.f32 %v1589_v13  ;;  %v1572_v17 = vsub.f32 %v5906_v11, %v1560_v14 }
 0x75d   : > { %v1585_v19 = vmul.f32 1.442695, %v1572_v17 }
 0x75e   : > { %v1646_v20 = vpop.permute.xlu1 %1645 }
 0x75f   : > { %4580 = vmatprep.subr.bf16.mxu0 %v1646_v20  ;;  %5003 = vpow2.f32 %v1585_v19 }
 0x760   : > { %4581 = vmatpush3.bf16.msra.mxu0 %v1646_v20 }
 0x765   : > { %v5002_v21 = vpop.eup %5001 }
 0x766   : > { %v1612_v22 = vsel %vm1260_vm3, %v5002_v21, 0.0 }
 0x767   : > { %1613 = vadd.xlane.f32.xlu0 %v1612_v22 }
 0x769   : > { %v5004_v23 = vpop.eup %5003 }
 0x76a   : > { %v1606_v18 = vsel %vm1260_vm3, %v5004_v23, 0.0 }
 0x770   : > { %1607 = vadd.xlane.f32.xlu1 %v1606_v18 }
 0x77d   : > { %1736 = vrot.lane.b32.xlu0 %v5725_v48, %s5359_s23 }
 0x781   : > { %1728 = vrot.lane.b32.xlu0 %v5737_v4, %s5359_s23  ;;  %1742 = vrot.lane.b32.xlu1 %v5735_v3, %s5359_s23 }
 0x785   : > { %1732 = vrot.lane.b32.xlu0 %v5749_v16, %s5359_s23  ;;  %1730 = vrot.lane.b32.xlu1 %v5733_v2, %s5359_s23 }
 0x789   : > { %1734 = vrot.lane.b32.xlu1 %v5747_v15, %s5359_s23 }
 0x7b8   : > { %v1599_v10 = vpop.xlane.xlu0 %1598 }
 0x7bc   : > { %v1593_v24 = vpop.xlane.xlu0 %1592 }
 0x7c0   : > { %v1602_v11 = vpop.xlane.xlu1 %1601 }
 0x7c1   : > { %5005 = vrcp.f32 %v1602_v11 }
 0x7c2   : > { %5007 = vrcp.f32 %v1593_v24 }
 0x7c3   : > { %5009 = vrcp.f32 %v1599_v10 }
 0x7c4   : > { %v1596_v25 = vpop.xlane.xlu1 %1595  ;;  %v1611_v52 = vpop.xlane.xlu0 %1610 }
 0x7c5   : > { %5011 = vrcp.f32 %v1596_v25 }
 0x7c8   : > { %v1605_v53 = vpop.xlane.xlu0 %1604  ;;  %v1739_v50 = vpop.permute.xlu1 %1738 }
 0x7cb   : > { %v5006_v26 = vpop.eup %5005 }
 0x7cc   : > { %v5008_v29 = vpop.eup %5007  ;;  %v1626_v39 = vmul.f32 %v5006_v26, %v4994_v31  ;;  %v1741_v63 = vpop.permute.xlu1 %1740 }
 0x7cd   : > { %v5010_v32 = vpop.eup %5009  ;;  %v1623_v40 = vmul.f32 %v5008_v29, %v5926_v46  ;;  %v1760_v46 = vsel %vm1170_vm2, %v1739_v50, 0  ;;  %v1763_v12 = vsel %vm1170_vm2, %v1741_v63, 0 }
 0x7ce   : > { %v1625_v41 = vmul.f32 %v5010_v32, %v5922_v27 }
 0x7cf   : > { %v5012_v37 = vpop.eup %5011 }
 0x7d0   : > { %v1624_v28 = vmul.f32 %v5012_v37, %v4996_v62  ;;  %v1632_v45 = vpack.c.bf16 %v1626_v39, %v1625_v41 }
 0x7d2   : > { %v1631_v42 = vpack.c.bf16 %v1624_v28, %v1623_v40 }
 0x7d4   : > { %4582 = vmatprep.mubr.msk.bf16.mxu0 %vm1260_vm3, %v1631_v42 }
 0x7d5   : > { %4583 = vmatmul.mubr.msk.bf16.vlgmr.msra.gmra.mrb[16].mxu0 %vm1260_vm3, %v1632_v45 }
 0x7f4   : > { %v1614_v54 = vpop.xlane.xlu0 %1613 }
 0x7f5   : > { %5013 = vrcp.f32 %v1614_v54 }
 0x7f6   : > { %5015 = vrcp.f32 %v1605_v53 }
 0x7f7   : > { %5017 = vrcp.f32 %v1611_v52 }
 0x7f8   : > { %v1737_v43 = vpop.permute.xlu0 %1736 }
 0x7f9   : > { %4703 = vmatprep.subr.msk.bf16.mxu0 %vm1170_vm2, %v1737_v43  ;;  %v1757_v31 = vsel %vm1170_vm2, %v1737_v43, 0 }
 0x7fa   : > { %4591 = vmatpush3.bf16.xpose.msra.mxu0 %v1757_v31 }
 0x7fb   : > { %4704 = vmatprep.subr.msk.bf16.mxu0 %vm1170_vm2, %v1739_v50 }
 0x7fc   : > { %v1729_v18 = vpop.permute.xlu0 %1728 }
 0x7fd   : > { %v1608_v27 = vpop.xlane.xlu1 %1607 }
 0x7fe   : > { %5019 = vrcp.f32 %v1608_v27 }
 0x7ff   : > { %v5014_v62 = vpop.eup %5013 }
 0x800   : > { %v5016_v1 = vpop.eup %5015  ;;  %v1630_v9 = vmul.f32 %v5014_v62, %v5002_v21 }
 0x801   : > { %v5018_v6 = vpop.eup %5017  ;;  %v1627_v13 = vmul.f32 %v5016_v1, %v5936_v7  ;;  %v1743_v17 = vpop.permute.xlu1 %1742 }
 0x802   : > { %4593 = vmatpush3.bf16.xpose.msra.mxu0 %v1760_v46  ;;  %v1629_v19 = vmul.f32 %v5018_v6, %v5931_v0  ;;  %v1766_v21 = vsel %vm1170_vm2, %v1743_v17, 0 }
 0x803   : > { %4705 = vmatprep.subr.msk.bf16.mxu0 %vm1170_vm2, %v1741_v63 }
 0x804   : > { %v1634_v22 = vpack.c.bf16 %v1630_v9, %v1629_v19 }
 0x805   : > { %v1731_v7 = vpop.permute.xlu1 %1730 }
 0x808   : > { %v5020_v8 = vpop.eup %5019 }
 0x809   : > { %v1628_v14 = vmul.f32 %v5020_v8, %v5004_v23  ;;  %v1733_v23 = vpop.permute.xlu0 %1732  ;;  %v1735_v0 = vpop.permute.xlu1 %1734 }
 0x80a   : > { %4595 = vmatpush3.bf16.xpose.msra.mxu0 %v1763_v12 }
 0x80b   : > { %4706 = vmatprep.subr.msk.bf16.mxu0 %vm1170_vm2, %v1743_v17  ;;  %v1633_v20 = vpack.c.bf16 %v1628_v14, %v1627_v13 }
 0x80d   : > { %4586 = vmatprep.mubr.msk.bf16.mxu0 %vm1260_vm3, %v1633_v20 }
 0x80e   : > { %4587 = vmatmul.mubr.msk.bf16.gmra.mrb[20].mxu0 %vm1260_vm3, %v1634_v22 }
 0x80f   : > { %4598 = vmatprep.mubr.msk.bf16.mxu0 %vm1170_vm2, %v1729_v18 }
 0x812   : > { %4597 = vmatpush3.bf16.xpose.msra.mxu0 %v1766_v21 }
 0x819   : > { %4599 = vmatmul.mubr.msk.bf16.vlgmr.msra.gmra.mrb[24].mxu0 %vm1170_vm2, %v1731_v7 }
 0x81a   : > { %4602 = vmatprep.mubr.msk.bf16.mxu0 %vm1170_vm2, %v1733_v23 }
 0x821   : > { %4603 = vmatmul.mubr.msk.bf16.gmra.mrb[28].mxu0 %vm1170_vm2, %v1735_v0 }
 0x8a8   : > { %v5980_v10 = vpop.f32.mrb[16].mxu0 }
 0x8a9   : > { %v5982_v11 = vpop.f32.mrb[17].mxu0 }
 0x8aa   : > { %v5984_v24 = vpop.f32.mrb[18].mxu0 }
 0x8ab   : > { %v4790_v25 = vpack.i.bf16 %v5984_v24, %v5980_v10  ;;  %v5988_v26 = vpop.f32.mrb[19].mxu0 }
 0x8ac   : > { %v4785_v29 = vpack.i.bf16 %v5988_v26, %v5982_v11 }
 0x8e1   : > { %v5992_v32 = vpop.f32.mrb[20].mxu0 }
 0x8e2   : > { %v5994_v37 = vpop.f32.mrb[21].mxu0 }
 0x8e3   : > { %v5996_v39 = vpop.f32.mrb[22].mxu0 }
 0x8e4   : > { %v4820_v40 = vpack.i.bf16 %v5996_v39, %v5992_v32  ;;  %v6000_v28 = vpop.f32.mrb[23].mxu0 }
 0x8e5   : > { %v4815_v41 = vpack.i.bf16 %v6000_v28, %v5994_v37 }
 0x8ec   : > { %v4600_v42 = vpop.f32.mrb[24].mxu0 }
 0x8ed   : > { %v1802_v45 = vpop.f32.mrb[25].mxu0  ;;  %v1839_v52 = vsel %vm1260_vm3, %v4600_v42, -inf }
 0x8ee   : > { %1840 = vmax.xlane.f32.xlu0 %v1839_v52  ;;  %v4601_v53 = vpop.f32.mrb[26].mxu0  ;;  %v1833_v43 = vsel %vm1260_vm3, %v1802_v45, -inf }
 0x8ef   : > { %v1805_v50 = vpop.f32.mrb[27].mxu0  ;;  %v1842_v27 = vsel %vm1260_vm3, %v4601_v53, -inf }
 0x8f0   : > { %v1836_v54 = vsel %vm1260_vm3, %v1805_v50, -inf }
 0x8f1   : > { %1837 = vmax.xlane.f32.xlu1 %v1836_v54 }
 0x8f2   : > { %1834 = vmax.xlane.f32.xlu0 %v1833_v43 }
 0x8f4   : > { %v4604_v63 = vpop.f32.mrb[28].mxu0 }
 0x8f5   : > { %v1818_v31 = vpop.f32.mrb[29].mxu0  ;;  %v1851_v1 = vsel %vm1260_vm3, %v4604_v63, -inf }
 0x8f6   : > { %1843 = vmax.xlane.f32.xlu0 %v1842_v27  ;;  %v6008_v46 = vpop.f32.mrb[30].mxu0  ;;  %v1845_v6 = vsel %vm1260_vm3, %v1818_v31, -inf }
 0x8f7   : > { %v6010_v62 = vpop.f32.mrb[31].mxu0  ;;  %v1854_v8 = vsel %vm1260_vm3, %v6008_v46, -inf }
 0x8f8   : > { %v1848_v9 = vsel %vm1260_vm3, %v6010_v62, -inf }
 0x8fa   : > { %1852 = vmax.xlane.f32.xlu0 %v1851_v1 }
 0x8fe   : > { %1846 = vmax.xlane.f32.xlu0 %v1845_v6 }
 0x902   : > { %1927 = vrot.lane.b32.xlu1 %v5798_v59, %s5359_s23 }
 0x906   : > { %1929 = vrot.lane.b32.xlu1 %v5832_v44, %s5359_s23 }
 0x914   : > { %1925 = vrot.lane.b32.xlu0 %v5800_v60, %s5359_s23 }
 0x92a   : > { %1855 = vmax.xlane.f32.xlu1 %v1854_v8 }
 0x92e   : > { %1849 = vmax.xlane.f32.xlu1 %v1848_v9 }
 0x93f   : > { %1931 = vrot.lane.b32.xlu1 %v5840_v51, %s5359_s23 }
 0x97b   : > { %v1841_v12 = vpop.xlane.xlu0 %1840 }
 0x97c   : > { %v1859_v13 = vsub.f32 %v4600_v42, %v1841_v12 }
 0x97e   : > { %v1869_v14 = vmul.f32 1.442695, %v1859_v13  ;;  %v1838_v17 = vpop.xlane.xlu1 %1837 }
 0x97f   : > { %v1835_v19 = vpop.xlane.xlu0 %1834  ;;  %v1858_v22 = vsub.f32 %v1805_v50, %v1838_v17 }
 0x980   : > { %5021 = vpow2.f32 %v1869_v14  ;;  %v1857_v20 = vsub.f32 %v1802_v45, %v1835_v19 }
 0x981   : > { %v1867_v23 = vmul.f32 1.442695, %v1858_v22 }
 0x982   : > { %v1865_v18 = vmul.f32 1.442695, %v1857_v20 }
 0x983   : > { %v1844_v21 = vpop.xlane.xlu0 %1843 }
 0x984   : > { %5023 = vpow2.f32 %v1865_v18  ;;  %v1860_v7 = vsub.f32 %v4601_v53, %v1844_v21  ;;  %v1928_v53 = vpop.permute.xlu1 %1927 }
 0x986   : > { %v1871_v0 = vmul.f32 1.442695, %v1860_v7 }
 0x987   : > { %v1853_v52 = vpop.xlane.xlu0 %1852 }
 0x988   : > { %5025 = vpow2.f32 %v1871_v0  ;;  %v1863_v54 = vsub.f32 %v4604_v63, %v1853_v52 }
 0x989   : > { %5027 = vpow2.f32 %v1867_v23 }
 0x98a   : > { %v6026_v43 = vpop.eup %5021  ;;  %v1877_v27 = vmul.f32 1.442695, %v1863_v54 }
 0x98b   : > { %v1847_v42 = vpop.xlane.xlu0 %1846  ;;  %v1887_v1 = vsel %vm1260_vm3, %v6026_v43, 0.0 }
 0x98c   : > { %5029 = vpow2.f32 %v1877_v27  ;;  %v1861_v45 = vsub.f32 %v1818_v31, %v1847_v42  ;;  %1888 = vadd.xlane.f32.xlu0 %v1887_v1  ;;  %v1930_v31 = vpop.permute.xlu1 %1929 }
 0x98e   : > { %v6030_v50 = vpop.eup %5023  ;;  %v1873_v6 = vmul.f32 1.442695, %v1861_v45 }
 0x98f   : > { %v1926_v8 = vpop.permute.xlu0 %1925  ;;  %v1881_v9 = vsel %vm1260_vm3, %v6030_v50, 0.0 }
 0x990   : > { %5031 = vpow2.f32 %v1873_v6  ;;  %1882 = vadd.xlane.f32.xlu0 %v1881_v9  ;;  %4606 = vmatprep.subr.bf16.mxu1 %v1926_v8 }
 0x991   : > { %4607 = vmatpush3.bf16.msra.mxu1 %v1926_v8 }
 0x992   : > { %v5026_v63 = vpop.eup %5025  ;;  %4608 = vmatprep.subr.bf16.mxu1 %v1928_v53 }
 0x993   : > { %v1890_v12 = vsel %vm1260_vm3, %v5026_v63, 0.0  ;;  %v5028_v13 = vpop.eup %5027 }
 0x994   : > { %1891 = vadd.xlane.f32.xlu1 %v1890_v12  ;;  %v1884_v19 = vsel %vm1260_vm3, %v5028_v13, 0.0 }
 0x995   : > { %4609 = vmatpush3.bf16.msra.mxu1 %v1928_v53 }
 0x996   : > { %v6035_v14 = vpop.eup %5029  ;;  %4610 = vmatprep.subr.bf16.mxu1 %v1930_v31 }
 0x997   : > { %v1899_v17 = vsel %vm1260_vm3, %v6035_v14, 0.0 }
 0x998   : > { %1900 = vadd.xlane.f32.xlu0 %v1899_v17  ;;  %1885 = vadd.xlane.f32.xlu1 %v1884_v19 }
 0x999   : > { %4611 = vmatpush3.bf16.msra.mxu1 %v1930_v31 }
 0x99a   : > { %v6040_v20 = vpop.eup %5031 }
 0x99b   : > { %v1893_v22 = vsel %vm1260_vm3, %v6040_v20, 0.0 }
 0x99c   : > { %1894 = vadd.xlane.f32.xlu0 %v1893_v22 }
 0x9a9   : > { %2024 = vrot.lane.b32.xlu1 %v5723_v47, %s5360_s25 }
 0x9ad   : > { %2026 = vrot.lane.b32.xlu1 %v5739_v5, %s5360_s25 }
 0x9b7   : > { %v1856_v18 = vpop.xlane.xlu1 %1855 }
 0x9b8   : > { %v1864_v21 = vsub.f32 %v6008_v46, %v1856_v18 }
 0x9ba   : > { %v1879_v7 = vmul.f32 1.442695, %v1864_v21 }
 0x9bb   : > { %v1850_v23 = vpop.xlane.xlu1 %1849 }
 0x9bc   : > { %5033 = vpow2.f32 %v1879_v7  ;;  %v1862_v0 = vsub.f32 %v6010_v62, %v1850_v23 }
 0x9be   : > { %v1875_v52 = vmul.f32 1.442695, %v1862_v0 }
 0x9bf   : > { %v1932_v54 = vpop.permute.xlu1 %1931 }
 0x9c0   : > { %4612 = vmatprep.subr.bf16.mxu1 %v1932_v54  ;;  %5035 = vpow2.f32 %v1875_v52 }
 0x9c1   : > { %4613 = vmatpush3.bf16.msra.mxu1 %v1932_v54 }
 0x9c6   : > { %v5034_v27 = vpop.eup %5033 }
 0x9c7   : > { %v1902_v42 = vsel %vm1260_vm3, %v5034_v27, 0.0 }
 0x9c8   : > { %1903 = vadd.xlane.f32.xlu0 %v1902_v42 }
 0x9ca   : > { %v5036_v47 = vpop.eup %5035 }
 0x9cb   : > { %v1896_v5 = vsel %vm1260_vm3, %v5036_v47, 0.0 }
 0x9d1   : > { %1897 = vadd.xlane.f32.xlu1 %v1896_v5 }
 0x9de   : > { %2022 = vrot.lane.b32.xlu0 %v5725_v48, %s5360_s25 }
 0x9e2   : > { %2014 = vrot.lane.b32.xlu0 %v5737_v4, %s5360_s25  ;;  %2028 = vrot.lane.b32.xlu1 %v5735_v3, %s5360_s25 }
 0x9e6   : > { %2018 = vrot.lane.b32.xlu0 %v5749_v16, %s5360_s25  ;;  %2016 = vrot.lane.b32.xlu1 %v5733_v2, %s5360_s25 }
 0x9ea   : > { %2020 = vrot.lane.b32.xlu1 %v5747_v15, %s5360_s25 }
 0xa19   : > { %v1889_v46 = vpop.xlane.xlu0 %1888 }
 0xa1d   : > { %v1883_v1 = vpop.xlane.xlu0 %1882 }
 0xa21   : > { %v1892_v62 = vpop.xlane.xlu1 %1891 }
 0xa22   : > { %5037 = vrcp.f32 %v1892_v62 }
 0xa23   : > { %5039 = vrcp.f32 %v1883_v1 }
 0xa24   : > { %5041 = vrcp.f32 %v1889_v46 }
 0xa25   : > { %v1886_v48 = vpop.xlane.xlu1 %1885  ;;  %v1901_v12 = vpop.xlane.xlu0 %1900 }
 0xa26   : > { %5043 = vrcp.f32 %v1886_v48 }
 0xa29   : > { %v1895_v31 = vpop.xlane.xlu0 %1894  ;;  %v2025_v17 = vpop.permute.xlu1 %2024 }
 0xa2c   : > { %v5038_v4 = vpop.eup %5037 }
 0xa2d   : > { %v5040_v45 = vpop.eup %5039  ;;  %v1916_v53 = vmul.f32 %v5038_v4, %v5026_v63  ;;  %v2027_v18 = vpop.permute.xlu1 %2026 }
 0xa2e   : > { %v5042_v3 = vpop.eup %5041  ;;  %v1913_v16 = vmul.f32 %v5040_v45, %v6030_v50  ;;  %v2046_v50 = vsel %vm1170_vm2, %v2025_v17, 0  ;;  %v2049_v52 = vsel %vm1170_vm2, %v2027_v18, 0 }
 0xa2f   : > { %v1915_v2 = vmul.f32 %v5042_v3, %v6026_v43 }
 0xa30   : > { %v5044_v6 = vpop.eup %5043 }
 0xa31   : > { %v1914_v8 = vmul.f32 %v5044_v6, %v5028_v13  ;;  %v1922_v15 = vpack.c.bf16 %v1916_v53, %v1915_v2 }
 0xa33   : > { %v1921_v9 = vpack.c.bf16 %v1914_v8, %v1913_v16 }
 0xa35   : > { %4614 = vmatprep.mubr.msk.bf16.mxu1 %vm1260_vm3, %v1921_v9 }
 0xa36   : > { %4615 = vmatmul.mubr.msk.bf16.vlgmr.msra.gmra.mrb[32].mxu1 %vm1260_vm3, %v1922_v15 }
 0xa55   : > { %v1904_v19 = vpop.xlane.xlu0 %1903 }
 0xa56   : > { %5045 = vrcp.f32 %v1904_v19 }
 0xa57   : > { %5047 = vrcp.f32 %v1895_v31 }
 0xa58   : > { %5049 = vrcp.f32 %v1901_v12 }
 0xa59   : > { %v2023_v22 = vpop.permute.xlu0 %2022 }
 0xa5a   : > { %v2043_v21 = vsel %vm1170_vm2, %v2023_v22, 0  ;;  %4707 = vmatprep.subr.msk.bf16.mxu1 %vm1170_vm2, %v2023_v22 }
 0xa5b   : > { %4623 = vmatpush3.bf16.xpose.msra.mxu1 %v2043_v21 }
 0xa5c   : > { %4708 = vmatprep.subr.msk.bf16.mxu1 %vm1170_vm2, %v2025_v17 }
 0xa5d   : > { %v2015_v48 = vpop.permute.xlu0 %2014 }
 0xa5e   : > { %v1898_v43 = vpop.xlane.xlu1 %1897 }
 0xa5f   : > { %5051 = vrcp.f32 %v1898_v43 }
 0xa60   : > { %v5046_v63 = vpop.eup %5045 }
 0xa61   : > { %v5048_v13 = vpop.eup %5047  ;;  %v1920_v0 = vmul.f32 %v5046_v63, %v5034_v27 }
 0xa62   : > { %v5050_v7 = vpop.eup %5049  ;;  %v1917_v54 = vmul.f32 %v5048_v13, %v6040_v20  ;;  %v2029_v5 = vpop.permute.xlu1 %2028 }
 0xa63   : > { %4625 = vmatpush3.bf16.xpose.msra.mxu1 %v2046_v50  ;;  %v1919_v46 = vmul.f32 %v5050_v7, %v6035_v14  ;;  %v2052_v27 = vsel %vm1170_vm2, %v2029_v5, 0 }
 0xa64   : > { %4709 = vmatprep.subr.msk.bf16.mxu1 %vm1170_vm2, %v2027_v18 }
 0xa65   : > { %v1924_v1 = vpack.c.bf16 %v1920_v0, %v1919_v46 }
 0xa66   : > { %v2017_v20 = vpop.permute.xlu1 %2016 }
 0xa69   : > { %v5052_v23 = vpop.eup %5051 }
 0xa6a   : > { %v1918_v42 = vmul.f32 %v5052_v23, %v5036_v47  ;;  %v2019_v47 = vpop.permute.xlu0 %2018  ;;  %v2021_v14 = vpop.permute.xlu1 %2020 }
 0xa6b   : > { %4627 = vmatpush3.bf16.xpose.msra.mxu1 %v2049_v52 }
 0xa6c   : > { %4710 = vmatprep.subr.msk.bf16.mxu1 %vm1170_vm2, %v2029_v5  ;;  %v1923_v62 = vpack.c.bf16 %v1918_v42, %v1917_v54 }
 0xa6e   : > { %4618 = vmatprep.mubr.msk.bf16.mxu1 %vm1260_vm3, %v1923_v62 }
 0xa6f   : > { %4619 = vmatmul.mubr.msk.bf16.gmra.mrb[36].mxu1 %vm1260_vm3, %v1924_v1 }
 0xa70   : > { %4630 = vmatprep.mubr.msk.bf16.mxu1 %vm1170_vm2, %v2015_v48 }
 0xa73   : > { %4629 = vmatpush3.bf16.xpose.msra.mxu1 %v2052_v27 }
 0xa7a   : > { %4631 = vmatmul.mubr.msk.bf16.vlgmr.msra.gmra.mrb[40].mxu1 %vm1170_vm2, %v2017_v20 }
 0xa7b   : > { %4634 = vmatprep.mubr.msk.bf16.mxu1 %vm1170_vm2, %v2019_v47 }
 0xa82   : > { %4635 = vmatmul.mubr.msk.bf16.gmra.mrb[44].mxu1 %vm1170_vm2, %v2021_v14 }
 0xb09   : > { %v6084_v4 = vpop.f32.mrb[32].mxu1 }
 0xb0a   : > { %v6086_v45 = vpop.f32.mrb[33].mxu1 }
 0xb0b   : > { %v6088_v3 = vpop.f32.mrb[34].mxu1 }
 0xb0c   : > { %v4800_v6 = vpack.i.bf16 %v6088_v3, %v6084_v4  ;;  %v6092_v53 = vpop.f32.mrb[35].mxu1 }
 0xb0d   : > { %v4795_v16 = vpack.i.bf16 %v6092_v53, %v6086_v45 }
 0xb42   : > { %v6096_v8 = vpop.f32.mrb[36].mxu1 }
 0xb43   : > { %v6098_v2 = vpop.f32.mrb[37].mxu1 }
 0xb44   : > { %v6100_v9 = vpop.f32.mrb[38].mxu1 }
 0xb45   : > { %v4830_v15 = vpack.i.bf16 %v6100_v9, %v6096_v8  ;;  %v6104_v12 = vpop.f32.mrb[39].mxu1 }
 0xb46   : > { %v4825_v31 = vpack.i.bf16 %v6104_v12, %v6098_v2 }
 0xb4d   : > { %v4632_v17 = vpop.f32.mrb[40].mxu1 }
 0xb4e   : > { %v2088_v19 = vpop.f32.mrb[41].mxu1  ;;  %v2125_v50 = vsel %vm1260_vm3, %v4632_v17, -inf }
 0xb4f   : > { %v4633_v22 = vpop.f32.mrb[42].mxu1  ;;  %v2119_v18 = vsel %vm1260_vm3, %v2088_v19, -inf }
 0xb50   : > { %2120 = vmax.xlane.f32.xlu0 %v2119_v18  ;;  %v2091_v21 = vpop.f32.mrb[43].mxu1  ;;  %v2128_v23 = vsel %vm1260_vm3, %v4633_v22, -inf }
 0xb51   : > { %v2122_v43 = vsel %vm1260_vm3, %v2091_v21, -inf }
 0xb52   : > { %2123 = vmax.xlane.f32.xlu1 %v2122_v43 }
 0xb54   : > { %2126 = vmax.xlane.f32.xlu0 %v2125_v50 }
 0xb55   : > { %v4636_v63 = vpop.f32.mrb[44].mxu1 }
 0xb56   : > { %v2104_v13 = vpop.f32.mrb[45].mxu1  ;;  %v2137_v5 = vsel %vm1260_vm3, %v4636_v63, -inf }
 0xb57   : > { %v4637_v7 = vpop.f32.mrb[46].mxu1  ;;  %v2131_v54 = vsel %vm1260_vm3, %v2104_v13, -inf }
 0xb58   : > { %2129 = vmax.xlane.f32.xlu0 %v2128_v23  ;;  %v2107_v0 = vpop.f32.mrb[47].mxu1  ;;  %v2140_v42 = vsel %vm1260_vm3, %v4637_v7, -inf }
 0xb59   : > { %v2134_v52 = vsel %vm1260_vm3, %v2107_v0, -inf }
 0xb5a   : > { %2135 = vmax.xlane.f32.xlu1 %v2134_v52 }
 0xb5c   : > { %2132 = vmax.xlane.f32.xlu0 %v2131_v54 }
 0xb5e   : > { %2141 = vmax.xlane.f32.xlu1 %v2140_v42 }
 0xb60   : > { %2138 = vmax.xlane.f32.xlu0 %v2137_v5 }
 0xb76   : > { %2211 = vrot.lane.b32.xlu0 %v5800_v60, %s5360_s25 }
 0xbdd   : > { %v2121_v46 = vpop.xlane.xlu0 %2120 }
 0xbde   : > { %v2143_v62 = vsub.f32 %v2088_v19, %v2121_v46 }
 0xbdf   : > { %v2124_v1 = vpop.xlane.xlu1 %2123 }
 0xbe0   : > { %v2151_v20 = vmul.f32 1.442695, %v2143_v62  ;;  %v2144_v47 = vsub.f32 %v2091_v21, %v2124_v1 }
 0xbe1   : > { %v2127_v48 = vpop.xlane.xlu0 %2126 }
 0xbe2   : > { %v2145_v27 = vsub.f32 %v4632_v17, %v2127_v48  ;;  %v2153_v23 = vmul.f32 1.442695, %v2144_v47 }
 0xbe4   : > { %v2155_v14 = vmul.f32 1.442695, %v2145_v27 }
 0xbe5   : > { %v2130_v18 = vpop.xlane.xlu0 %2129 }
 0xbe6   : > { %5053 = vpow2.f32 %v2155_v14  ;;  %v2146_v43 = vsub.f32 %v4633_v22, %v2130_v18 }
 0xbe7   : > { %v2136_v50 = vpop.xlane.xlu1 %2135  ;;  %5055 = vpow2.f32 %v2151_v20 }
 0xbe8   : > { %v2157_v52 = vmul.f32 1.442695, %v2146_v43 }
 0xbe9   : > { %v2133_v54 = vpop.xlane.xlu0 %2132 }
 0xbea   : > { %5057 = vpow2.f32 %v2157_v52  ;;  %v2147_v42 = vsub.f32 %v2104_v13, %v2133_v54  ;;  %v2148_v13 = vsub.f32 %v2107_v0, %v2136_v50 }
 0xbeb   : > { %5059 = vpow2.f32 %v2153_v23  ;;  %v2142_v60 = vpop.xlane.xlu1 %2141 }
 0xbec   : > { %v2159_v17 = vmul.f32 1.442695, %v2147_v42  ;;  %v2150_v62 = vsub.f32 %v4637_v7, %v2142_v60  ;;  %v2161_v14 = vmul.f32 1.442695, %v2148_v13 }
 0xbed   : > { %v2139_v5 = vpop.xlane.xlu0 %2138 }
 0xbee   : > { %v2149_v19 = vsub.f32 %v4636_v63, %v2139_v5  ;;  %v2165_v20 = vmul.f32 1.442695, %v2150_v62 }
 0xbf0   : > { %v6118_v46 = vpop.eup %5053  ;;  %v2163_v21 = vmul.f32 1.442695, %v2149_v19 }
 0xbf1   : > { %v2212_v1 = vpop.permute.xlu0 %2211  ;;  %v2173_v22 = vsel %vm1260_vm3, %v6118_v46, 0.0  ;;  %v5056_v48 = vpop.eup %5055 }
 0xbf2   : > { %5061 = vpow2.f32 %v2163_v21  ;;  %2174 = vadd.xlane.f32.xlu0 %v2173_v22  ;;  %4638 = vmatprep.subr.bf16.mxu0 %v2212_v1  ;;  %v2167_v63 = vsel %vm1260_vm3, %v5056_v48, 0.0 }
 0xbf3   : > { %4639 = vmatpush3.bf16.msra.mxu0 %v2212_v1  ;;  %5063 = vpow2.f32 %v2159_v17 }
 0xbf4   : > { %v6122_v27 = vpop.eup %5057  ;;  %5065 = vpow2.f32 %v2165_v20 }
 0xbf5   : > { %v2176_v7 = vsel %vm1260_vm3, %v6122_v27, 0.0  ;;  %v5060_v47 = vpop.eup %5059  ;;  %5067 = vpow2.f32 %v2161_v14 }
 0xbf6   : > { %2168 = vadd.xlane.f32.xlu0 %v2167_v63  ;;  %2177 = vadd.xlane.f32.xlu1 %v2176_v7  ;;  %v2170_v18 = vsel %vm1260_vm3, %v5060_v47, 0.0 }
 0xbfa   : > { %2171 = vadd.xlane.f32.xlu1 %v2170_v18 }
 0xbfc   : > { %v6128_v43 = vpop.eup %5061 }
 0xbfd   : > { %v2185_v0 = vsel %vm1260_vm3, %v6128_v43, 0.0  ;;  %v5064_v50 = vpop.eup %5063 }
 0xbfe   : > { %2186 = vadd.xlane.f32.xlu1 %v2185_v0  ;;  %v2179_v23 = vsel %vm1260_vm3, %v5064_v50, 0.0  ;;  %v5066_v52 = vpop.eup %5065  ;;  %v4870_v0 = vld [vmem:[%s5593_s6 + $0xc8] sm:$0xff]  }
 0xbff   : > { %v2188_v54 = vsel %vm1260_vm3, %v5066_v52, 0.0  ;;  %v5068_v42 = vpop.eup %5067 }
 0xc00   : > { %v2182_v60 = vsel %vm1260_vm3, %v5068_v42, 0.0 }
 0xc02   : > { %2180 = vadd.xlane.f32.xlu1 %v2179_v23  ;;  %v4872_v23 = vld [vmem:[%s5593_s6 + $0xd8] sm:$0xff]  }
 0xc06   : > { %2189 = vadd.xlane.f32.xlu1 %v2188_v54  ;;  %v4875_v54 = vld [vmem:[%s5593_s6 + $0xf0] sm:$0xff]  }
 0xc0a   : > { %2183 = vadd.xlane.f32.xlu1 %v2182_v60 }
 0xc0c   : > { %2215 = vrot.lane.b32.xlu0 %v5832_v44, %s5360_s25 }
 0xc10   : > { %2217 = vrot.lane.b32.xlu0 %v5840_v51, %s5360_s25 }
 0xc14   : > { %4786 = vrot.lane.b32.xlu0 %v4785_v29, %s5360_s25 }
 0xc18   : > { %4796 = vrot.lane.b32.xlu0 %v4795_v16, %s5359_s23 }
 0xc1b   : > { %2213 = vrot.lane.b32.xlu1 %v5798_v59, %s5360_s25 }
 0xc1f   : > { %4791 = vrot.lane.b32.xlu1 %v4790_v25, %s5360_s25 }
 0xc23   : > { %4801 = vrot.lane.b32.xlu1 %v4800_v6, %s5359_s23 }
 0xc7f   : > { %v2175_v44 = vpop.xlane.xlu0 %2174 }
 0xc83   : > { %v2169_v51 = vpop.xlane.xlu0 %2168  ;;  %v2178_v11 = vpop.xlane.xlu1 %2177 }
 0xc84   : > { %5069 = vrcp.f32 %v2169_v51 }
 0xc87   : > { %v2172_v26 = vpop.xlane.xlu1 %2171  ;;  %v2216_v25 = vpop.permute.xlu0 %2215 }
 0xc88   : > { %5071 = vrcp.f32 %v2172_v26 }
 0xc89   : > { %5073 = vrcp.f32 %v2178_v11 }
 0xc8a   : > { %5075 = vrcp.f32 %v2175_v44 }
 0xc8b   : > { %v2187_v29 = vpop.xlane.xlu1 %2186  ;;  %v2218_v62 = vpop.permute.xlu0 %2217 }
 0xc8e   : > { %v5070_v53 = vpop.eup %5069 }
 0xc8f   : > { %v2181_v45 = vpop.xlane.xlu1 %2180  ;;  %v2199_v5 = vmul.f32 %v5070_v53, %v5056_v48  ;;  %v4787_v37 = vpop.permute.xlu0 %4786 }
 0xc90   : > { %5077 = vrcp.f32 %v2181_v45  ;;  %v4788_v28 = vunpack.i.l.bf16 %v4787_v37 }
 0xc92   : > { %v5072_v59 = vpop.eup %5071  ;;  %v2396_v12 = vsel %vm1170_vm2, %v5886_v30, %v4788_v28  ;;  %v2444_v28 = vsub.s32 3, %v5710_v33 }
 0xc93   : > { %v2190_v16 = vpop.xlane.xlu1 %2189  ;;  %v2200_v19 = vmul.f32 %v5072_v59, %v5060_v47  ;;  %v5074_v3 = vpop.eup %5073 }
 0xc94   : > { %v5076_v6 = vpop.eup %5075  ;;  %v2202_v1 = vmul.f32 %v5074_v3, %v6122_v27 }
 0xc95   : > { %v2207_v10 = vpack.c.bf16 %v2200_v19, %v2199_v5  ;;  %v2201_v48 = vmul.f32 %v5076_v6, %v6118_v46  ;;  %v4869_v46 = vld [vmem:[%s5593_s6 + $0xc0] sm:$0xff]  }
 0xc97   : > { %4646 = vmatprep.mubr.msk.bf16.mxu0 %vm1260_vm3, %v2207_v10  ;;  %v2184_v24 = vpop.xlane.xlu1 %2183  ;;  %v2208_v20 = vpack.c.bf16 %v2202_v1, %v2201_v48 }
 0xc98   : > { %5079 = vrcp.f32 %v2184_v24 }
 0xc99   : > { %5081 = vrcp.f32 %v2190_v16 }
 0xc9a   : > { %5083 = vrcp.f32 %v2187_v29  ;;  %v5078_v17 = vpop.eup %5077 }
 0xc9b   : > { %v2214_v4 = vpop.permute.xlu1 %2213  ;;  %v2203_v13 = vmul.f32 %v5078_v17, %v5064_v50  ;;  %v4871_v50 = vld [vmem:[%s5593_s6 + $0xd0] sm:$0xff]  }
 0xc9c   : > { %4640 = vmatprep.subr.bf16.mxu0 %v2214_v4 }
 0xc9d   : > { %4641 = vmatpush3.bf16.msra.mxu0 %v2214_v4 }
 0xc9e   : > { %4642 = vmatprep.subr.bf16.mxu0 %v2216_v25 }
 0xc9f   : > { %v4792_v32 = vpop.permute.xlu1 %4791 }
 0xca0   : > { %v4794_v10 = vunpack.i.h.bf16 %v4792_v32  ;;  %v4793_v24 = vunpack.i.l.bf16 %v4792_v32 }
 0xca1   : > { %4643 = vmatpush3.bf16.msra.mxu0 %v2216_v25 }
 0xca2   : > { %v5080_v21 = vpop.eup %5079  ;;  %4644 = vmatprep.subr.bf16.mxu0 %v2218_v62  ;;  %v2399_v4 = vsel %vm1170_vm2, %v5888_v55, %v4794_v10  ;;  %v2398_v3 = vsel %vm1170_vm2, %v5884_v36, %v4793_v24 }
 0xca3   : > { %v2204_v22 = vmul.f32 %v5080_v21, %v5068_v42  ;;  %v5082_v63 = vpop.eup %5081  ;;  %v4876_v42 = vld [vmem:[%s5593_s6 + $0xf8] sm:$0xff]   ;;  %v4802_v39 = vpop.permute.xlu1 %4801 }
 0xca4   : > { %v5084_v47 = vpop.eup %5083  ;;  %v2206_v27 = vmul.f32 %v5082_v63, %v5066_v52  ;;  %v4873_v52 = vld [vmem:[%s5593_s6 + $0xe0] sm:$0xff]   ;;  %v4804_v25 = vunpack.i.h.bf16 %v4802_v39  ;;  %v4803_v8 = vunpack.i.l.bf16 %v4802_v39 }
 0xca5   : > { %4645 = vmatpush3.bf16.msra.mxu0 %v2218_v62  ;;  %v2209_v7 = vpack.c.bf16 %v2204_v22, %v2203_v13  ;;  %v2205_v14 = vmul.f32 %v5084_v47, %v6128_v43  ;;  %v4874_v43 = vld [vmem:[%s5593_s6 + $0xe8] sm:$0xff]   ;;  %s5362_s6 = smov [#allocation8]  }
 0xca6   : > { %4654 = vmatprep.subr.bf16.mxu0 %v4869_v46  ;;  %v2406_v21 = vsel %vm1260_vm3, %v2398_v3, %v4803_v8  ;;  %v2407_v1 = vsel %vm1260_vm3, %v2399_v4, %v4804_v25  ;;  %v5183_v3 = vld [vmem:[#allocation8 + $0x8] sm:$0xff] }
 0xca7   : > { %v2210_v18 = vpack.c.bf16 %v2206_v27, %v2205_v14 }
 0xca8   : > { %4647 = vmatmul.mubr.msk.bf16.vlgmr.msra.gmra.mrb[32].mxu0 %vm1260_vm3, %v2208_v20 }
 0xca9   : > { %4650 = vmatprep.mubr.msk.bf16.mxu0 %vm1260_vm3, %v2209_v7  ;;  %4655 = vmatpush3.bf16.msra.mxu0 %v4869_v46 }
 0xcaa   : > { %4656 = vmatprep.subr.bf16.mxu0 %v4870_v0 }
 0xcad   : > { %4657 = vmatpush3.bf16.msra.mxu0 %v4870_v0 }
 0xcae   : > { %4658 = vmatprep.subr.bf16.mxu0 %v4871_v50 }
 0xcb0   : > { %4651 = vmatmul.mubr.msk.bf16.gmra.mrb[36].mxu0 %vm1260_vm3, %v2210_v18 }
 0xcb1   : > { %4659 = vmatpush3.bf16.msra.mxu0 %v4871_v50 }
 0xcb2   : > { %4660 = vmatprep.subr.bf16.mxu0 %v4872_v23 }
 0xcb5   : > { %4661 = vmatpush3.bf16.msra.mxu0 %v4872_v23 }
 0xcb6   : > { %4662 = vmatprep.subr.bf16.mxu0 %v4873_v52 }
 0xcb9   : > { %4663 = vmatpush3.bf16.msra.mxu0 %v4873_v52 }
 0xcba   : > { %4664 = vmatprep.subr.bf16.mxu0 %v4874_v43 }
 0xcbd   : > { %4665 = vmatpush3.bf16.msra.mxu0 %v4874_v43 }
 0xcbe   : > { %4666 = vmatprep.subr.bf16.mxu0 %v4875_v54 }
 0xcc1   : > { %4667 = vmatpush3.bf16.msra.mxu0 %v4875_v54 }
 0xcc2   : > { %4668 = vmatprep.subr.bf16.mxu0 %v4876_v42 }
 0xcc5   : > { %4669 = vmatpush3.bf16.msra.mxu0 %v4876_v42 }
 0xd7b   : > { %v4648_v60 = vpop.f32.mrb[32].mxu0 }
 0xd7c   : > { %v2269_v44 = vpop.f32.mrb[33].mxu0 }
 0xd7d   : > { %v4649_v51 = vpop.f32.mrb[34].mxu0 }
 0xd7e   : > { %v4810_v11 = vpack.i.bf16 %v4649_v51, %v4648_v60  ;;  %v2272_v26 = vpop.f32.mrb[35].mxu0 }
 0xd7f   : > { %v4805_v29 = vpack.i.bf16 %v2272_v26, %v2269_v44 }
 0xd80   : > { %4811 = vrot.lane.b32.xlu1 %v4810_v11, %s5358_s21 }
 0xd81   : > { %4806 = vrot.lane.b32.xlu0 %v4805_v29, %s5358_s21 }
 0xd83   : > { %v4652_v45 = vpop.f32.mrb[36].mxu0 }
 0xd84   : > { %4821 = vrot.lane.b32.xlu1 %v4820_v40, %s5360_s25  ;;  %v2285_v53 = vpop.f32.mrb[37].mxu0  ;;  %v4789_v40 = vunpack.i.h.bf16 %v4787_v37 }
 0xd85   : > { %4816 = vrot.lane.b32.xlu0 %v4815_v41, %s5360_s25  ;;  %v4653_v59 = vpop.f32.mrb[38].mxu0  ;;  %v4797_v41 = vpop.permute.xlu0 %4796 }
 0xd86   : > { %v4840_v16 = vpack.i.bf16 %v4653_v59, %v4652_v45  ;;  %v2288_v5 = vpop.f32.mrb[39].mxu0  ;;  %v4799_v9 = vunpack.i.h.bf16 %v4797_v41  ;;  %v2397_v2 = vsel %vm1170_vm2, %v5890_v56, %v4789_v40 }
 0xd87   : > { %v4835_v19 = vpack.i.bf16 %v2288_v5, %v2285_v53 }
 0xd88   : > { %4831 = vrot.lane.b32.xlu1 %v4830_v15, %s5359_s23  ;;  %v4798_v15 = vunpack.i.l.bf16 %v4797_v41  ;;  %v2405_v30 = vsel %vm1260_vm3, %v2397_v2, %v4799_v9  ;;  %v6226_v41 = vld [vmem:[%s5611_s12] sm:$0xff] }
 0xd89   : > { %4826 = vrot.lane.b32.xlu0 %v4825_v31, %s5359_s23  ;;  %v2445_v10 = vrot.slane %v6226_v41, %v2444_v28 }
 0xd8a   : > { %v2404_v48 = vsel %vm1260_vm3, %v2396_v12, %v4798_v15  ;;  %v5182_v12 = vld [vmem:[#allocation8] sm:$0xff] }
 0xd8c   : > { %4841 = vrot.lane.b32.xlu1 %v4840_v16, %s5358_s21 }
 0xd8d   : > { %4836 = vrot.lane.b32.xlu0 %v4835_v19, %s5358_s21 }
 0xdf2   : > { %v4812_v31 = vpop.permute.xlu1 %4811 }
 0xdf3   : > { %v4814_v6 = vunpack.i.h.bf16 %v4812_v31  ;;  %v4813_v17 = vunpack.i.l.bf16 %v4812_v31  ;;  %v4807_v62 = vpop.permute.xlu0 %4806 }
 0xdf4   : > { %v4809_v22 = vunpack.i.h.bf16 %v4807_v62  ;;  %v4808_v56 = vunpack.i.l.bf16 %v4807_v62 }
 0xdf5   : > { %v2415_v13 = vsel %vm2412_vm4, %v2406_v21, %v4813_v17  ;;  %v2416_v55 = vsel %vm2412_vm4, %v2407_v1, %v4814_v6  ;;  %v5184_v17 = vld [vmem:[#allocation8 + $0x10] sm:$0xff]  ;;  %v5185_v1 = vld [vmem:[#allocation8 + $0x18] sm:$0xff] }
 0xdf6   : > { %v2422_v20 = vpack.c.bf16 %v2416_v55, %v2415_v13  ;;  %v4822_v63 = vpop.permute.xlu1 %4821  ;;  %v2413_v36 = vsel %vm2412_vm4, %v2404_v48, %v4808_v56  ;;  %v2414_v7 = vsel %vm2412_vm4, %v2405_v30, %v4809_v22 }
 0xdf7   : > { %v4817_v47 = vpop.permute.xlu0 %4816  ;;  %v2421_v27 = vpack.c.bf16 %v2414_v7, %v2413_v36  ;;  %v4824_v14 = vunpack.i.h.bf16 %v4822_v63  ;;  %v4823_v18 = vunpack.i.l.bf16 %v4822_v63  ;;  %v5186_v63 = vld [vmem:[#allocation8 + $0x20] sm:$0xff] }
 0xdf8   : > { %v4819_v0 = vunpack.i.h.bf16 %v4817_v47  ;;  %v4818_v50 = vunpack.i.l.bf16 %v4817_v47 }
 0xdf9   : > { %4670 = vmatprep.mubr.bf16.mxu0 %v2421_v27  ;;  %v2403_v60 = vsel %vm1170_vm2, %v5896_v35, %v4824_v14  ;;  %v2402_v44 = vsel %vm1170_vm2, %v5892_v57, %v4823_v18  ;;  %v5187_v27 = vld [vmem:[#allocation8 + $0x28] sm:$0xff]  ;;  %v5188_v18 = vld [vmem:[#allocation8 + $0x30] sm:$0xff] }
 0xdfa   : > { %v4832_v46 = vpop.permute.xlu1 %4831  ;;  %4671 = vmatmul.mubr.bf16.vlgmr.msra.gmra.mrb[40].mxu0 %v2422_v20  ;;  %v2401_v11 = vsel %vm1170_vm2, %v5898_v61, %v4819_v0  ;;  %v2400_v26 = vsel %vm1170_vm2, %v5894_v58, %v4818_v50  ;;  %v5189_v0 = vld [vmem:[#allocation8 + $0x38] sm:$0xff] }
 0xdfb   : > { %v4827_v23 = vpop.permute.xlu0 %4826  ;;  %v4834_v52 = vunpack.i.h.bf16 %v4832_v46  ;;  %v4833_v43 = vunpack.i.l.bf16 %v4832_v46 }
 0xdfc   : > { %v4829_v54 = vunpack.i.h.bf16 %v4827_v23  ;;  %v4828_v42 = vunpack.i.l.bf16 %v4827_v23  ;;  %v4877_v23 = vld [vmem:[%s5600_s13] ss:$16 sps:$4 sm:$0xff]  }
 0xdfd   : > { %v2410_v59 = vsel %vm1260_vm3, %v2402_v44, %v4833_v43  ;;  %v2411_v16 = vsel %vm1260_vm3, %v2403_v60, %v4834_v52  ;;  %v4879_v52 = vld [vmem:[%s5600_s13 + $0x4] ss:$16 sps:$4 sm:$0xff]   ;;  %v4880_v43 = vld [vmem:[%s5600_s13 + $0x8] ss:$16 sps:$4 sm:$0xff]   ;;  %v4888_v60 = vld [vmem:[%s5600_s13 + $0x2c] ss:$16 sps:$4 sm:$0xff]  }
 0xdfe   : > { %v4842_v51 = vpop.permute.xlu1 %4841  ;;  %v2408_v19 = vsel %vm1260_vm3, %v2400_v26, %v4828_v42  ;;  %v2409_v57 = vsel %vm1260_vm3, %v2401_v11, %v4829_v54  ;;  %v4882_v54 = vld [vmem:[%s5600_s13 + $0xc] ss:$16 sps:$4 sm:$0xff]   ;;  %v4885_v42 = vld [vmem:[%s5600_s13 + $0x24] ss:$16 sps:$4 sm:$0xff]   ;;  %2898 = vmatprep.subr.bf16.mxu1 %v4879_v52  ;;  %v4883_v44 = vld [vmem:[%s5600_s13 + $0x20] ss:$16 sps:$4 sm:$0xff]  }
 0xdff   : > { %v4844_v29 = vunpack.i.h.bf16 %v4842_v51  ;;  %v4843_v45 = vunpack.i.l.bf16 %v4842_v51  ;;  %v4837_v53 = vpop.permute.xlu0 %4836  ;;  %2971 = vmatprep.subr.bf16.mxu0 %v4882_v54  ;;  %2899 = vmatpush1.bf16.msra.mxu1 %v4877_v23  ;;  %v4886_v51 = vld [vmem:[%s5600_s13 + $0x28] ss:$16 sps:$4 sm:$0xff]   ;;  %v4913_v23 = vld [vmem:[%s5600_s13 + $0xc0] ss:$16 sps:$4 sm:$0xff]   ;;  %v4924_v54 = vld [vmem:[%s5600_s13 + $0xec] ss:$16 sps:$4 sm:$0xff]  }
 0xe00   : > { %v4839_v5 = vunpack.i.h.bf16 %v4837_v53  ;;  %v4838_v35 = vunpack.i.l.bf16 %v4837_v53  ;;  %2972 = vmatpush1.bf16.msra.mxu0 %v4880_v43  ;;  %2900 = vmatprep.subr.bf16.mxu1 %v4885_v42  ;;  %v4916_v52 = vld [vmem:[%s5600_s13 + $0xc8] ss:$16 sps:$4 sm:$0xff]   ;;  %v4921_v43 = vld [vmem:[%s5600_s13 + $0xe4] ss:$16 sps:$4 sm:$0xff]   ;;  %v4919_v42 = vld [vmem:[%s5600_s13 + $0xe0] ss:$16 sps:$4 sm:$0xff]  }
 0xe01   : > { %v2419_v32 = vsel %vm2412_vm4, %v2410_v59, %v4843_v45  ;;  %v2420_v61 = vsel %vm2412_vm4, %v2411_v16, %v4844_v29  ;;  %2973 = vmatprep.subr.bf16.mxu0 %v4888_v60  ;;  %v4922_v60 = vld [vmem:[%s5600_s13 + $0xe8] ss:$16 sps:$4 sm:$0xff]  }
 0xe02   : > { %v2417_v58 = vsel %vm2412_vm4, %v2408_v19, %v4838_v35  ;;  %v2418_v37 = vsel %vm2412_vm4, %v2409_v57, %v4839_v5  ;;  %v2424_v39 = vpack.c.bf16 %v2420_v61, %v2419_v32 }
 0xe03   : > { %v2423_v40 = vpack.c.bf16 %v2418_v37, %v2417_v58  ;;  %2901 = vmatpush1.bf16.msra.mxu1 %v4883_v44  ;;  %v5361_v44 = vmov 0  }
 0xe04   : > { %2974 = vmatpush1.bf16.msra.mxu0 %v4886_v51  ;;  %2930 = vmatprep.mubr.bf16.mxu1 %v5361_v44 }
 0xe05   : > { %4674 = vmatprep.mubr.bf16.mxu0 %v2423_v40 }
 0xe06   : > { %4675 = vmatmul.mubr.bf16.gmra.mrb[44].mxu0 %v2424_v39 }
 0xe07   : > { %3003 = vmatprep.mubr.bf16.mxu0 %v5361_v44 }
 0xecd   : > { %v4672_v24 = vpop.f32.mrb[40].mxu0 }
 0xece   : > { %v2528_v25 = vpop.f32.mrb[41].mxu0  ;;  %v2537_v2 = vadd.f32 %v4672_v24, %v2445_v10 }
 0xecf   : > { %v2529_v8 = vadd.f32 %v2528_v25, %v2445_v10  ;;  %v4673_v9 = vpop.f32.mrb[42].mxu0 }
 0xed0   : > { %v2531_v15 = vpop.f32.mrb[43].mxu0  ;;  %v2561_v62 = vadd.f32 %v5184_v17, %v2537_v2  ;;  %v2540_v21 = vadd.f32 %v4673_v9, %v2445_v10 }
 0xed1   : > { %v2559_v31 = vadd.f32 %v5182_v12, %v2529_v8  ;;  %v2532_v4 = vadd.f32 %v2531_v15, %v2445_v10 }
 0xed2   : > { %v2562_v22 = vadd.f32 %v5185_v1, %v2540_v21  ;;  %v4891_v21 = vld [vmem:[%s5600_s13 + $0x44] ss:$16 sps:$4 sm:$0xff]   ;;  %v4894_v1 = vld [vmem:[%s5600_s13 + $0x4c] ss:$16 sps:$4 sm:$0xff]  }
 0xed3   : > { %v2560_v6 = vadd.f32 %v5183_v3, %v2532_v4  ;;  %2567 = vadd.xlane.f32.xlu0 %v2559_v31  ;;  %2902 = vmatprep.subr.bf16.mxu1 %v4891_v21 }
 0xed4   : > { %2975 = vmatprep.subr.bf16.mxu0 %v4894_v1 }
 0xed5   : > { %2569 = vadd.xlane.f32.xlu1 %v2560_v6 }
 0xed7   : > { %2571 = vadd.xlane.f32.xlu0 %v2561_v62 }
 0xed9   : > { %v4676_v56 = vpop.f32.mrb[44].mxu0 }
 0xeda   : > { %v2544_v48 = vpop.f32.mrb[45].mxu0  ;;  %v2553_v20 = vadd.f32 %v4676_v56, %v2445_v10  ;;  %v4892_v56 = vld [vmem:[%s5600_s13 + $0x48] ss:$16 sps:$4 sm:$0xff]  }
 0xedb   : > { %v2545_v30 = vadd.f32 %v2544_v48, %v2445_v10  ;;  %v4677_v13 = vpop.f32.mrb[46].mxu0  ;;  %2573 = vadd.xlane.f32.xlu0 %v2562_v22  ;;  %2976 = vmatpush1.bf16.msra.mxu0 %v4892_v56 }
 0xedc   : > { %v2547_v55 = vpop.f32.mrb[47].mxu0  ;;  %v2556_v47 = vadd.f32 %v4677_v13, %v2445_v10  ;;  %v2565_v46 = vadd.f32 %v5188_v18, %v2553_v20  ;;  %v4900_v13 = vld [vmem:[%s5600_s13 + $0x6c] ss:$16 sps:$4 sm:$0xff]   ;;  %v4898_v20 = vld [vmem:[%s5600_s13 + $0x68] ss:$16 sps:$4 sm:$0xff]  }
 0xedd   : > { %v2563_v36 = vadd.f32 %v5186_v63, %v2545_v30  ;;  %v2548_v7 = vadd.f32 %v2547_v55, %v2445_v10  ;;  %v4897_v30 = vld [vmem:[%s5600_s13 + $0x64] ss:$16 sps:$4 sm:$0xff]   ;;  %v4895_v55 = vld [vmem:[%s5600_s13 + $0x60] ss:$16 sps:$4 sm:$0xff]   ;;  %2977 = vmatprep.subr.bf16.mxu0 %v4900_v13 }
 0xede   : > { %v2566_v50 = vadd.f32 %v5189_v0, %v2556_v47  ;;  %v4903_v63 = vld [vmem:[%s5600_s13 + $0x84] ss:$16 sps:$4 sm:$0xff]   ;;  %v4904_v47 = vld [vmem:[%s5600_s13 + $0x88] ss:$16 sps:$4 sm:$0xff]   ;;  %v4907_v18 = vld [vmem:[%s5600_s13 + $0xa0] ss:$16 sps:$4 sm:$0xff]  }
 0xedf   : > { %v2564_v14 = vadd.f32 %v5187_v27, %v2548_v7  ;;  %2575 = vadd.xlane.f32.xlu0 %v2563_v36  ;;  %2978 = vmatpush1.bf16.msra.mxu0 %v4898_v20  ;;  %v4901_v7 = vld [vmem:[%s5600_s13 + $0x80] ss:$16 sps:$4 sm:$0xff]   ;;  %v4909_v27 = vld [vmem:[%s5600_s13 + $0xa4] ss:$16 sps:$4 sm:$0xff]  }
 0xee0   : > { %v4915_v0 = vld [vmem:[%s5600_s13 + $0xc4] ss:$16 sps:$4 sm:$0xff]  }
 0xee1   : > { %2577 = vadd.xlane.f32.xlu1 %v2564_v14 }
 0xee3   : > { %2579 = vadd.xlane.f32.xlu0 %v2565_v46 }
 0xee5   : > { %2581 = vadd.xlane.f32.xlu1 %v2566_v50 }
 0xf60   : > { %v2568_v11 = vpop.xlane.xlu0 %2567 }
 0xf61   : > { %v2584_v26 = vmul.f32 0.0078125, %v2568_v11 }
 0xf62   : > { %v2570_v29 = vpop.xlane.xlu1 %2569 }
 0xf63   : > { %v6239_v45 = vsub.f32 %v2559_v31, %v2584_v26  ;;  %v2585_v53 = vmul.f32 0.0078125, %v2570_v29 }
 0xf64   : > { %v2572_v59 = vpop.xlane.xlu0 %2571 }
 0xf65   : > { %v6241_v16 = vsub.f32 %v2560_v6, %v2585_v53  ;;  %v2586_v5 = vmul.f32 0.0078125, %v2572_v59  ;;  %v2600_v35 = vmul.f32 %v6239_v45, %v6239_v45 }
 0xf67   : > { %v6245_v19 = vsub.f32 %v2561_v62, %v2586_v5  ;;  %2608 = vadd.xlane.f32.xlu0 %v2600_v35  ;;  %v2601_v57 = vmul.f32 %v6241_v16, %v6241_v16 }
 0xf68   : > { %v2574_v32 = vpop.xlane.xlu0 %2573 }
 0xf69   : > { %v2587_v61 = vmul.f32 0.0078125, %v2574_v32  ;;  %2610 = vadd.xlane.f32.xlu1 %v2601_v57  ;;  %v2602_v58 = vmul.f32 %v6245_v19, %v6245_v19 }
 0xf6b   : > { %v6251_v37 = vsub.f32 %v2562_v22, %v2587_v61  ;;  %2612 = vadd.xlane.f32.xlu0 %v2602_v58  ;;  %v4889_v22 = vld [vmem:[%s5600_s13 + $0x40] ss:$16 sps:$4 sm:$0xff]   ;;  %v2658_v58 = vsub.s32 4, %v5710_v33 }
 0xf6c   : > { %v2576_v39 = vpop.xlane.xlu0 %2575  ;;  %2903 = vmatpush1.bf16.msra.mxu1 %v4889_v22 }
 0xf6d   : > { %v2588_v40 = vmul.f32 0.0078125, %v2576_v39  ;;  %v2603_v10 = vmul.f32 %v6251_v37, %v6251_v37  ;;  %2904 = vmatprep.subr.bf16.mxu1 %v4897_v30 }
 0xf6e   : > { %v2578_v24 = vpop.xlane.xlu1 %2577 }
 0xf6f   : > { %v6255_v25 = vsub.f32 %v2563_v36, %v2588_v40  ;;  %v2589_v8 = vmul.f32 0.0078125, %v2578_v24  ;;  %2614 = vadd.xlane.f32.xlu1 %v2603_v10  ;;  %v4906_v36 = vld [vmem:[%s5600_s13 + $0x8c] ss:$16 sps:$4 sm:$0xff]   ;;  %v2659_v24 = vrot.slane %v6226_v41, %v2658_v58 }
 0xf70   : > { %v2580_v9 = vpop.xlane.xlu0 %2579  ;;  %2905 = vmatpush1.bf16.msra.mxu1 %v4895_v55  ;;  %2979 = vmatprep.subr.bf16.mxu0 %v4906_v36  ;;  %v4931_v58 = vld [vmem:[%s5618_s27 + $0x8] sm:$0xff]  }
 0xf71   : > { %v6257_v15 = vsub.f32 %v2564_v14, %v2589_v8  ;;  %v2590_v2 = vmul.f32 0.0078125, %v2580_v9  ;;  %v2604_v12 = vmul.f32 %v6255_v25, %v6255_v25  ;;  %2906 = vmatprep.subr.bf16.mxu1 %v4903_v63  ;;  %2980 = vmatpush1.bf16.msra.mxu0 %v4904_v47  ;;  %v4912_v14 = vld [vmem:[%s5600_s13 + $0xac] ss:$16 sps:$4 sm:$0xff]   ;;  %v2670_v9 = vsub.s32 5, %v5710_v33 }
 0xf72   : > { %v2582_v31 = vpop.xlane.xlu1 %2581  ;;  %2981 = vmatprep.subr.bf16.mxu0 %v4912_v14 }
 0xf73   : > { %v6261_v4 = vsub.f32 %v2565_v46, %v2590_v2  ;;  %v2591_v3 = vmul.f32 0.0078125, %v2582_v31  ;;  %2616 = vadd.xlane.f32.xlu0 %v2604_v12  ;;  %v2605_v6 = vmul.f32 %v6257_v15, %v6257_v15  ;;  %v4910_v46 = vld [vmem:[%s5600_s13 + $0xa8] ss:$16 sps:$4 sm:$0xff]   ;;  %v2671_v30 = vrot.slane %v6226_v41, %v2670_v9 }
 0xf74   : > { %2907 = vmatpush1.bf16.msra.mxu1 %v4901_v7  ;;  %v4937_v9 = vld [vmem:[%s5618_s27 + $0x58] sm:$0xff]  }
 0xf75   : > { %v6265_v17 = vsub.f32 %v2566_v50, %v2591_v3  ;;  %2618 = vadd.xlane.f32.xlu1 %v2605_v6  ;;  %v2606_v62 = vmul.f32 %v6261_v4, %v6261_v4  ;;  %2908 = vmatprep.subr.bf16.mxu1 %v4909_v27  ;;  %v4918_v50 = vld [vmem:[%s5600_s13 + $0xcc] ss:$16 sps:$4 sm:$0xff]   ;;  %s3872_s13 = sshll.u32 %s5362_s6, 4  ;;  %s3873_s13 = int_to_ptr.vmem [resolvable:$true] %s3872_s13 }
 0xf76   : > { %2982 = vmatpush1.bf16.msra.mxu0 %v4910_v46  ;;  %p5288_p5 = scmp.lt.s32.totalorder %s3873_s13, %s3873_s13 }
 0xf77   : > { %2620 = vadd.xlane.f32.xlu0 %v2606_v62  ;;  %v2607_v48 = vmul.f32 %v6265_v17, %v6265_v17  ;;  %2983 = vmatprep.subr.bf16.mxu0 %v4918_v50 }
 0xf78   : > { %2909 = vmatpush1.bf16.msra.mxu1 %v4907_v18 }
 0xf79   : > { %2622 = vadd.xlane.f32.xlu1 %v2607_v48  ;;  %2910 = vmatprep.subr.bf16.mxu1 %v4915_v0 }
 0xf7a   : > { %2984 = vmatpush1.bf16.msra.mxu0 %v4916_v52 }
 0xf7b   : > { %2985 = vmatprep.subr.bf16.mxu0 %v4924_v54 }
 0xf7c   : > { %2911 = vmatpush1.bf16.msra.mxu1 %v4913_v23 }
 0xf7d   : > { %2912 = vmatprep.subr.bf16.mxu1 %v4921_v43 }
 0xf7e   : > { %2986 = vmatpush1.bf16.msra.mxu0 %v4922_v60 }
 0xf80   : > { %2913 = vmatpush1.bf16.msra.mxu1 %v4919_v42 }
 0xff4   : > { %v2609_v51 = vpop.xlane.xlu0 %2608 }
 0xff5   : > { %v2624_v11 = vmul.f32 0.0078125, %v2609_v51 }
 0xff6   : > { %v2611_v26 = vpop.xlane.xlu1 %2610 }
 0xff7   : > { %v2632_v29 = vadd.f32 1e-05, %v2624_v11  ;;  %v2625_v53 = vmul.f32 0.0078125, %v2611_v26 }
 0xff8   : > { %v2613_v59 = vpop.xlane.xlu0 %2612 }
 0xff9   : > { %5085 = vrsqrt.f32 %v2632_v29  ;;  %v2633_v5 = vadd.f32 1e-05, %v2625_v53  ;;  %v2626_v35 = vmul.f32 0.0078125, %v2613_v59 }
 0xffb   : > { %5087 = vrsqrt.f32 %v2633_v5  ;;  %v2634_v57 = vadd.f32 1e-05, %v2626_v35  ;;  %v4925_v5 = vld [vmem:[%s5618_s27 + $0x40] sm:$0xff]  }
 0xffc   : > { %v2615_v32 = vpop.xlane.xlu1 %2614  ;;  %v4926_v35 = vld [vmem:[%s5618_s27 + $0xc0] sm:$0xff]   ;;  %4340 = vmatprep.subr.bf16.mxu1 %v4925_v5 }
 0xffd   : > { %5089 = vrsqrt.f32 %v2634_v57  ;;  %v2627_v61 = vmul.f32 0.0078125, %v2615_v32  ;;  %4380 = vmatprep.subr.bf16.mxu0 %v4926_v35  ;;  %v4927_v57 = vld [vmem:[%s5618_s27] sm:$0xff]   ;;  %v4929_v32 = vld [vmem:[%s5618_s27 + $0x48] sm:$0xff]  }
 0xfff   : > { %v2635_v39 = vadd.f32 1e-05, %v2627_v61  ;;  %v4930_v61 = vld [vmem:[%s5618_s27 + $0xc8] sm:$0xff]  }
0x1000   : > { %v2617_v40 = vpop.xlane.xlu0 %2616 }
0x1001   : > { %5091 = vrsqrt.f32 %v2635_v39  ;;  %v2628_v10 = vmul.f32 0.0078125, %v2617_v40  ;;  %v4932_v39 = vld [vmem:[%s5618_s27 + $0x88] sm:$0xff]   ;;  %v4933_v40 = vld [vmem:[%s5618_s27 + $0x50] sm:$0xff]  }
0x1002   : > { %v2619_v8 = vpop.xlane.xlu1 %2618 }
0x1003   : > { %v5086_v2 = vpop.eup %5085  ;;  %v2636_v12 = vadd.f32 1e-05, %v2628_v10  ;;  %v2629_v31 = vmul.f32 0.0078125, %v2619_v8  ;;  %v4934_v10 = vld [vmem:[%s5618_s27 + $0xd0] sm:$0xff]  }
0x1004   : > { %v2648_v3 = vmul.f32 %v5086_v2, %v6239_v45  ;;  %v2621_v6 = vpop.xlane.xlu0 %2620  ;;  %v4936_v8 = vld [vmem:[%s5618_s27 + $0x90] sm:$0xff]   ;;  %v4938_v2 = vld [vmem:[%s5618_s27 + $0xd8] sm:$0xff]  }
0x1005   : > { %v5088_v62 = vpop.eup %5087  ;;  %5093 = vrsqrt.f32 %v2636_v12  ;;  %v2637_v21 = vadd.f32 1e-05, %v2629_v31  ;;  %v2630_v1 = vmul.f32 0.0078125, %v2621_v6  ;;  %v4939_v12 = vld [vmem:[%s5618_s27 + $0x18] sm:$0xff]   ;;  %v4942_v6 = vld [vmem:[%s5618_s27 + $0xe0] sm:$0xff]  }
0x1006   : > { %v2660_v22 = vmul.f32 %v2659_v24, %v2648_v3  ;;  %v2649_v56 = vmul.f32 %v5088_v62, %v6241_v16  ;;  %v2623_v48 = vpop.xlane.xlu1 %2622  ;;  %v4940_v31 = vld [vmem:[%s5618_s27 + $0x98] sm:$0xff]   ;;  %v4941_v3 = vld [vmem:[%s5618_s27 + $0x60] sm:$0xff]  }
0x1007   : > { %v5090_v13 = vpop.eup %5089  ;;  %5095 = vrsqrt.f32 %v2637_v21  ;;  %v2631_v55 = vmul.f32 0.0078125, %v2623_v48  ;;  %v2638_v63 = vadd.f32 1e-05, %v2630_v1  ;;  %v4943_v62 = vld [vmem:[%s5618_s27 + $0x20] sm:$0xff]   ;;  %v4945_v1 = vld [vmem:[%s5618_s27 + $0x68] sm:$0xff]  }
0x1008   : > { %v2661_v20 = vmul.f32 %v2659_v24, %v2649_v56  ;;  %v6303_v7 = vadd.f32 %v2671_v30, %v2660_v22  ;;  %v2650_v47 = vmul.f32 %v5090_v13, %v6245_v19  ;;  %v4944_v21 = vld [vmem:[%s5618_s27 + $0xa0] sm:$0xff]   ;;  %v4946_v22 = vld [vmem:[%s5618_s27 + $0xe8] sm:$0xff]   ;;  %v4950_v13 = vld [vmem:[%s5618_s27 + $0xf0] sm:$0xff]  }
0x1009   : > { %v2639_v36 = vadd.f32 1e-05, %v2631_v55  ;;  %v4947_v56 = vld [vmem:[%s5618_s27 + $0x28] sm:$0xff]   ;;  %v4951_v55 = vld [vmem:[%s5618_s27 + $0x30] sm:$0xff]  }
0x100a   : > { %6877 = vst [vmem:[#allocation15_spill] sm:$0xff] %v6303_v7  ;;  %v6305_v45 = vadd.f32 %v2671_v30, %v2661_v20  ;;  %v2662_v41 = vmul.f32 %v2659_v24, %v2650_v47  ;;  %v4948_v48 = vld [vmem:[%s5618_s27 + $0xa8] sm:$0xff]   ;;  %v4952_v20 = vld [vmem:[%s5618_s27 + $0xb0] sm:$0xff]   ;;  %v4955_v47 = vld [vmem:[%s5618_s27 + $0x38] sm:$0xff]  }
0x100b   : > { %v5092_v27 = vpop.eup %5091  ;;  %5097 = vrsqrt.f32 %v2639_v36  ;;  %v4954_v36 = vld [vmem:[%s5618_s27 + $0xf8] sm:$0xff]  }
0x100c   : > { %6878 = vst [vmem:[#allocation16_spill] sm:$0xff] %v6305_v45  ;;  %v2680_v16 = vpack.c.bf16 %v6305_v45, %v6303_v7  ;;  %v2651_v14 = vmul.f32 %v5092_v27, %v6251_v37  ;;  %5099 = vrsqrt.f32 %v2638_v63  ;;  %v6315_v50 = vadd.f32 %v2671_v30, %v2662_v41  ;;  %v4953_v63 = vld [vmem:[%s5618_s27 + $0x78] sm:$0xff]  }
0x100d   : > { %v4956_v27 = vld [vmem:[%s5618_s27 + $0xb8] sm:$0xff]  }
0x100e   : > { %2931 = vmatmul.mubr.bf16.vlgmr.msra.gmra.mrb[48].mxu1 %v2680_v16  ;;  %3004 = vmatmul.mubr.bf16.vlgmr.msra.gmra.mrb[48].mxu0 %v2680_v16  ;;  %v2663_v18 = vmul.f32 %v2659_v24, %v2651_v14  ;;  %6880 = vst [vmem:[#allocation18_spill] sm:$0xff] %v6315_v50  ;;  %v2716_v16 = vld [vmem:[%s5616_s5] sm:$0xf] }
0x100f   : > { %v5094_v46 = vpop.eup %5093  ;;  %2940 = vmatprep.mubr.bf16.mxu1 %v5361_v44  ;;  %3013 = vmatprep.mubr.bf16.mxu0 %v5361_v44  ;;  %v6374_v14 = vrot.slane %v2716_v16, %v775_v38  ;;  %v6378_v41 = vrot.slane %v2716_v16, %v1043_v49 }
0x1010   : > { %v6313_v0 = vadd.f32 %v2671_v30, %v2663_v18  ;;  %v2652_v23 = vmul.f32 %v5094_v46, %v6255_v25  ;;  %4341 = vmatpush3.bf16.msra.mxu1 %v4927_v57  ;;  %v6382_v18 = vrot.slane %v2716_v16, %v909_v34  ;;  %v6386_v46 = vrot.slane %v2716_v16, %v2444_v28 }
0x1011   : > { %v5096_v19 = vpop.eup %5095  ;;  %4342 = vmatprep.subr.bf16.mxu1 %v4929_v32 }
0x1012   : > { %6879 = vst [vmem:[#allocation17_spill] sm:$0xff] %v6313_v0  ;;  %v2653_v52 = vmul.f32 %v5096_v19, %v6257_v15  ;;  %v2681_v37 = vpack.c.bf16 %v6313_v0, %v6315_v50  ;;  %v2664_v42 = vmul.f32 %v2659_v24, %v2652_v23 }
0x1014   : > { %v2665_v43 = vmul.f32 %v2659_v24, %v2653_v52  ;;  %v6326_v15 = vadd.f32 %v2671_v30, %v2664_v42  ;;  %4343 = vmatpush3.bf16.msra.mxu1 %v4931_v58 }
0x1015   : > { %v5098_v54 = vpop.eup %5097  ;;  %4344 = vmatprep.subr.bf16.mxu1 %v4933_v40 }
0x1016   : > { %2941 = vmatmul.mubr.bf16.gmra.mrb[52].mxu1 %v2681_v37  ;;  %3014 = vmatmul.mubr.bf16.gmra.mrb[52].mxu0 %v2681_v37  ;;  %v5100_v60 = vpop.eup %5099  ;;  %v6323_v51 = vadd.f32 %v2671_v30, %v2665_v43  ;;  %v2655_v25 = vmul.f32 %v5098_v54, %v6265_v17  ;;  %6882 = vst [vmem:[#allocation20_spill] sm:$0xff] %v6326_v15 }
0x1017   : > { %2950 = vmatprep.mubr.bf16.mxu1 %v5361_v44  ;;  %3023 = vmatprep.mubr.bf16.mxu0 %v5361_v44  ;;  %v2654_v11 = vmul.f32 %v5100_v60, %v6261_v4 }
0x1018   : > { %6881 = vst [vmem:[#allocation19_spill] sm:$0xff] %v6323_v51  ;;  %v2682_v26 = vpack.c.bf16 %v6323_v51, %v6326_v15  ;;  %v2667_v29 = vmul.f32 %v2659_v24, %v2655_v25 }
0x1019   : > { %v2666_v53 = vmul.f32 %v2659_v24, %v2654_v11  ;;  %v4935_v24 = vld [vmem:[%s5618_s27 + $0x10] sm:$0xff]  }
0x101a   : > { %v6333_v17 = vadd.f32 %v2671_v30, %v2667_v29  ;;  %4345 = vmatpush3.bf16.msra.mxu1 %v4935_v24 }
0x101b   : > { %v6335_v4 = vadd.f32 %v2671_v30, %v2666_v53  ;;  %4346 = vmatprep.subr.bf16.mxu1 %v4937_v9  ;;  %v4949_v30 = vld [vmem:[%s5618_s27 + $0x70] sm:$0xff]  }
0x101c   : > { %6883 = vst [vmem:[#allocation21_spill] sm:$0xff] %v6333_v17 }
0x101d   : > { %6884 = vst [vmem:[#allocation22_spill] sm:$0xff] %v6335_v4  ;;  %v2683_v59 = vpack.c.bf16 %v6333_v17, %v6335_v4 }
0x101e   : > { %2951 = vmatmul.mubr.bf16.gmra.mrb[56].mxu1 %v2682_v26  ;;  %3024 = vmatmul.mubr.bf16.gmra.mrb[56].mxu0 %v2682_v26 }
0x101f   : > { %2960 = vmatprep.mubr.bf16.mxu1 %v5361_v44  ;;  %3033 = vmatprep.mubr.bf16.mxu0 %v5361_v44  ;;  %v4928_v44 = vld [vmem:[%s5618_s27 + $0x80] sm:$0xff]  }
0x1020   : > { %4381 = vmatpush3.bf16.msra.mxu0 %v4928_v44  ;;  %4347 = vmatpush3.bf16.msra.mxu1 %v4939_v12 }
0x1021   : > { %4382 = vmatprep.subr.bf16.mxu0 %v4930_v61  ;;  %4348 = vmatprep.subr.bf16.mxu1 %v4941_v3 }
0x1024   : > { %4383 = vmatpush3.bf16.msra.mxu0 %v4932_v39  ;;  %4349 = vmatpush3.bf16.msra.mxu1 %v4943_v62 }
0x1025   : > { %4384 = vmatprep.subr.bf16.mxu0 %v4934_v10  ;;  %4350 = vmatprep.subr.bf16.mxu1 %v4945_v1 }
0x1026   : > { %2961 = vmatmul.mubr.bf16.gmra.mrb[60].mxu1 %v2683_v59  ;;  %3034 = vmatmul.mubr.bf16.gmra.mrb[60].mxu0 %v2683_v59 }
0x1028   : > { %4385 = vmatpush3.bf16.msra.mxu0 %v4936_v8  ;;  %4351 = vmatpush3.bf16.msra.mxu1 %v4947_v56 }
0x1029   : > { %4386 = vmatprep.subr.bf16.mxu0 %v4938_v2  ;;  %4352 = vmatprep.subr.bf16.mxu1 %v4949_v30 }
0x102c   : > { %4387 = vmatpush3.bf16.msra.mxu0 %v4940_v31  ;;  %4353 = vmatpush3.bf16.msra.mxu1 %v4951_v55 }
0x102d   : > { %4388 = vmatprep.subr.bf16.mxu0 %v4942_v6  ;;  %4354 = vmatprep.subr.bf16.mxu1 %v4953_v63 }
0x1030   : > { %4389 = vmatpush3.bf16.msra.mxu0 %v4944_v21  ;;  %4355 = vmatpush3.bf16.msra.mxu1 %v4955_v47 }
0x1031   : > { %4390 = vmatprep.subr.bf16.mxu0 %v4946_v22 }
0x1034   : > { %4391 = vmatpush3.bf16.msra.mxu0 %v4948_v48 }
0x1035   : > { %4392 = vmatprep.subr.bf16.mxu0 %v4950_v13 }
0x1038   : > { %4393 = vmatpush3.bf16.msra.mxu0 %v4952_v20 }
0x1039   : > { %4394 = vmatprep.subr.bf16.mxu0 %v4954_v36 }
0x103c   : > { %4395 = vmatpush3.bf16.msra.mxu0 %v4956_v27 }
0x10e1   : > { %v2932_v19 = vpop.f32.mrb[48].mxu1  ;;  %v3005_v23 = vpop.f32.mrb[48].mxu0 }
0x10e2   : > { %v2933_v52 = vadd.f32 %v2932_v19, %v6374_v14  ;;  %v3006_v37 = vadd.f32 %v3005_v23, %v6378_v41  ;;  %v2934_v38 = vpop.f32.mrb[49].mxu1  ;;  %v3007_v43 = vpop.f32.mrb[49].mxu0 }
0x10e3   : > { %v6391_v54 = vadd.f32 %v2934_v38, %v6382_v18  ;;  %v6394_v49 = vadd.f32 %v3007_v43, %v6386_v46  ;;  %v2936_v34 = vpop.f32.mrb[50].mxu1  ;;  %v3009_v42 = vpop.f32.mrb[50].mxu0 }
0x10e4   : > { %v3076_v60 = vmul.f32 0.044715, %v2933_v52  ;;  %v3078_v25 = vmul.f32 0.044715, %v3006_v37  ;;  %v2937_v11 = vadd.f32 %v2936_v34, %v6374_v14  ;;  %v3010_v26 = vadd.f32 %v3009_v42, %v6378_v41  ;;  %v2938_v29 = vpop.f32.mrb[51].mxu1  ;;  %v3011_v53 = vpop.f32.mrb[51].mxu0 }
0x10e5   : > { %v3077_v28 = vmul.f32 0.044715, %v6391_v54  ;;  %v3079_v35 = vmul.f32 0.044715, %v6394_v49  ;;  %v6401_v57 = vadd.f32 %v2938_v29, %v6382_v18  ;;  %v6404_v39 = vadd.f32 %v3011_v53, %v6386_v46 }
0x10e6   : > { %v3108_v59 = vmul.f32 %v3076_v60, %v2933_v52  ;;  %v3110_v5 = vmul.f32 %v3078_v25, %v3006_v37  ;;  %v3080_v44 = vmul.f32 0.044715, %v2937_v11  ;;  %v3082_v58 = vmul.f32 0.044715, %v3010_v26 }
0x10e7   : > { %v3109_v40 = vmul.f32 %v3077_v28, %v6391_v54  ;;  %v3111_v2 = vmul.f32 %v3079_v35, %v6394_v49  ;;  %v3081_v31 = vmul.f32 0.044715, %v6401_v57  ;;  %v6415_v30 = vmul.f32 0.5, %v2933_v52 }
0x10e8   : > { %v3140_v32 = vmul.f32 %v3108_v59, %v2933_v52  ;;  %v3142_v61 = vmul.f32 %v3110_v5, %v3006_v37  ;;  %v3112_v10 = vmul.f32 %v3080_v44, %v2937_v11  ;;  %v3114_v12 = vmul.f32 %v3082_v58, %v3010_v26 }
0x10e9   : > { %v2942_v24 = vpop.f32.mrb[52].mxu1  ;;  %v3015_v8 = vpop.f32.mrb[52].mxu0  ;;  %v6417_v13 = vmul.f32 0.5, %v3006_v37  ;;  %v3083_v20 = vmul.f32 0.044715, %v6404_v39  ;;  %v6420_v27 = vmul.f32 0.5, %v2937_v11  ;;  %v6430_v34 = vmul.f32 %v3109_v40, %v6391_v54 }
0x10ea   : > { %v3172_v9 = vadd.f32 %v3140_v32, %v2933_v52  ;;  %v2944_v3 = vpop.f32.mrb[53].mxu1  ;;  %v3017_v6 = vpop.f32.mrb[53].mxu0  ;;  %v3174_v62 = vadd.f32 %v3142_v61, %v3006_v37  ;;  %v3144_v21 = vmul.f32 %v3112_v10, %v2937_v11  ;;  %v6410_v1 = vadd.f32 %v2942_v24, %v6374_v14 }
0x10eb   : > { %v6413_v22 = vadd.f32 %v3015_v8, %v6378_v41  ;;  %v2946_v56 = vpop.f32.mrb[54].mxu1  ;;  %v3019_v48 = vpop.f32.mrb[54].mxu0  ;;  %v3146_v55 = vmul.f32 %v3114_v12, %v3010_v26  ;;  %v6422_v19 = vmul.f32 0.5, %v3010_v26  ;;  %v6427_v52 = vadd.f32 %v2944_v3, %v6382_v18 }
0x10ec   : > { %v2948_v63 = vpop.f32.mrb[55].mxu1  ;;  %v3021_v36 = vpop.f32.mrb[55].mxu0  ;;  %v3204_v47 = vmul.f32 0.7978846, %v3172_v9  ;;  %v3176_v16 = vadd.f32 %v3144_v21, %v2937_v11  ;;  %v3084_v38 = vmul.f32 0.044715, %v6410_v1  ;;  %v6433_v42 = vmul.f32 %v3111_v2, %v6394_v49 }
0x10ed   : > { %6885 = vst [vmem:[#allocation23_spill] sm:$0xff] %v6413_v22  ;;  %v3178_v23 = vadd.f32 %v3146_v55, %v3010_v26  ;;  %v3086_v43 = vmul.f32 0.044715, %v6413_v22  ;;  %v3206_v37 = vmul.f32 0.7978846, %v3174_v62  ;;  %v3113_v60 = vmul.f32 %v3081_v31, %v6401_v57 }
0x10ee   : > { %v3115_v25 = vmul.f32 %v3083_v20, %v6404_v39  ;;  %v3085_v28 = vmul.f32 0.044715, %v6427_v52  ;;  %v6439_v11 = vadd.f32 %v3017_v6, %v6386_v46  ;;  %v6442_v26 = vadd.f32 %v2946_v56, %v6374_v14 }
0x10ef   : > { %5101 = vtanh.f32 %v3204_v47  ;;  %v3208_v29 = vmul.f32 0.7978846, %v3176_v16  ;;  %v3210_v53 = vmul.f32 0.7978846, %v3178_v23  ;;  %v6445_v59 = vadd.f32 %v3019_v48, %v6378_v41 }
0x10f0   : > { %6886 = vst [vmem:[#allocation24_spill] sm:$0xff] %v6442_v26  ;;  %v3116_v44 = vmul.f32 %v3084_v38, %v6410_v1  ;;  %v3118_v32 = vmul.f32 %v3086_v43, %v6413_v22  ;;  %v3087_v61 = vmul.f32 0.044715, %v6439_v11  ;;  %v3088_v58 = vmul.f32 0.044715, %v6442_v26 }
0x10f1   : > { %6887 = vst [vmem:[#allocation25_spill] sm:$0xff] %v6445_v59  ;;  %v2952_v5 = vpop.f32.mrb[56].mxu1  ;;  %v3025_v35 = vpop.f32.mrb[56].mxu0  ;;  %v3117_v24 = vmul.f32 %v3085_v28, %v6427_v52  ;;  %v3090_v8 = vmul.f32 0.044715, %v6445_v59  ;;  %v6454_v9 = vadd.f32 %v2948_v63, %v6382_v18  ;;  %v6457_v2 = vadd.f32 %v3021_v36, %v6386_v46 }
0x10f2   : > { %v2954_v40 = vpop.f32.mrb[57].mxu1  ;;  %v3027_v10 = vpop.f32.mrb[57].mxu0  ;;  %5103 = vtanh.f32 %v3206_v37  ;;  %v6460_v3 = vmul.f32 %v3113_v60, %v6401_v57  ;;  %v6463_v6 = vadd.f32 %v2952_v5, %v6374_v14  ;;  %v6466_v62 = vadd.f32 %v3025_v35, %v6378_v41 }
0x10f3   : > { %v2956_v12 = vpop.f32.mrb[58].mxu1  ;;  %v3029_v31 = vpop.f32.mrb[58].mxu0  ;;  %5105 = vtanh.f32 %v3208_v29  ;;  %v6469_v48 = vmul.f32 %v3115_v25, %v6404_v39  ;;  %v3119_v55 = vmul.f32 %v3087_v61, %v6439_v11  ;;  %v3089_v20 = vmul.f32 0.044715, %v6454_v9 }
0x10f4   : > { %v2958_v21 = vpop.f32.mrb[59].mxu1  ;;  %v3031_v56 = vpop.f32.mrb[59].mxu0  ;;  %v6474_v63 = vmul.f32 %v3116_v44, %v6410_v1  ;;  %v3120_v36 = vmul.f32 %v3088_v58, %v6442_v26  ;;  %v3091_v47 = vmul.f32 0.044715, %v6457_v2  ;;  %v6479_v16 = vadd.f32 %v2954_v40, %v6382_v18 }
0x10f5   : > { %5107 = vtanh.f32 %v3210_v53  ;;  %v6482_v23 = vmul.f32 %v3118_v32, %v6413_v22  ;;  %v6485_v38 = vmul.f32 %v3117_v24, %v6427_v52  ;;  %v3122_v43 = vmul.f32 %v3090_v8, %v6445_v59 }
0x10f6   : > { %6888 = vst [vmem:[#allocation26_spill] sm:$0xff] %v6474_v63  ;;  %v3092_v37 = vmul.f32 0.044715, %v6463_v6  ;;  %v3094_v60 = vmul.f32 0.044715, %v6466_v62  ;;  %v6491_v25 = vadd.f32 %v3027_v10, %v6386_v46  ;;  %v6494_v28 = vadd.f32 %v2956_v12, %v6374_v14 }
0x10f7   : > { %6889 = vst [vmem:[#allocation27_spill] sm:$0xff] %v6482_v23  ;;  %v6497_v29 = vmul.f32 %v3119_v55, %v6439_v11  ;;  %v3121_v53 = vmul.f32 %v3089_v20, %v6454_v9  ;;  %v3093_v5 = vmul.f32 0.044715, %v6479_v16  ;;  %v6502_v35 = vadd.f32 %v3029_v31, %v6378_v41 }
0x10f8   : > { %v6505_v61 = vmul.f32 %v3120_v36, %v6442_v26  ;;  %v3123_v58 = vmul.f32 %v3091_v47, %v6457_v2  ;;  %v3095_v40 = vmul.f32 0.044715, %v6491_v25  ;;  %v3096_v10 = vmul.f32 0.044715, %v6494_v28 }
0x10f9   : > { %v2962_v44 = vpop.f32.mrb[60].mxu1  ;;  %v3035_v32 = vpop.f32.mrb[60].mxu0  ;;  %v3098_v55 = vmul.f32 0.044715, %v6502_v35  ;;  %v6514_v31 = vadd.f32 %v2958_v21, %v6382_v18  ;;  %v6517_v20 = vadd.f32 %v3031_v56, %v6386_v46  ;;  %v6523_v17 = vmul.f32 %v3122_v43, %v6445_v59 }
0x10fa   : > { %6890 = vst [vmem:[#allocation28_spill] sm:$0xff] %v6505_v61  ;;  %v2964_v24 = vpop.f32.mrb[61].mxu1  ;;  %v3037_v8 = vpop.f32.mrb[61].mxu0  ;;  %v6520_v36 = vadd.f32 %v2962_v44, %v6374_v14  ;;  %v3124_v4 = vmul.f32 %v3092_v37, %v6463_v6  ;;  %v3126_v51 = vmul.f32 %v3094_v60, %v6466_v62  ;;  %v6528_v15 = vadd.f32 %v3035_v32, %v6378_v41 }
0x10fb   : > { %v6510_v12 = vpop.eup %5101  ;;  %v2966_v47 = vpop.f32.mrb[62].mxu1  ;;  %6891 = vst [vmem:[#allocation29_spill] sm:$0xff] %v6523_v17  ;;  %v6531_v56 = vmul.f32 %v3121_v53, %v6454_v9  ;;  %v3097_v44 = vmul.f32 0.044715, %v6514_v31  ;;  %v3099_v50 = vmul.f32 0.044715, %v6517_v20  ;;  %v6537_v7 = vmul.f32 %v3123_v58, %v6457_v2 }
0x10fc   : > { %v3039_v33 = vpop.f32.mrb[62].mxu0  ;;  %6892 = vst [vmem:[#allocation30_spill] sm:$0xff] %v6528_v15  ;;  %v2968_v21 = vpop.f32.mrb[63].mxu1  ;;  %v3100_v45 = vmul.f32 0.044715, %v6520_v36  ;;  %v3125_v37 = vmul.f32 %v3093_v5, %v6479_v16  ;;  %v6542_v32 = vadd.f32 %v2964_v24, %v6382_v18  ;;  %v3127_v53 = vmul.f32 %v3095_v40, %v6491_v25 }
0x10fd   : > { %v3041_v0 = vpop.f32.mrb[63].mxu0  ;;  %v5104_v43 = vpop.eup %5103  ;;  %v3102_v60 = vmul.f32 0.044715, %v6528_v15  ;;  %v3128_v59 = vmul.f32 %v3096_v10, %v6494_v28  ;;  %v3130_v23 = vmul.f32 %v3098_v55, %v6502_v35  ;;  %v3129_v22 = vmul.f32 %v3097_v44, %v6514_v31 }
0x10fe   : > { %v5106_v17 = vpop.eup %5105  ;;  %v3131_v61 = vmul.f32 %v3099_v50, %v6517_v20  ;;  %v3101_v58 = vmul.f32 0.044715, %v6542_v32  ;;  %v6551_v5 = vadd.f32 %v3037_v8, %v6386_v46  ;;  %v6554_v26 = vadd.f32 %v2966_v47, %v6374_v14 }
0x10ff   : > { %v5108_v24 = vpop.eup %5107  ;;  %v6557_v63 = vmul.f32 %v3124_v4, %v6463_v6  ;;  %v6560_v40 = vmul.f32 %v3126_v51, %v6466_v62  ;;  %v3132_v10 = vmul.f32 %v3100_v45, %v6520_v36  ;;  %v6564_v55 = vadd.f32 %v3039_v33, %v6378_v41 }
0x1100   : > { %v6567_v50 = vmul.f32 %v3125_v37, %v6479_v16  ;;  %v3134_v8 = vmul.f32 %v3102_v60, %v6528_v15  ;;  %v3133_v14 = vmul.f32 %v3101_v58, %v6542_v32  ;;  %v3103_v47 = vmul.f32 0.044715, %v6551_v5 }
0x1101   : > { %v6573_v4 = vmul.f32 %v3127_v53, %v6491_v25  ;;  %v6576_v51 = vmul.f32 %v3128_v59, %v6494_v28  ;;  %v3104_v45 = vmul.f32 0.044715, %v6554_v26  ;;  %v3106_v33 = vmul.f32 0.044715, %v6564_v55 }
0x1102   : > { %v6581_v41 = vmul.f32 %v3130_v23, %v6502_v35  ;;  %v6584_v44 = vmul.f32 %v3129_v22, %v6514_v31  ;;  %v6587_v37 = vmul.f32 %v3131_v61, %v6517_v20  ;;  %v6590_v60 = vadd.f32 %v2968_v21, %v6382_v18 }
0x1103   : > { %v6593_v53 = vmul.f32 %v3132_v10, %v6520_v36  ;;  %v3135_v59 = vmul.f32 %v3103_v47, %v6551_v5  ;;  %v6597_v58 = vadd.f32 %v3041_v0, %v6386_v46  ;;  %v3173_v23 = vadd.f32 %v6430_v34, %v6391_v54 }
0x1104   : > { %v6602_v22 = vmul.f32 %v3134_v8, %v6528_v15  ;;  %v6605_v61 = vmul.f32 %v3133_v14, %v6542_v32  ;;  %v6608_v18 = vmul.f32 0.5, %v6391_v54  ;;  %v3177_v21 = vadd.f32 %v6460_v3, %v6401_v57 }
0x1105   : > { %v3136_v10 = vmul.f32 %v3104_v45, %v6554_v26  ;;  %v3138_v0 = vmul.f32 %v3106_v33, %v6564_v55  ;;  %v6615_v46 = vmul.f32 0.5, %v6401_v57  ;;  %v3205_v34 = vmul.f32 0.7978846, %v3173_v23 }
0x1106   : > { %6893 = vst [vmem:[#allocation31_spill] sm:$0xff] %v6602_v22  ;;  %v3105_v8 = vmul.f32 0.044715, %v6590_v60  ;;  %v3209_v47 = vmul.f32 0.7978846, %v3177_v21  ;;  %v3175_v14 = vadd.f32 %v6433_v42, %v6394_v49  ;;  %v3179_v54 = vadd.f32 %v6469_v48, %v6404_v39 }
0x1107   : > { %v6623_v22 = vmul.f32 %v3135_v59, %v6551_v5  ;;  %v3107_v3 = vmul.f32 0.044715, %v6597_v58  ;;  %5109 = vtanh.f32 %v3205_v34  ;;  %v3268_v45 = vadd.f32 1.0, %v6510_v12 }
0x1108   : > { %5111 = vtanh.f32 %v3209_v47  ;;  %v3207_v57 = vmul.f32 0.7978846, %v3175_v14  ;;  %v3211_v33 = vmul.f32 0.7978846, %v3179_v54  ;;  %v3272_v23 = vadd.f32 1.0, %v5106_v17 }
0x1109   : > { %v6628_v21 = vmul.f32 %v3136_v10, %v6554_v26  ;;  %v6631_v42 = vmul.f32 0.5, %v6394_v49  ;;  %v3270_v15 = vadd.f32 1.0, %v5104_v43  ;;  %v3274_v48 = vadd.f32 1.0, %v5108_v24 }
0x110a   : > { %5113 = vtanh.f32 %v3207_v57  ;;  %v6634_v59 = vmul.f32 %v3268_v45, %v6415_v30  ;;  %v6637_v34 = vmul.f32 %v3272_v23, %v6420_v27  ;;  %v3181_v12 = vadd.f32 %v6485_v38, %v6427_v52  ;;  %v6895_v45 = vld [vmem:[#allocation24_spill] sm:$0xff]  ;;  %v6897_v23 = vld [vmem:[#allocation23_spill] sm:$0xff] }
0x110b   : > { %5115 = vtanh.f32 %v3211_v33  ;;  %v6642_v17 = vmul.f32 %v3270_v15, %v6417_v13  ;;  %v6645_v10 = vmul.f32 %v3274_v48, %v6422_v19  ;;  %v3185_v49 = vadd.f32 %v6531_v56, %v6454_v9  ;;  %v6896_v57 = vld [vmem:[#allocation28_spill] sm:$0xff]  ;;  %v6898_v48 = vld [vmem:[#allocation27_spill] sm:$0xff] }
0x110c   : > { %v3137_v43 = vmul.f32 %v3105_v8, %v6590_v60  ;;  %v3139_v30 = vmul.f32 %v3107_v3, %v6597_v58  ;;  %v3332_v27 = vpack.c.bf16 %v6637_v34, %v6634_v59  ;;  %v3213_v24 = vmul.f32 0.7978846, %v3181_v12  ;;  %v6894_v8 = vld [vmem:[#allocation26_spill] sm:$0xff] }
0x110d   : > { %v3334_v38 = vpack.c.bf16 %v6645_v10, %v6642_v17  ;;  %v3217_v47 = vmul.f32 0.7978846, %v3185_v49  ;;  %v3183_v15 = vadd.f32 %v6497_v29, %v6439_v11  ;;  %v3187_v13 = vadd.f32 %v6537_v7, %v6457_v2  ;;  %v6899_v49 = vld [vmem:[#allocation25_spill] sm:$0xff] }
0x110e   : > { %v6660_v19 = vmul.f32 %v3138_v0, %v6564_v55  ;;  %v3051_v56 = vmul.f32 0.5, %v6404_v39  ;;  %5117 = vtanh.f32 %v3213_v24  ;;  %v3180_v14 = vadd.f32 %v6894_v8, %v6410_v1  ;;  %v6900_v24 = vld [vmem:[#allocation29_spill] sm:$0xff] }
0x110f   : > { %5119 = vtanh.f32 %v3217_v47  ;;  %v3215_v54 = vmul.f32 0.7978846, %v3183_v15  ;;  %v3219_v3 = vmul.f32 0.7978846, %v3187_v13  ;;  %v3184_v33 = vadd.f32 %v6896_v57, %v6895_v45 }
0x1110   : > { %v6668_v29 = vmul.f32 %v3137_v43, %v6590_v60  ;;  %v6671_v7 = vmul.f32 %v3139_v30, %v6597_v58  ;;  %v3212_v0 = vmul.f32 0.7978846, %v3180_v14  ;;  %v3182_v39 = vadd.f32 %v6898_v48, %v6897_v23 }
0x1111   : > { %v5110_v59 = vpop.eup %5109  ;;  %v3053_v34 = vmul.f32 0.5, %v6427_v52  ;;  %5121 = vtanh.f32 %v3215_v54  ;;  %v3216_v12 = vmul.f32 0.7978846, %v3184_v33  ;;  %v3186_v47 = vadd.f32 %v6900_v24, %v6899_v49 }
0x1112   : > { %v5112_v15 = vpop.eup %5111  ;;  %v3269_v13 = vadd.f32 1.0, %v5110_v59  ;;  %v3057_v43 = vmul.f32 0.5, %v6454_v9  ;;  %5123 = vtanh.f32 %v3219_v3  ;;  %v3214_v8 = vmul.f32 0.7978846, %v3182_v39 }
0x1113   : > { %v3273_v30 = vadd.f32 1.0, %v5112_v15  ;;  %5125 = vtanh.f32 %v3212_v0  ;;  %v3218_v14 = vmul.f32 0.7978846, %v3186_v47  ;;  %v3189_v57 = vadd.f32 %v6567_v50, %v6479_v16 }
0x1114   : > { %v5114_v48 = vpop.eup %5113  ;;  %v3301_v52 = vmul.f32 %v3269_v13, %v6608_v18  ;;  %v3055_v54 = vmul.f32 0.5, %v6439_v11  ;;  %5127 = vtanh.f32 %v3216_v12  ;;  %v3193_v33 = vadd.f32 %v6584_v44, %v6514_v31 }
0x1115   : > { %v5116_v59 = vpop.eup %5115  ;;  %v3305_v9 = vmul.f32 %v3273_v30, %v6615_v46  ;;  %v3271_v3 = vadd.f32 1.0, %v5114_v48  ;;  %5129 = vtanh.f32 %v3214_v8  ;;  %v3221_v39 = vmul.f32 0.7978846, %v3189_v57 }
0x1116   : > { %v3275_v0 = vadd.f32 1.0, %v5116_v59  ;;  %v3059_v24 = vmul.f32 0.5, %v6457_v2  ;;  %5131 = vtanh.f32 %v3218_v14  ;;  %v3225_v50 = vmul.f32 0.7978846, %v3193_v33 }
0x1117   : > { %v3333_v47 = vpack.c.bf16 %v3305_v9, %v3301_v52  ;;  %v3052_v18 = vmul.f32 0.5, %v6410_v1  ;;  %5133 = vtanh.f32 %v3221_v39  ;;  %v3191_v11 = vadd.f32 %v6573_v4, %v6491_v25 }
0x1118   : > { %v5118_v12 = vpop.eup %5117  ;;  %v3303_v44 = vmul.f32 %v3271_v3, %v6631_v42  ;;  %v3307_v15 = vmul.f32 %v3275_v0, %v3051_v56  ;;  %5135 = vtanh.f32 %v3225_v50  ;;  %v3195_v46 = vadd.f32 %v6587_v37, %v6517_v20 }
0x1119   : > { %v5120_v13 = vpop.eup %5119  ;;  %3640 = vmatprep.mubr.bf16.mxu1 %v3333_v47  ;;  %v3277_v2 = vadd.f32 1.0, %v5118_v12  ;;  %v3056_v8 = vmul.f32 0.5, %v6895_v45  ;;  %v3223_v30 = vmul.f32 0.7978846, %v3191_v11  ;;  %v3188_v1 = vadd.f32 %v6557_v63, %v6463_v6 }
0x111a   : > { %v3335_v14 = vpack.c.bf16 %v3307_v15, %v3303_v44  ;;  %3641 = vmatmul.mubr.bf16.vlgmr.msra.gmra.mrb[64].mxu1 %v3332_v27  ;;  %v3281_v4 = vadd.f32 1.0, %v5120_v13  ;;  %v3227_v57 = vmul.f32 0.7978846, %v3195_v46  ;;  %v3192_v42 = vadd.f32 %v6576_v51, %v6494_v28 }
0x111b   : > { %v5122_v56 = vpop.eup %5121  ;;  %v3309_v48 = vmul.f32 %v3277_v2, %v3053_v34  ;;  %v3054_v37 = vmul.f32 0.5, %v6897_v23  ;;  %5137 = vtanh.f32 %v3223_v30  ;;  %v3220_v52 = vmul.f32 0.7978846, %v3188_v1 }
0x111c   : > { %v5124_v33 = vpop.eup %5123  ;;  %3705 = vmatprep.mubr.bf16.mxu0 %v3335_v14  ;;  %v3313_v45 = vmul.f32 %v3281_v4, %v3057_v43  ;;  %v3279_v59 = vadd.f32 1.0, %v5122_v56  ;;  %5139 = vtanh.f32 %v3227_v57  ;;  %v3224_v9 = vmul.f32 0.7978846, %v3192_v42 }
0x111d   : > { %v5126_v63 = vpop.eup %5125  ;;  %3706 = vmatmul.mubr.bf16.vlgmr.msra.gmra.mrb[64].mxu0 %v3334_v38  ;;  %v3283_v27 = vadd.f32 1.0, %v5124_v33  ;;  %v3058_v51 = vmul.f32 0.5, %v6899_v49  ;;  %5141 = vtanh.f32 %v3220_v52  ;;  %v3190_v23 = vadd.f32 %v6560_v40, %v6466_v62 }
0x111e   : > { %v5128_v34 = vpop.eup %5127  ;;  %v3337_v3 = vpack.c.bf16 %v3313_v45, %v3309_v48  ;;  %v3311_v39 = vmul.f32 %v3279_v59, %v3055_v54  ;;  %v3276_v0 = vadd.f32 1.0, %v5126_v63  ;;  %5143 = vtanh.f32 %v3224_v9 }
0x111f   : > { %v5130_v43 = vpop.eup %5129  ;;  %v3315_v50 = vmul.f32 %v3283_v27, %v3059_v24  ;;  %v3280_v47 = vadd.f32 1.0, %v5128_v34  ;;  %v3194_v11 = vadd.f32 %v6581_v41, %v6502_v35  ;;  %v3222_v17 = vmul.f32 0.7978846, %v3190_v23 }
0x1120   : > { %v5132_v10 = vpop.eup %5131  ;;  %3648 = vmatprep.mubr.bf16.mxu1 %v3337_v3  ;;  %v3308_v38 = vmul.f32 %v3276_v0, %v3052_v18  ;;  %v3278_v49 = vadd.f32 1.0, %v5130_v43  ;;  %v3061_v12 = vmul.f32 0.5, %v6479_v16  ;;  %v3065_v40 = vmul.f32 0.5, %v6514_v31 }
0x1121   : > { %v5134_v44 = vpop.eup %5133  ;;  %v3339_v15 = vpack.c.bf16 %v3315_v50, %v3311_v39  ;;  %v3312_v54 = vmul.f32 %v3280_v47, %v3056_v8  ;;  %v3282_v46 = vadd.f32 1.0, %v5132_v10  ;;  %v3226_v13 = vmul.f32 0.7978846, %v3194_v11  ;;  %v6901_v11 = vld [vmem:[#allocation30_spill] sm:$0xff] }
0x1122   : > { %v5136_v2 = vpop.eup %5135  ;;  %v3310_v24 = vmul.f32 %v3278_v49, %v3054_v37  ;;  %v3285_v30 = vadd.f32 1.0, %v5134_v44  ;;  %5145 = vtanh.f32 %v3222_v17  ;;  %v3197_v41 = vadd.f32 %v6605_v61, %v6542_v32  ;;  %v6902_v17 = vld [vmem:[#allocation31_spill] sm:$0xff] }
0x1123   : > { %3713 = vmatprep.mubr.bf16.mxu0 %v3339_v15  ;;  %v3336_v1 = vpack.c.bf16 %v3312_v54, %v3308_v38  ;;  %v3314_v18 = vmul.f32 %v3282_v46, %v3058_v51  ;;  %v3289_v14 = vadd.f32 1.0, %v5136_v2  ;;  %5147 = vtanh.f32 %v3226_v13 }
0x1124   : > { %v3063_v16 = vmul.f32 0.5, %v6491_v25  ;;  %v3067_v31 = vmul.f32 0.5, %v6517_v20  ;;  %v3201_v8 = vadd.f32 %v6668_v29, %v6590_v60  ;;  %v3229_v4 = vmul.f32 0.7978846, %v3197_v41 }
0x1125   : > { %v5138_v57 = vpop.eup %5137  ;;  %3649 = vmatmul.mubr.bf16.gmra.mrb[68].mxu1 %v3336_v1  ;;  %v3338_v42 = vpack.c.bf16 %v3314_v18, %v3310_v24  ;;  %v3317_v56 = vmul.f32 %v3285_v30, %v3061_v12  ;;  %v3321_v48 = vmul.f32 %v3289_v14, %v3065_v40  ;;  %v3199_v61 = vadd.f32 %v6623_v22, %v6551_v5 }
0x1126   : > { %v5140_v37 = vpop.eup %5139  ;;  %v3287_v52 = vadd.f32 1.0, %v5138_v57  ;;  %v3233_v33 = vmul.f32 0.7978846, %v3201_v8  ;;  %5149 = vtanh.f32 %v3229_v4  ;;  %v3203_v25 = vadd.f32 %v6671_v7, %v6597_v58 }
0x1127   : > { %v5142_v20 = vpop.eup %5141  ;;  %3714 = vmatmul.mubr.bf16.gmra.mrb[68].mxu0 %v3338_v42  ;;  %v3341_v45 = vpack.c.bf16 %v3321_v48, %v3317_v56  ;;  %v3291_v29 = vadd.f32 1.0, %v5140_v37  ;;  %v3060_v59 = vmul.f32 0.5, %v6463_v6  ;;  %v3231_v9 = vmul.f32 0.7978846, %v3199_v61 }
0x1128   : > { %v5144_v63 = vpop.eup %5143  ;;  %v3064_v27 = vmul.f32 0.5, %v6494_v28  ;;  %v3284_v51 = vadd.f32 1.0, %v5142_v20  ;;  %5151 = vtanh.f32 %v3233_v33  ;;  %v3235_v22 = vmul.f32 0.7978846, %v3203_v25 }
0x1129   : > { %3656 = vmatprep.mubr.bf16.mxu1 %v3341_v45  ;;  %v3319_v23 = vmul.f32 %v3287_v52, %v3063_v16  ;;  %v3323_v34 = vmul.f32 %v3291_v29, %v3067_v31  ;;  %v3288_v3 = vadd.f32 1.0, %v5144_v63  ;;  %5153 = vtanh.f32 %v3231_v9 }
0x112a   : > { %5155 = vtanh.f32 %v3235_v22  ;;  %v3196_v7 = vadd.f32 %v6593_v53, %v6520_v36  ;;  %v3200_v39 = vadd.f32 %v6628_v21, %v6554_v26  ;;  %v3316_v0 = vmul.f32 %v3284_v51, %v3060_v59 }
0x112b   : > { %v3343_v6 = vpack.c.bf16 %v3323_v34, %v3319_v23  ;;  %v3320_v43 = vmul.f32 %v3288_v3, %v3064_v27  ;;  %v3198_v10 = vadd.f32 %v6902_v17, %v6901_v11  ;;  %v3202_v38 = vadd.f32 %v6660_v19, %v6564_v55 }
0x112c   : > { %v5146_v50 = vpop.eup %5145  ;;  %v3228_v28 = vmul.f32 0.7978846, %v3196_v7  ;;  %v3232_v47 = vmul.f32 0.7978846, %v3200_v39  ;;  %v3062_v53 = vmul.f32 0.5, %v6466_v62  ;;  %v3066_v40 = vmul.f32 0.5, %v6502_v35 }
0x112d   : > { %v5148_v49 = vpop.eup %5147  ;;  %3721 = vmatprep.mubr.bf16.mxu0 %v3343_v6  ;;  %v3340_v12 = vpack.c.bf16 %v3320_v43, %v3316_v0  ;;  %v3286_v21 = vadd.f32 1.0, %v5146_v50  ;;  %v3230_v15 = vmul.f32 0.7978846, %v3198_v10  ;;  %v3234_v54 = vmul.f32 0.7978846, %v3202_v38 }
0x112e   : > { %v3290_v44 = vadd.f32 1.0, %v5148_v49  ;;  %5157 = vtanh.f32 %v3228_v28  ;;  %v3069_v62 = vmul.f32 0.5, %v6542_v32  ;;  %v3073_v35 = vmul.f32 0.5, %v6590_v60  ;;  %v6903_v49 = vld [vmem:[#allocation15_spill] sm:$0xff] }
0x112f   : > { %3657 = vmatmul.mubr.bf16.gmra.mrb[72].mxu1 %v3340_v12  ;;  %5159 = vtanh.f32 %v3232_v47  ;;  %v3318_v13 = vmul.f32 %v3286_v21, %v3062_v53  ;;  %v3071_v14 = vmul.f32 0.5, %v6551_v5  ;;  %v3075_v4 = vmul.f32 0.5, %v6597_v58 }
0x1130   : > { %v5150_v46 = vpop.eup %5149  ;;  %v3322_v2 = vmul.f32 %v3290_v44, %v3066_v40  ;;  %5161 = vtanh.f32 %v3230_v15  ;;  %v3068_v33 = vmul.f32 0.5, %v6520_v36  ;;  %v3072_v25 = vmul.f32 0.5, %v6554_v26  ;;  %v6740_v26 = vld [vmem:[%s5611_s12 + $0x8] ss:$0 sm:$0xff]  ;;  %v6904_v40 = vld [vmem:[#allocation16_spill] sm:$0xff] }
0x1131   : > { %v3293_v24 = vadd.f32 1.0, %v5150_v46  ;;  %5163 = vtanh.f32 %v3234_v54  ;;  %v3070_v58 = vmul.f32 0.5, %v6901_v11  ;;  %v3074_v9 = vmul.f32 0.5, %v6564_v55 }
0x1132   : > { %v5152_v19 = vpop.eup %5151  ;;  %v3342_v30 = vpack.c.bf16 %v3322_v2, %v3318_v13 }
0x1133   : > { %v5154_v41 = vpop.eup %5153  ;;  %v3297_v1 = vadd.f32 1.0, %v5152_v19  ;;  %v3325_v31 = vmul.f32 %v3293_v24, %v3069_v62 }
0x1134   : > { %v5156_v18 = vpop.eup %5155  ;;  %3722 = vmatmul.mubr.bf16.gmra.mrb[72].mxu0 %v3342_v30  ;;  %v3295_v16 = vadd.f32 1.0, %v5154_v41 }
0x1135   : > { %v3329_v8 = vmul.f32 %v3297_v1, %v3073_v35  ;;  %v3299_v57 = vadd.f32 1.0, %v5156_v18 }
0x1136   : > { %v3327_v56 = vmul.f32 %v3295_v16, %v3071_v14  ;;  %v6905_v16 = vld [vmem:[#allocation18_spill] sm:$0xff] }
0x1137   : > { %v3345_v42 = vpack.c.bf16 %v3329_v8, %v3325_v31  ;;  %v3331_v48 = vmul.f32 %v3299_v57, %v3075_v4  ;;  %v6906_v4 = vld [vmem:[#allocation17_spill] sm:$0xff] }
0x1138   : > { %v5158_v61 = vpop.eup %5157 }
0x1139   : > { %v5160_v37 = vpop.eup %5159  ;;  %3664 = vmatprep.mubr.bf16.mxu1 %v3345_v42  ;;  %v3347_v32 = vpack.c.bf16 %v3331_v48, %v3327_v56  ;;  %v3292_v52 = vadd.f32 1.0, %v5158_v61 }
0x113a   : > { %v5162_v60 = vpop.eup %5161  ;;  %v3296_v5 = vadd.f32 1.0, %v5160_v37 }
0x113b   : > { %v5164_v20 = vpop.eup %5163  ;;  %3729 = vmatprep.mubr.bf16.mxu0 %v3347_v32  ;;  %v3294_v45 = vadd.f32 1.0, %v5162_v60  ;;  %v3324_v29 = vmul.f32 %v3292_v52, %v3068_v33 }
0x113c   : > { %v3328_v59 = vmul.f32 %v3296_v5, %v3072_v25  ;;  %v3298_v63 = vadd.f32 1.0, %v5164_v20 }
0x113d   : > { %v3326_v51 = vmul.f32 %v3294_v45, %v3070_v58 }
0x113e   : > { %v3344_v27 = vpack.c.bf16 %v3328_v59, %v3324_v29  ;;  %v3330_v22 = vmul.f32 %v3298_v63, %v3074_v9  ;;  %v6907_v59 = vld [vmem:[#allocation20_spill] sm:$0xff]  ;;  %v6908_v63 = vld [vmem:[#allocation19_spill] sm:$0xff] }
0x1140   : > { %3665 = vmatmul.mubr.bf16.gmra.mrb[76].mxu1 %v3344_v27  ;;  %v3346_v23 = vpack.c.bf16 %v3330_v22, %v3326_v51 }
0x1142   : > { %3730 = vmatmul.mubr.bf16.gmra.mrb[76].mxu0 %v3346_v23 }
0x11ed   : > { %v4356_v36 = vpop.f32.mrb[64].mxu1 }
0x11ee   : > { %v4357_v34 = vpop.f32.mrb[65].mxu1 }
0x11ef   : > { %v4358_v3 = vadd.f32 %v4357_v34, %v4356_v36  ;;  %v4359_v7 = vpop.f32.mrb[66].mxu1 }
0x11f0   : > { %v4396_v39 = vpop.f32.mrb[64].mxu0  ;;  %v4360_v6 = vpop.f32.mrb[67].mxu1 }
0x11f1   : > { %v3643_v0 = vadd.f32 %v4358_v3, %v6740_v26  ;;  %v4397_v43 = vpop.f32.mrb[65].mxu0  ;;  %v4361_v50 = vadd.f32 %v4360_v6, %v4359_v7 }
0x11f2   : > { %v4398_v55 = vadd.f32 %v4397_v43, %v4396_v39  ;;  %v4399_v28 = vpop.f32.mrb[66].mxu0 }
0x11f3   : > { %v3646_v47 = vadd.f32 %v4361_v50, %v6740_v26  ;;  %v4400_v11 = vpop.f32.mrb[67].mxu0 }
0x11f4   : > { %v3708_v17 = vadd.f32 %v4398_v55, %v3643_v0  ;;  %v4401_v10 = vadd.f32 %v4400_v11, %v4399_v28 }
0x11f6   : > { %v3711_v38 = vadd.f32 %v4401_v10, %v3646_v47  ;;  %v6745_v12 = vadd.f32 %v3708_v17, %v6903_v49  ;;  %v6909_v17 = vld [vmem:[#allocation22_spill] sm:$0xff] }
0x11f8   : > { %v4362_v53 = vpop.f32.mrb[68].mxu1  ;;  %3746 = vadd.xlane.f32.xlu0 %v6745_v12  ;;  %v6749_v21 = vadd.f32 %v3711_v38, %v6904_v40  ;;  %v6910_v38 = vld [vmem:[#allocation21_spill] sm:$0xff] }
0x11f9   : > { %v4363_v44 = vpop.f32.mrb[69].mxu1 }
0x11fa   : > { %v4402_v15 = vpop.f32.mrb[68].mxu0  ;;  %v4364_v54 = vadd.f32 %v4363_v44, %v4362_v53  ;;  %v4365_v46 = vpop.f32.mrb[70].mxu1  ;;  %3748 = vadd.xlane.f32.xlu1 %v6749_v21 }
0x11fb   : > { %v4403_v13 = vpop.f32.mrb[69].mxu0  ;;  %v4366_v2 = vpop.f32.mrb[71].mxu1 }
0x11fc   : > { %v3651_v24 = vadd.f32 %v4364_v54, %v6740_v26  ;;  %v4404_v19 = vadd.f32 %v4403_v13, %v4402_v15  ;;  %v4405_v30 = vpop.f32.mrb[70].mxu0  ;;  %v4367_v41 = vadd.f32 %v4366_v2, %v4365_v46 }
0x11fd   : > { %v4406_v62 = vpop.f32.mrb[71].mxu0 }
0x11fe   : > { %v3716_v35 = vadd.f32 %v4404_v19, %v3651_v24  ;;  %v3654_v1 = vadd.f32 %v4367_v41, %v6740_v26  ;;  %v4407_v18 = vadd.f32 %v4406_v62, %v4405_v30 }
0x1200   : > { %v3719_v14 = vadd.f32 %v4407_v18, %v3654_v1  ;;  %v3740_v31 = vadd.f32 %v3716_v35, %v6905_v16 }
0x1202   : > { %v4368_v8 = vpop.f32.mrb[72].mxu1  ;;  %3750 = vadd.xlane.f32.xlu0 %v3740_v31  ;;  %v3741_v57 = vadd.f32 %v3719_v14, %v6906_v4 }
0x1203   : > { %v4369_v42 = vpop.f32.mrb[73].mxu1 }
0x1204   : > { %v4370_v56 = vadd.f32 %v4369_v42, %v4368_v8  ;;  %v4371_v48 = vpop.f32.mrb[74].mxu1  ;;  %3752 = vadd.xlane.f32.xlu1 %v3741_v57 }
0x1205   : > { %v4372_v61 = vpop.f32.mrb[75].mxu1 }
0x1206   : > { %v4373_v37 = vadd.f32 %v4372_v61, %v4371_v48  ;;  %v3659_v52 = vadd.f32 %v4370_v56, %v6740_v26 }
0x1207   : > { %v4408_v32 = vpop.f32.mrb[72].mxu0 }
0x1208   : > { %v4409_v60 = vpop.f32.mrb[73].mxu0  ;;  %v3662_v5 = vadd.f32 %v4373_v37, %v6740_v26 }
0x1209   : > { %v4410_v33 = vadd.f32 %v4409_v60, %v4408_v32  ;;  %v4411_v25 = vpop.f32.mrb[74].mxu0 }
0x120a   : > { %v4412_v20 = vpop.f32.mrb[75].mxu0 }
0x120b   : > { %v3724_v58 = vadd.f32 %v4410_v33, %v3659_v52  ;;  %v4413_v45 = vadd.f32 %v4412_v20, %v4411_v25 }
0x120d   : > { %v3727_v29 = vadd.f32 %v4413_v45, %v3662_v5  ;;  %v3742_v9 = vadd.f32 %v3724_v58, %v6907_v59  ;;  %v6911_v45 = vld [vmem:[#allocation14_spill] sm:$0xff] }
0x120f   : > { %3754 = vadd.xlane.f32.xlu0 %v3742_v9  ;;  %v3743_v27 = vadd.f32 %v3727_v29, %v6908_v63  ;;  %v3836_v29 = vsub.s32 6, %v6911_v45  ;;  %v3848_v63 = vsub.s32 7, %v6911_v45 }
0x1211   : > { %3756 = vadd.xlane.f32.xlu1 %v3743_v27 }
0x1213   : > { %v4374_v51 = vpop.f32.mrb[76].mxu1 }
0x1214   : > { %v4375_v22 = vpop.f32.mrb[77].mxu1 }
0x1215   : > { %v4414_v23 = vpop.f32.mrb[76].mxu0  ;;  %v4376_v36 = vadd.f32 %v4375_v22, %v4374_v51  ;;  %v4377_v34 = vpop.f32.mrb[78].mxu1 }
0x1216   : > { %v4415_v3 = vpop.f32.mrb[77].mxu0  ;;  %v4378_v7 = vpop.f32.mrb[79].mxu1 }
0x1217   : > { %v3667_v39 = vadd.f32 %v4376_v36, %v6740_v26  ;;  %v4416_v6 = vadd.f32 %v4415_v3, %v4414_v23  ;;  %v4417_v0 = vpop.f32.mrb[78].mxu0  ;;  %v4379_v43 = vadd.f32 %v4378_v7, %v4377_v34  ;;  %v5190_v23 = vld [vmem:[%s5611_s12] sm:$0xff]  ;;  %s5281_s12 = scalar_lea.vmem %s3873_s13, 1024 }
0x1218   : > { %v4418_v50 = vpop.f32.mrb[79].mxu0  ;;  %v3837_v36 = vrot.slane %v5190_v23, %v3836_v29  ;;  %v3849_v7 = vrot.slane %v5190_v23, %v3848_v63  ;;  %p5282_p1 = scmp.ne.s32.totalorder %s3873_s13, %s5281_s12  ;;  %p5289_p6 = scmp.lt.s32.totalorder %s5281_s12, %s5281_s12 }
0x1219   : > { %v3732_v55 = vadd.f32 %v4416_v6, %v3667_v39  ;;  %v3670_v28 = vadd.f32 %v4379_v43, %v6740_v26  ;;  %v4419_v47 = vadd.f32 %v4418_v50, %v4417_v0 }
0x121a   : > { %p5283_p7 = pnand %p5282_p1, %p4732_p12  ;;  %p5290_p2 = por %p5289_p6, %p5288_p5 }
0x121b   : > { %v3735_v11 = vadd.f32 %v4419_v47, %v3670_v28  ;;  %v3744_v10 = vadd.f32 %v3732_v55, %v6909_v17 }
0x121c   : > { %p5284_p3 = pneg %p5283_p7 }
0x121d   : > { %3758 = vadd.xlane.f32.xlu0 %v3744_v10  ;;  %v3745_v49 = vadd.f32 %v3735_v11, %v6910_v38 }
0x121e   : > { %p5291_p4 = pnand %p5290_p2, %p5284_p3 }
0x121f   : > { %3760 = vadd.xlane.f32.xlu1 %v3745_v49 }
0x1285   : > { %v3747_v53 = vpop.xlane.xlu0 %3746 }
0x1286   : > { %v3762_v40 = vmul.f32 0.0078125, %v3747_v53 }
0x1287   : > { %v3749_v44 = vpop.xlane.xlu1 %3748 }
0x1288   : > { %v3770_v15 = vsub.f32 %v6745_v12, %v3762_v40  ;;  %v3763_v54 = vmul.f32 0.0078125, %v3749_v44 }
0x128a   : > { %v3771_v46 = vsub.f32 %v6749_v21, %v3763_v54  ;;  %v3778_v13 = vmul.f32 %v3770_v15, %v3770_v15 }
0x128c   : > { %3786 = vadd.xlane.f32.xlu0 %v3778_v13  ;;  %v3779_v2 = vmul.f32 %v3771_v46, %v3771_v46 }
0x128e   : > { %3788 = vadd.xlane.f32.xlu1 %v3779_v2 }
0x128f   : > { %v3751_v26 = vpop.xlane.xlu0 %3750 }
0x1290   : > { %v3764_v24 = vmul.f32 0.0078125, %v3751_v26 }
0x1291   : > { %v3753_v19 = vpop.xlane.xlu1 %3752 }
0x1292   : > { %v3772_v30 = vsub.f32 %v3740_v31, %v3764_v24  ;;  %v3765_v41 = vmul.f32 0.0078125, %v3753_v19 }
0x1294   : > { %v6766_v62 = vsub.f32 %v3741_v57, %v3765_v41  ;;  %v3780_v35 = vmul.f32 %v3772_v30, %v3772_v30 }
0x1296   : > { %3790 = vadd.xlane.f32.xlu0 %v3780_v35  ;;  %v3781_v1 = vmul.f32 %v6766_v62, %v6766_v62 }
0x1298   : > { %3792 = vadd.xlane.f32.xlu1 %v3781_v1 }
0x129c   : > { %v3755_v12 = vpop.xlane.xlu0 %3754 }
0x129d   : > { %v3766_v18 = vmul.f32 0.0078125, %v3755_v12 }
0x129e   : > { %v3757_v21 = vpop.xlane.xlu1 %3756 }
0x129f   : > { %v6770_v14 = vsub.f32 %v3742_v9, %v3766_v18  ;;  %v3767_v16 = vmul.f32 0.0078125, %v3757_v21 }
0x12a1   : > { %v6772_v8 = vsub.f32 %v3743_v27, %v3767_v16  ;;  %v3782_v31 = vmul.f32 %v6770_v14, %v6770_v14 }
0x12a3   : > { %3794 = vadd.xlane.f32.xlu0 %v3782_v31  ;;  %v3783_v4 = vmul.f32 %v6772_v8, %v6772_v8 }
0x12a5   : > { %3796 = vadd.xlane.f32.xlu1 %v3783_v4 }
0x12aa   : > { %v3759_v57 = vpop.xlane.xlu0 %3758 }
0x12ab   : > { %v3768_v42 = vmul.f32 0.0078125, %v3759_v57 }
0x12ac   : > { %v3761_v56 = vpop.xlane.xlu1 %3760 }
0x12ad   : > { %v6778_v48 = vsub.f32 %v3744_v10, %v3768_v42  ;;  %v3769_v61 = vmul.f32 0.0078125, %v3761_v56 }
0x12af   : > { %v6780_v37 = vsub.f32 %v3745_v49, %v3769_v61  ;;  %v3784_v32 = vmul.f32 %v6778_v48, %v6778_v48 }
0x12b1   : > { %3798 = vadd.xlane.f32.xlu0 %v3784_v32  ;;  %v3785_v52 = vmul.f32 %v6780_v37, %v6780_v37 }
0x12b3   : > { %3800 = vadd.xlane.f32.xlu1 %v3785_v52 }
0x1319   : > { %v3787_v60 = vpop.xlane.xlu0 %3786 }
0x131a   : > { %v3802_v33 = vmul.f32 0.0078125, %v3787_v60 }
0x131b   : > { %v3789_v25 = vpop.xlane.xlu1 %3788 }
0x131c   : > { %v3810_v5 = vadd.f32 1e-05, %v3802_v33  ;;  %v3803_v20 = vmul.f32 0.0078125, %v3789_v25 }
0x131e   : > { %5165 = vrsqrt.f32 %v3810_v5  ;;  %v3811_v58 = vadd.f32 1e-05, %v3803_v20 }
0x1320   : > { %5167 = vrsqrt.f32 %v3811_v58 }
0x1323   : > { %v3791_v59 = vpop.xlane.xlu0 %3790 }
0x1324   : > { %v3804_v9 = vmul.f32 0.0078125, %v3791_v59 }
0x1325   : > { %v3793_v27 = vpop.xlane.xlu1 %3792 }
0x1326   : > { %v3812_v51 = vadd.f32 1e-05, %v3804_v9  ;;  %v3805_v22 = vmul.f32 0.0078125, %v3793_v27 }
0x1328   : > { %v5166_v34 = vpop.eup %5165  ;;  %5169 = vrsqrt.f32 %v3812_v51  ;;  %v3813_v3 = vadd.f32 1e-05, %v3805_v22 }
0x1329   : > { %v3826_v39 = vmul.f32 %v5166_v34, %v3770_v15 }
0x132a   : > { %v5168_v6 = vpop.eup %5167  ;;  %5171 = vrsqrt.f32 %v3813_v3 }
0x132b   : > { %v3838_v0 = vmul.f32 %v3837_v36, %v3826_v39  ;;  %v3827_v43 = vmul.f32 %v5168_v6, %v3771_v46 }
0x132d   : > { %v3850_v50 = vadd.f32 %v3849_v7, %v3838_v0  ;;  %v3839_v55 = vmul.f32 %v3837_v36, %v3827_v43 }
0x132f   : > { %3858 = vst [vmem:[#allocation8] sm:$0xff] %v3850_v50  ;;  %v3851_v28 = vadd.f32 %v3849_v7, %v3839_v55 }
0x1330   : > { %v3795_v47 = vpop.xlane.xlu0 %3794 }
0x1331   : > { %3859 = vst [vmem:[#allocation8 + $0x8] sm:$0xff] %v3851_v28  ;;  %v3806_v11 = vmul.f32 0.0078125, %v3795_v47 }
0x1332   : > { %v5170_v17 = vpop.eup %5169  ;;  %v3797_v10 = vpop.xlane.xlu1 %3796 }
0x1333   : > { %v3828_v38 = vmul.f32 %v5170_v17, %v3772_v30  ;;  %v3814_v49 = vadd.f32 1e-05, %v3806_v11  ;;  %v3807_v53 = vmul.f32 0.0078125, %v3797_v10 }
0x1334   : > { %v5172_v40 = vpop.eup %5171 }
0x1335   : > { %v3840_v44 = vmul.f32 %v3837_v36, %v3828_v38  ;;  %v3829_v15 = vmul.f32 %v5172_v40, %v6766_v62  ;;  %5173 = vrsqrt.f32 %v3814_v49  ;;  %v3815_v54 = vadd.f32 1e-05, %v3807_v53 }
0x1337   : > { %v3852_v13 = vadd.f32 %v3849_v7, %v3840_v44  ;;  %v3841_v46 = vmul.f32 %v3837_v36, %v3829_v15  ;;  %5175 = vrsqrt.f32 %v3815_v54 }
0x1339   : > { %3860 = vst [vmem:[#allocation8 + $0x10] sm:$0xff] %v3852_v13  ;;  %v3853_v2 = vadd.f32 %v3849_v7, %v3841_v46 }
0x133b   : > { %3861 = vst [vmem:[#allocation8 + $0x18] sm:$0xff] %v3853_v2 }
0x133e   : > { %v3799_v26 = vpop.xlane.xlu0 %3798 }
0x133f   : > { %v5174_v24 = vpop.eup %5173  ;;  %v3808_v19 = vmul.f32 0.0078125, %v3799_v26 }
0x1340   : > { %v3830_v41 = vmul.f32 %v5174_v24, %v6770_v14  ;;  %v3801_v30 = vpop.xlane.xlu1 %3800 }
0x1341   : > { %v5176_v35 = vpop.eup %5175  ;;  %v3816_v1 = vadd.f32 1e-05, %v3808_v19  ;;  %v3809_v12 = vmul.f32 0.0078125, %v3801_v30 }
0x1342   : > { %v3842_v18 = vmul.f32 %v3837_v36, %v3830_v41  ;;  %v3831_v62 = vmul.f32 %v5176_v35, %v6772_v8 }
0x1343   : > { %5177 = vrsqrt.f32 %v3816_v1  ;;  %v3817_v21 = vadd.f32 1e-05, %v3809_v12 }
0x1344   : > { %v3854_v16 = vadd.f32 %v3849_v7, %v3842_v18  ;;  %v3843_v31 = vmul.f32 %v3837_v36, %v3831_v62 }
0x1345   : > { %5179 = vrsqrt.f32 %v3817_v21 }
0x1346   : > { %3862 = vst [vmem:[#allocation8 + $0x20] sm:$0xff] %v3854_v16  ;;  %v3855_v4 = vadd.f32 %v3849_v7, %v3843_v31 }
0x1348   : > { %3863 = vst [vmem:[#allocation8 + $0x28] sm:$0xff] %v3855_v4 }
0x134d   : > { %v5178_v57 = vpop.eup %5177 }
0x134e   : > { %v3832_v14 = vmul.f32 %v5178_v57, %v6778_v48 }
0x134f   : > { %v5180_v42 = vpop.eup %5179 }
0x1350   : > { %v3844_v56 = vmul.f32 %v3837_v36, %v3832_v14  ;;  %v3833_v61 = vmul.f32 %v5180_v42, %v6780_v37 }
0x1352   : > { %v3856_v8 = vadd.f32 %v3849_v7, %v3844_v56  ;;  %v3845_v32 = vmul.f32 %v3837_v36, %v3833_v61 }
0x1354   : > { %3864 = vst [vmem:[#allocation8 + $0x30] sm:$0xff] %v3856_v8  ;;  %v3857_v52 = vadd.f32 %v3849_v7, %v3845_v32 }
0x1356   : > { %3865 = vst [vmem:[#allocation8 + $0x38] sm:$0xff] %v3857_v52 }
0x1357   : > { %5294 = shalt.err (!%p5291_p4)
}
0x1358   : > { %s5295_s24 = scalar_lea.hbm %s6840_s10, 1024 }
0x1359   : > { %p5296_p11 = scmp.ne.s32.totalorder %s6840_s10, %s5295_s24  ;;  %p5301_p9 = scmp.lt.u32.totalorder %s5295_s24, %s6840_s10 }
0x135b   : > { %p5297_p13 = pnand %p5296_p11, %p4732_p12 }
0x135d   : > { %p5298_p10 = pneg %p5297_p13 }
0x135f   : > { %p5303_p8 = pnand %p5301_p9, %p5298_p10 }
0x1361   : > { %5306 = shalt.err (!%p5303_p8)
}
0x1362   : > { %s5363_s26 = smov 128   ;;  %s5364_s29 = smov 8  }
0x1363   : > { %4718 = dma.vmem_to_hbm [thread:$0]  (%p4732_p12), %s3873_s13, 1024, %s6840_s10, [#allocation4], %s5363_s26, %s5363_s26, %s5364_s29  }
0x1364   : > { %5332 = dma.done.wait (%p4732_p12), [#allocation4], 1024  }
0x1365   : > { %5334 = vsyncadd (%p4732_p12), [#allocation4], 4294966272 }
0x1366 PF: > { %s6912_s16 = sld [smem:[#allocation12_spill]]  ;;  %s6913_s19 = sld [smem:[#allocation13_spill]] }
0x1367   : > { %s6914_s13 = smov %s5341_s14  ;;  %s6915_s14 = smov %s5345_s15 }
0x136c   : > { %p24_p0 = scmp.ge.s32.totalorder %s6912_s16, 4   ;;  %s6916_s15 = smov %s6913_s19 }
0x136e   :  { %26 = sbr.rel (!%p24_p0) target bundleno = 9 (0x9), region = 134 }
0x1375   :  { %3888 = vsyncpa [#allocation3], 1 }
0x1376   :  { %3890 = vsyncpa [#allocation3 + $0x1], 1 }
0x1377   :  { %3891 = vsyncpa [#allocation6], 1 }
0x1378   :  { %3893 = vsyncpa [#allocation6 + $0x1], 1 }
0x1379   :  { %3894 = vsyncpa [#allocation4], 1 }
0x137a   :  { %3896 = vsyncpa [#allocation4 + $0x1], 1 }

</bundles_post_ra>
